<compile_context>
chip_gen: v7x
topology: tpu7x:2x2x1
jax: 0.10.0
libtpu: 0.0.40
codegen_flags: <defaults>
</compile_context>

<pallas_src>
import math
import numpy as np
import jax
import jax.numpy as jnp
from jax import lax
from jax.experimental import pallas as pl
from jax.experimental.pallas import tpu as pltpu

# ----- model hyper-params (small, consistent with Block(n_heads, dim)) -----
B = 2            # batch
S = 8            # sequence length
D = 32           # model dim
H = 4            # n_heads
HD = D // H      # head_dim
NL = 4           # n_blocks (layers fused into one pallas_call)
N = B * S        # flattened token count
EPS = 1e-5
MULTIPLE_OF = 256
_hidden = int(2 * (4 * D) / 3)
HFF = MULTIPLE_OF * ((_hidden + MULTIPLE_OF - 1) // MULTIPLE_OF)   # 256 for D=32
SCALE = 1.0 / math.sqrt(HD)
NEG_BIG = -1e30
LOG2_S = int(math.log2(S))
assert S == (1 << LOG2_S)


def _rmsnorm_f32(t, g):
    # x * rsqrt(mean(x^2)+eps) * weight   (rsqrt -> EUP, frees VALU)
    return (t * lax.rsqrt(jnp.mean(t * t, axis=-1, keepdims=True) + EPS)) * g


def stack_kernel(x_ref, wqkv_ref, wo_ref, w13_ref, w2_ref, gan_ref, gfn_ref, out_ref):
    bf16 = jnp.bfloat16

    # block-diagonal causal mask over batch-major flattened tokens (built once)
    ri = lax.broadcasted_iota(jnp.int32, (N, N), 0)
    ci = lax.broadcasted_iota(jnp.int32, (N, N), 1)
    same_batch = jnp.right_shift(ri, LOG2_S) == jnp.right_shift(ci, LOG2_S)
    keep = jnp.logical_and(same_batch, ri >= ci)

    h = x_ref[...].astype(jnp.float32)                       # (N, D) carried activations

    for l in range(NL):                                      # static layer loop
        wqkv = wqkv_ref[l]                                   # (D, 3D)     bf16
        wo = wo_ref[l]                                       # (D, D)      f32 (tiny)
        w13 = w13_ref[l]                                     # (D, 2*HFF)  bf16
        w2 = w2_ref[l]                                       # (HFF, D)    bf16
        gan = gan_ref[l]                                     # (1, D)      f32
        gfn = gfn_ref[l]                                     # (1, D)      f32

        # ---------------- attention ----------------
        xn = _rmsnorm_f32(h, gan)
        qkv = jnp.dot(xn.astype(bf16), wqkv,
                      preferred_element_type=jnp.float32)    # (N, 3D) fused QKV

        attn = h                                             # residual accumulator
        for hh in range(H):
            qh = qkv[:, hh * HD:(hh + 1) * HD].astype(bf16)
            kh = qkv[:, D + hh * HD:D + (hh + 1) * HD].astype(bf16)
            vh = qkv[:, 2 * D + hh * HD:2 * D + (hh + 1) * HD].astype(bf16)
            # scores: contract head_dim of q and k directly (no explicit .T)
            s = lax.dot_general(qh, kh, (((1,), (1,)), ((), ())),
                                preferred_element_type=jnp.float32) * SCALE   # (N, N)
            s = jnp.where(keep, s, NEG_BIG)
            p = jnp.exp(s - jnp.max(s, axis=-1, keepdims=True))
            p = p * pl.reciprocal(jnp.sum(p, axis=-1, keepdims=True), approx=True)
            o = jnp.dot(p.astype(bf16), vh,
                        preferred_element_type=jnp.float32)                  # (N, HD)
            # fold the output projection per head slice (no concatenate)
            wo_h = wo[hh * HD:(hh + 1) * HD, :].astype(bf16)
            attn = attn + jnp.dot(o.astype(bf16), wo_h,
                                  preferred_element_type=jnp.float32)
        h = attn                                             # h = x + attn_out

        # ---------------- SwiGLU FFN ----------------
        hn = _rmsnorm_f32(h, gfn)
        up = jnp.dot(hn.astype(bf16), w13,
                     preferred_element_type=jnp.float32)     # (N, 2*HFF) lane-dense
        a = up[:, :HFF]
        b = up[:, HFF:]
        g = (a * jax.nn.sigmoid(a)) * b                      # SiLU(a) * b, f32
        h = h + jnp.dot(g.astype(bf16), w2,
                        preferred_element_type=jnp.float32)  # residual 2

    out_ref[...] = h.astype(out_ref.dtype)


def blocks_forward(x, params):
    """x: (B, S, D) f32 -> (B, S, D) f32; NL stacked Blocks, eval mode."""
    wqkv, wo, w13, w2, gan, gfn = params
    out = pl.pallas_call(
        stack_kernel,
        out_shape=jax.ShapeDtypeStruct((N, D), x.dtype),
        # No grid: single invocation, every operand fully VMEM-resident
        # (total working set ~260 KB, far below scoped VMEM on v5e/v6e/v7x,
        # so no multi-buffering / vmem_limit tuning is needed).
    )(x.reshape(N, D), wqkv, wo, w13, w2, gan, gfn)
    return out.reshape(B, S, D)


def blocks_reference(x, params):
    """Pure-JAX reference matching the PyTorch Block stack (eval mode),
    with the same mixed-precision policy (bf16 MXU operands, f32 accum)."""
    wqkv, wo, w13, w2, gan, gfn = params
    bf16 = jnp.bfloat16

    def rmsnorm(t, g):
        return t * lax.rsqrt(jnp.mean(t * t, axis=-1, keepdims=True) + EPS) * g

    def mm(a, w):
        return jnp.dot(a.astype(bf16), w.astype(bf16),
                       preferred_element_type=jnp.float32)

    causal = jnp.tril(jnp.ones((S, S), bool))
    h = x
    for l in range(NL):
        xn = rmsnorm(h, gan[l, 0])
        qkv = mm(xn, wqkv[l])                                         # (B, S, 3D)
        q, k, v = qkv[..., :D], qkv[..., D:2 * D], qkv[..., 2 * D:]
        qh = q.reshape(B, S, H, HD).transpose(0, 2, 1, 3)
        kh = k.reshape(B, S, H, HD).transpose(0, 2, 1, 3)
        vh = v.reshape(B, S, H, HD).transpose(0, 2, 1, 3)
        s = jnp.einsum('bhqd,bhkd->bhqk', qh.astype(bf16), kh.astype(bf16),
                       preferred_element_type=jnp.float32) / math.sqrt(HD)
        s = jnp.where(causal[None, None], s, NEG_BIG)
        p = jax.nn.softmax(s, axis=-1)
        ao = jnp.einsum('bhqk,bhkd->bhqd', p.astype(bf16), vh.astype(bf16),
                        preferred_element_type=jnp.float32)
        ao = ao.transpose(0, 2, 1, 3).reshape(B, S, D)
        h = h + mm(ao, wo[l])
        hn = rmsnorm(h, gfn[l, 0])
        up = mm(hn, w13[l])
        a, b = up[..., :HFF], up[..., HFF:]
        h = h + mm(jax.nn.silu(a) * b, w2[l])
    return h


def init_params(key):
    """Stacked per-layer weights, pre-transposed to (in, out).
    wqkv = [Wq^T | Wk^T | Wv^T], w13 = [w1^T | w3^T]. Big weights in bf16."""
    ks = jax.random.split(key, 4)
    scale = 0.05
    wqkv = (scale * jax.random.normal(ks[0], (NL, D, 3 * D), jnp.float32)).astype(jnp.bfloat16)
    wo = scale * jax.random.normal(ks[1], (NL, D, D), jnp.float32)
    w13 = (scale * jax.random.normal(ks[2], (NL, D, 2 * HFF), jnp.float32)).astype(jnp.bfloat16)
    w2 = (scale * jax.random.normal(ks[3], (NL, HFF, D), jnp.float32)).astype(jnp.bfloat16)
    gan = jnp.ones((NL, 1, D), jnp.float32)   # RMSNorm weights init to ones
    gfn = jnp.ones((NL, 1, D), jnp.float32)
    return (wqkv, wo, w13, w2, gan, gfn)


if __name__ == "__main__":
    key = jax.random.PRNGKey(0)
    kx, kp = jax.random.split(key)
    x = jax.random.normal(kx, (B, S, D), jnp.float32)
    params = init_params(kp)

    out = jax.block_until_ready(blocks_forward(x, params))
    ref = jax.block_until_ready(blocks_reference(x, params))

    np.testing.assert_allclose(np.asarray(out), np.asarray(ref), rtol=2e-2, atol=2e-2)
    print("KERNEL_OK")
</pallas_src>

<mosaic_0001>
module attributes {stable_mosaic.version = 11 : i64} {
  func.func @stack_kernel(%arg0: memref<16x32xf32, #tpu.memory_space<vmem>>, %arg1: memref<4x32x96xbf16, #tpu.memory_space<vmem>>, %arg2: memref<4x32x32xf32, #tpu.memory_space<vmem>>, %arg3: memref<4x32x512xbf16, #tpu.memory_space<vmem>>, %arg4: memref<4x256x32xbf16, #tpu.memory_space<vmem>>, %arg5: memref<4x1x32xf32, #tpu.memory_space<vmem>>, %arg6: memref<4x1x32xf32, #tpu.memory_space<vmem>>, %arg7: memref<16x32xf32, #tpu.memory_space<vmem>>) attributes {dimension_semantics = [], scalar_prefetch = 0 : i64, scratch_operands = 0 : i64, tpu.core_type = #tpu.core_type<tc>} {
    %0 = tpu.iota {dimensions = array<i32: 0>} : vector<16x16xi32>
    %1 = tpu.iota {dimensions = array<i32: 1>} : vector<16x16xi32>
    %c3_i32 = arith.constant 3 : i32
    %2 = vector.broadcast %c3_i32 : i32 to vector<16x16xi32>
    %3 = arith.shrsi %0, %2 : vector<16x16xi32>
    %c3_i32_0 = arith.constant 3 : i32
    %4 = vector.broadcast %c3_i32_0 : i32 to vector<16x16xi32>
    %5 = arith.shrsi %1, %4 : vector<16x16xi32>
    %6 = arith.cmpi eq, %3, %5 : vector<16x16xi32>
    %7 = arith.cmpi sge, %0, %1 : vector<16x16xi32>
    %8 = arith.andi %6, %7 : vector<16x16xi1>
    %c0 = arith.constant 0 : index
    %c0_1 = arith.constant 0 : index
    %9 = vector.load %arg0[%c0, %c0_1] : memref<16x32xf32, #tpu.memory_space<vmem>>, vector<16x32xf32>
    %c0_2 = arith.constant 0 : index
    %c0_3 = arith.constant 0 : index
    %c0_4 = arith.constant 0 : index
    %10 = vector.load %arg1[%c0_2, %c0_3, %c0_4] : memref<4x32x96xbf16, #tpu.memory_space<vmem>>, vector<1x32x96xbf16>
    %11 = vector.shape_cast %10 : vector<1x32x96xbf16> to vector<32x96xbf16>
    %c0_5 = arith.constant 0 : index
    %c0_6 = arith.constant 0 : index
    %c0_7 = arith.constant 0 : index
    %12 = vector.load %arg2[%c0_5, %c0_6, %c0_7] : memref<4x32x32xf32, #tpu.memory_space<vmem>>, vector<1x32x32xf32>
    %13 = vector.shape_cast %12 : vector<1x32x32xf32> to vector<32x32xf32>
    %c0_8 = arith.constant 0 : index
    %c0_9 = arith.constant 0 : index
    %c0_10 = arith.constant 0 : index
    %14 = vector.load %arg3[%c0_8, %c0_9, %c0_10] : memref<4x32x512xbf16, #tpu.memory_space<vmem>>, vector<1x32x512xbf16>
    %15 = vector.shape_cast %14 : vector<1x32x512xbf16> to vector<32x512xbf16>
    %c0_11 = arith.constant 0 : index
    %c0_12 = arith.constant 0 : index
    %c0_13 = arith.constant 0 : index
    %16 = vector.load %arg4[%c0_11, %c0_12, %c0_13] : memref<4x256x32xbf16, #tpu.memory_space<vmem>>, vector<1x256x32xbf16>
    %17 = vector.shape_cast %16 : vector<1x256x32xbf16> to vector<256x32xbf16>
    %c0_14 = arith.constant 0 : index
    %c0_15 = arith.constant 0 : index
    %c0_16 = arith.constant 0 : index
    %18 = vector.load %arg5[%c0_14, %c0_15, %c0_16] : memref<4x1x32xf32, #tpu.memory_space<vmem>>, vector<1x1x32xf32>
    %19 = vector.shape_cast %18 : vector<1x1x32xf32> to vector<1x32xf32>
    %c0_17 = arith.constant 0 : index
    %c0_18 = arith.constant 0 : index
    %c0_19 = arith.constant 0 : index
    %20 = vector.load %arg6[%c0_17, %c0_18, %c0_19] : memref<4x1x32xf32, #tpu.memory_space<vmem>>, vector<1x1x32xf32>
    %21 = vector.shape_cast %20 : vector<1x1x32xf32> to vector<1x32xf32>
    %22 = arith.mulf %9, %9 : vector<16x32xf32>
    %cst = arith.constant dense<0.000000e+00> : vector<16xf32>
    %23 = vector.multi_reduction <add>, %22, %cst [1] : vector<16x32xf32> to vector<16xf32>
    %24 = vector.shape_cast %23 : vector<16xf32> to vector<16x1xf32>
    %cst_20 = arith.constant 3.200000e+01 : f32
    %25 = vector.broadcast %cst_20 : f32 to vector<16x1xf32>
    %26 = arith.divf %24, %25 : vector<16x1xf32>
    %cst_21 = arith.constant 9.99999974E-6 : f32
    %27 = vector.broadcast %cst_21 : f32 to vector<16x1xf32>
    %28 = arith.addf %26, %27 : vector<16x1xf32>
    %29 = math.rsqrt %28 : vector<16x1xf32>
    %30 = vector.broadcast %29 : vector<16x1xf32> to vector<16x32xf32>
    %31 = arith.mulf %9, %30 : vector<16x32xf32>
    %32 = vector.broadcast %19 : vector<1x32xf32> to vector<16x32xf32>
    %33 = arith.mulf %31, %32 : vector<16x32xf32>
    %34 = arith.truncf %33 : vector<16x32xf32> to vector<16x32xbf16>
    %cst_22 = arith.constant dense<0.000000e+00> : vector<16x96xf32>
    %35 = tpu.matmul %34, %11, %cst_22 {dimension_numbers = #tpu.dot_dimension_numbers<[1], [0], [0], [1], [0, 0, 1, 1], [], []>} : vector<16x32xbf16>, vector<32x96xbf16>, vector<16x96xf32> -> vector<16x96xf32>
    %36 = vector.extract_strided_slice %35 {offsets = [0, 0], sizes = [16, 8], strides = [1, 1]} : vector<16x96xf32> to vector<16x8xf32>
    %37 = arith.truncf %36 : vector<16x8xf32> to vector<16x8xbf16>
    %38 = vector.extract_strided_slice %35 {offsets = [0, 32], sizes = [16, 8], strides = [1, 1]} : vector<16x96xf32> to vector<16x8xf32>
    %39 = arith.truncf %38 : vector<16x8xf32> to vector<16x8xbf16>
    %40 = vector.extract_strided_slice %35 {offsets = [0, 64], sizes = [16, 8], strides = [1, 1]} : vector<16x96xf32> to vector<16x8xf32>
    %41 = arith.truncf %40 : vector<16x8xf32> to vector<16x8xbf16>
    %cst_23 = arith.constant dense<0.000000e+00> : vector<16x16xf32>
    %42 = tpu.matmul %37, %39, %cst_23 {dimension_numbers = #tpu.dot_dimension_numbers<[1], [1], [0], [0], [0, 0, 1, 0], [], []>} : vector<16x8xbf16>, vector<16x8xbf16>, vector<16x16xf32> -> vector<16x16xf32>
    %cst_24 = arith.constant 0.353553385 : f32
    %43 = vector.broadcast %cst_24 : f32 to vector<16x16xf32>
    %44 = arith.mulf %42, %43 : vector<16x16xf32>
    %cst_25 = arith.constant -1.000000e+30 : f32
    %45 = vector.broadcast %cst_25 : f32 to vector<16x16xf32>
    %46 = arith.select %8, %44, %45 : vector<16x16xi1>, vector<16x16xf32>
    %cst_26 = arith.constant dense<0xFF800000> : vector<16xf32>
    %47 = vector.multi_reduction <maximumf>, %46, %cst_26 [1] : vector<16x16xf32> to vector<16xf32>
    %48 = vector.shape_cast %47 : vector<16xf32> to vector<16x1xf32>
    %49 = vector.broadcast %48 : vector<16x1xf32> to vector<16x16xf32>
    %50 = arith.subf %46, %49 : vector<16x16xf32>
    %51 = math.exp %50 : vector<16x16xf32>
    %cst_27 = arith.constant dense<0.000000e+00> : vector<16xf32>
    %52 = vector.multi_reduction <add>, %51, %cst_27 [1] : vector<16x16xf32> to vector<16xf32>
    %53 = vector.shape_cast %52 : vector<16xf32> to vector<16x1xf32>
    %54 = tpu.reciprocal %53 {approx = true} : vector<16x1xf32> -> vector<16x1xf32>
    %55 = vector.broadcast %54 : vector<16x1xf32> to vector<16x16xf32>
    %56 = arith.mulf %51, %55 : vector<16x16xf32>
    %57 = arith.truncf %56 : vector<16x16xf32> to vector<16x16xbf16>
    %cst_28 = arith.constant dense<0.000000e+00> : vector<16x8xf32>
    %58 = tpu.matmul %57, %41, %cst_28 {dimension_numbers = #tpu.dot_dimension_numbers<[1], [0], [0], [1], [0, 0, 1, 1], [], []>} : vector<16x16xbf16>, vector<16x8xbf16>, vector<16x8xf32> -> vector<16x8xf32>
    %59 = vector.extract_strided_slice %13 {offsets = [0, 0], sizes = [8, 32], strides = [1, 1]} : vector<32x32xf32> to vector<8x32xf32>
    %60 = arith.truncf %59 : vector<8x32xf32> to vector<8x32xbf16>
    %61 = arith.truncf %58 : vector<16x8xf32> to vector<16x8xbf16>
    %cst_29 = arith.constant dense<0.000000e+00> : vector<16x32xf32>
    %62 = tpu.matmul %61, %60, %cst_29 {dimension_numbers = #tpu.dot_dimension_numbers<[1], [0], [0], [1], [0, 0, 1, 1], [], []>} : vector<16x8xbf16>, vector<8x32xbf16>, vector<16x32xf32> -> vector<16x32xf32>
    %63 = arith.addf %9, %62 : vector<16x32xf32>
    %64 = vector.extract_strided_slice %35 {offsets = [0, 8], sizes = [16, 8], strides = [1, 1]} : vector<16x96xf32> to vector<16x8xf32>
    %65 = arith.truncf %64 : vector<16x8xf32> to vector<16x8xbf16>
    %66 = vector.extract_strided_slice %35 {offsets = [0, 40], sizes = [16, 8], strides = [1, 1]} : vector<16x96xf32> to vector<16x8xf32>
    %67 = arith.truncf %66 : vector<16x8xf32> to vector<16x8xbf16>
    %68 = vector.extract_strided_slice %35 {offsets = [0, 72], sizes = [16, 8], strides = [1, 1]} : vector<16x96xf32> to vector<16x8xf32>
    %69 = arith.truncf %68 : vector<16x8xf32> to vector<16x8xbf16>
    %cst_30 = arith.constant dense<0.000000e+00> : vector<16x16xf32>
    %70 = tpu.matmul %65, %67, %cst_30 {dimension_numbers = #tpu.dot_dimension_numbers<[1], [1], [0], [0], [0, 0, 1, 0], [], []>} : vector<16x8xbf16>, vector<16x8xbf16>, vector<16x16xf32> -> vector<16x16xf32>
    %cst_31 = arith.constant 0.353553385 : f32
    %71 = vector.broadcast %cst_31 : f32 to vector<16x16xf32>
    %72 = arith.mulf %70, %71 : vector<16x16xf32>
    %cst_32 = arith.constant -1.000000e+30 : f32
    %73 = vector.broadcast %cst_32 : f32 to vector<16x16xf32>
    %74 = arith.select %8, %72, %73 : vector<16x16xi1>, vector<16x16xf32>
    %cst_33 = arith.constant dense<0xFF800000> : vector<16xf32>
    %75 = vector.multi_reduction <maximumf>, %74, %cst_33 [1] : vector<16x16xf32> to vector<16xf32>
    %76 = vector.shape_cast %75 : vector<16xf32> to vector<16x1xf32>
    %77 = vector.broadcast %76 : vector<16x1xf32> to vector<16x16xf32>
    %78 = arith.subf %74, %77 : vector<16x16xf32>
    %79 = math.exp %78 : vector<16x16xf32>
    %cst_34 = arith.constant dense<0.000000e+00> : vector<16xf32>
    %80 = vector.multi_reduction <add>, %79, %cst_34 [1] : vector<16x16xf32> to vector<16xf32>
    %81 = vector.shape_cast %80 : vector<16xf32> to vector<16x1xf32>
    %82 = tpu.reciprocal %81 {approx = true} : vector<16x1xf32> -> vector<16x1xf32>
    %83 = vector.broadcast %82 : vector<16x1xf32> to vector<16x16xf32>
    %84 = arith.mulf %79, %83 : vector<16x16xf32>
    %85 = arith.truncf %84 : vector<16x16xf32> to vector<16x16xbf16>
    %cst_35 = arith.constant dense<0.000000e+00> : vector<16x8xf32>
    %86 = tpu.matmul %85, %69, %cst_35 {dimension_numbers = #tpu.dot_dimension_numbers<[1], [0], [0], [1], [0, 0, 1, 1], [], []>} : vector<16x16xbf16>, vector<16x8xbf16>, vector<16x8xf32> -> vector<16x8xf32>
    %87 = vector.extract_strided_slice %13 {offsets = [8, 0], sizes = [8, 32], strides = [1, 1]} : vector<32x32xf32> to vector<8x32xf32>
    %88 = arith.truncf %87 : vector<8x32xf32> to vector<8x32xbf16>
    %89 = arith.truncf %86 : vector<16x8xf32> to vector<16x8xbf16>
    %cst_36 = arith.constant dense<0.000000e+00> : vector<16x32xf32>
    %90 = tpu.matmul %89, %88, %cst_36 {dimension_numbers = #tpu.dot_dimension_numbers<[1], [0], [0], [1], [0, 0, 1, 1], [], []>} : vector<16x8xbf16>, vector<8x32xbf16>, vector<16x32xf32> -> vector<16x32xf32>
    %91 = arith.addf %63, %90 : vector<16x32xf32>
    %92 = vector.extract_strided_slice %35 {offsets = [0, 16], sizes = [16, 8], strides = [1, 1]} : vector<16x96xf32> to vector<16x8xf32>
    %93 = arith.truncf %92 : vector<16x8xf32> to vector<16x8xbf16>
    %94 = vector.extract_strided_slice %35 {offsets = [0, 48], sizes = [16, 8], strides = [1, 1]} : vector<16x96xf32> to vector<16x8xf32>
    %95 = arith.truncf %94 : vector<16x8xf32> to vector<16x8xbf16>
    %96 = vector.extract_strided_slice %35 {offsets = [0, 80], sizes = [16, 8], strides = [1, 1]} : vector<16x96xf32> to vector<16x8xf32>
    %97 = arith.truncf %96 : vector<16x8xf32> to vector<16x8xbf16>
    %cst_37 = arith.constant dense<0.000000e+00> : vector<16x16xf32>
    %98 = tpu.matmul %93, %95, %cst_37 {dimension_numbers = #tpu.dot_dimension_numbers<[1], [1], [0], [0], [0, 0, 1, 0], [], []>} : vector<16x8xbf16>, vector<16x8xbf16>, vector<16x16xf32> -> vector<16x16xf32>
    %cst_38 = arith.constant 0.353553385 : f32
    %99 = vector.broadcast %cst_38 : f32 to vector<16x16xf32>
    %100 = arith.mulf %98, %99 : vector<16x16xf32>
    %cst_39 = arith.constant -1.000000e+30 : f32
    %101 = vector.broadcast %cst_39 : f32 to vector<16x16xf32>
    %102 = arith.select %8, %100, %101 : vector<16x16xi1>, vector<16x16xf32>
    %cst_40 = arith.constant dense<0xFF800000> : vector<16xf32>
    %103 = vector.multi_reduction <maximumf>, %102, %cst_40 [1] : vector<16x16xf32> to vector<16xf32>
    %104 = vector.shape_cast %103 : vector<16xf32> to vector<16x1xf32>
    %105 = vector.broadcast %104 : vector<16x1xf32> to vector<16x16xf32>
    %106 = arith.subf %102, %105 : vector<16x16xf32>
    %107 = math.exp %106 : vector<16x16xf32>
    %cst_41 = arith.constant dense<0.000000e+00> : vector<16xf32>
    %108 = vector.multi_reduction <add>, %107, %cst_41 [1] : vector<16x16xf32> to vector<16xf32>
    %109 = vector.shape_cast %108 : vector<16xf32> to vector<16x1xf32>
    %110 = tpu.reciprocal %109 {approx = true} : vector<16x1xf32> -> vector<16x1xf32>
    %111 = vector.broadcast %110 : vector<16x1xf32> to vector<16x16xf32>
    %112 = arith.mulf %107, %111 : vector<16x16xf32>
    %113 = arith.truncf %112 : vector<16x16xf32> to vector<16x16xbf16>
    %cst_42 = arith.constant dense<0.000000e+00> : vector<16x8xf32>
    %114 = tpu.matmul %113, %97, %cst_42 {dimension_numbers = #tpu.dot_dimension_numbers<[1], [0], [0], [1], [0, 0, 1, 1], [], []>} : vector<16x16xbf16>, vector<16x8xbf16>, vector<16x8xf32> -> vector<16x8xf32>
    %115 = vector.extract_strided_slice %13 {offsets = [16, 0], sizes = [8, 32], strides = [1, 1]} : vector<32x32xf32> to vector<8x32xf32>
    %116 = arith.truncf %115 : vector<8x32xf32> to vector<8x32xbf16>
    %117 = arith.truncf %114 : vector<16x8xf32> to vector<16x8xbf16>
    %cst_43 = arith.constant dense<0.000000e+00> : vector<16x32xf32>
    %118 = tpu.matmul %117, %116, %cst_43 {dimension_numbers = #tpu.dot_dimension_numbers<[1], [0], [0], [1], [0, 0, 1, 1], [], []>} : vector<16x8xbf16>, vector<8x32xbf16>, vector<16x32xf32> -> vector<16x32xf32>
    %119 = arith.addf %91, %118 : vector<16x32xf32>
    %120 = vector.extract_strided_slice %35 {offsets = [0, 24], sizes = [16, 8], strides = [1, 1]} : vector<16x96xf32> to vector<16x8xf32>
    %121 = arith.truncf %120 : vector<16x8xf32> to vector<16x8xbf16>
    %122 = vector.extract_strided_slice %35 {offsets = [0, 56], sizes = [16, 8], strides = [1, 1]} : vector<16x96xf32> to vector<16x8xf32>
    %123 = arith.truncf %122 : vector<16x8xf32> to vector<16x8xbf16>
    %124 = vector.extract_strided_slice %35 {offsets = [0, 88], sizes = [16, 8], strides = [1, 1]} : vector<16x96xf32> to vector<16x8xf32>
    %125 = arith.truncf %124 : vector<16x8xf32> to vector<16x8xbf16>
    %cst_44 = arith.constant dense<0.000000e+00> : vector<16x16xf32>
    %126 = tpu.matmul %121, %123, %cst_44 {dimension_numbers = #tpu.dot_dimension_numbers<[1], [1], [0], [0], [0, 0, 1, 0], [], []>} : vector<16x8xbf16>, vector<16x8xbf16>, vector<16x16xf32> -> vector<16x16xf32>
    %cst_45 = arith.constant 0.353553385 : f32
    %127 = vector.broadcast %cst_45 : f32 to vector<16x16xf32>
    %128 = arith.mulf %126, %127 : vector<16x16xf32>
    %cst_46 = arith.constant -1.000000e+30 : f32
    %129 = vector.broadcast %cst_46 : f32 to vector<16x16xf32>
    %130 = arith.select %8, %128, %129 : vector<16x16xi1>, vector<16x16xf32>
    %cst_47 = arith.constant dense<0xFF800000> : vector<16xf32>
    %131 = vector.multi_reduction <maximumf>, %130, %cst_47 [1] : vector<16x16xf32> to vector<16xf32>
    %132 = vector.shape_cast %131 : vector<16xf32> to vector<16x1xf32>
    %133 = vector.broadcast %132 : vector<16x1xf32> to vector<16x16xf32>
    %134 = arith.subf %130, %133 : vector<16x16xf32>
    %135 = math.exp %134 : vector<16x16xf32>
    %cst_48 = arith.constant dense<0.000000e+00> : vector<16xf32>
    %136 = vector.multi_reduction <add>, %135, %cst_48 [1] : vector<16x16xf32> to vector<16xf32>
    %137 = vector.shape_cast %136 : vector<16xf32> to vector<16x1xf32>
    %138 = tpu.reciprocal %137 {approx = true} : vector<16x1xf32> -> vector<16x1xf32>
    %139 = vector.broadcast %138 : vector<16x1xf32> to vector<16x16xf32>
    %140 = arith.mulf %135, %139 : vector<16x16xf32>
    %141 = arith.truncf %140 : vector<16x16xf32> to vector<16x16xbf16>
    %cst_49 = arith.constant dense<0.000000e+00> : vector<16x8xf32>
    %142 = tpu.matmul %141, %125, %cst_49 {dimension_numbers = #tpu.dot_dimension_numbers<[1], [0], [0], [1], [0, 0, 1, 1], [], []>} : vector<16x16xbf16>, vector<16x8xbf16>, vector<16x8xf32> -> vector<16x8xf32>
    %143 = vector.extract_strided_slice %13 {offsets = [24, 0], sizes = [8, 32], strides = [1, 1]} : vector<32x32xf32> to vector<8x32xf32>
    %144 = arith.truncf %143 : vector<8x32xf32> to vector<8x32xbf16>
    %145 = arith.truncf %142 : vector<16x8xf32> to vector<16x8xbf16>
    %cst_50 = arith.constant dense<0.000000e+00> : vector<16x32xf32>
    %146 = tpu.matmul %145, %144, %cst_50 {dimension_numbers = #tpu.dot_dimension_numbers<[1], [0], [0], [1], [0, 0, 1, 1], [], []>} : vector<16x8xbf16>, vector<8x32xbf16>, vector<16x32xf32> -> vector<16x32xf32>
    %147 = arith.addf %119, %146 : vector<16x32xf32>
    %148 = arith.mulf %147, %147 : vector<16x32xf32>
    %cst_51 = arith.constant dense<0.000000e+00> : vector<16xf32>
    %149 = vector.multi_reduction <add>, %148, %cst_51 [1] : vector<16x32xf32> to vector<16xf32>
    %150 = vector.shape_cast %149 : vector<16xf32> to vector<16x1xf32>
    %cst_52 = arith.constant 3.200000e+01 : f32
    %151 = vector.broadcast %cst_52 : f32 to vector<16x1xf32>
    %152 = arith.divf %150, %151 : vector<16x1xf32>
    %cst_53 = arith.constant 9.99999974E-6 : f32
    %153 = vector.broadcast %cst_53 : f32 to vector<16x1xf32>
    %154 = arith.addf %152, %153 : vector<16x1xf32>
    %155 = math.rsqrt %154 : vector<16x1xf32>
    %156 = vector.broadcast %155 : vector<16x1xf32> to vector<16x32xf32>
    %157 = arith.mulf %147, %156 : vector<16x32xf32>
    %158 = vector.broadcast %21 : vector<1x32xf32> to vector<16x32xf32>
    %159 = arith.mulf %157, %158 : vector<16x32xf32>
    %160 = arith.truncf %159 : vector<16x32xf32> to vector<16x32xbf16>
    %cst_54 = arith.constant dense<0.000000e+00> : vector<16x512xf32>
    %161 = tpu.matmul %160, %15, %cst_54 {dimension_numbers = #tpu.dot_dimension_numbers<[1], [0], [0], [1], [0, 0, 1, 1], [], []>} : vector<16x32xbf16>, vector<32x512xbf16>, vector<16x512xf32> -> vector<16x512xf32>
    %162 = vector.extract_strided_slice %161 {offsets = [0, 0], sizes = [16, 256], strides = [1, 1]} : vector<16x512xf32> to vector<16x256xf32>
    %163 = vector.extract_strided_slice %161 {offsets = [0, 256], sizes = [16, 256], strides = [1, 1]} : vector<16x512xf32> to vector<16x256xf32>
    %164 = arith.negf %162 : vector<16x256xf32>
    %165 = math.exp %164 : vector<16x256xf32>
    %cst_55 = arith.constant 1.000000e+00 : f32
    %166 = vector.broadcast %cst_55 : f32 to vector<16x256xf32>
    %167 = arith.addf %166, %165 : vector<16x256xf32>
    %168 = arith.divf %166, %167 : vector<16x256xf32>
    %169 = arith.mulf %162, %168 : vector<16x256xf32>
    %170 = arith.mulf %169, %163 : vector<16x256xf32>
    %171 = arith.truncf %170 : vector<16x256xf32> to vector<16x256xbf16>
    %cst_56 = arith.constant dense<0.000000e+00> : vector<16x32xf32>
    %172 = tpu.matmul %171, %17, %cst_56 {dimension_numbers = #tpu.dot_dimension_numbers<[1], [0], [0], [1], [0, 0, 1, 1], [], []>} : vector<16x256xbf16>, vector<256x32xbf16>, vector<16x32xf32> -> vector<16x32xf32>
    %173 = arith.addf %147, %172 : vector<16x32xf32>
    %c1 = arith.constant 1 : index
    %c0_57 = arith.constant 0 : index
    %c0_58 = arith.constant 0 : index
    %174 = vector.load %arg1[%c1, %c0_57, %c0_58] : memref<4x32x96xbf16, #tpu.memory_space<vmem>>, vector<1x32x96xbf16>
    %175 = vector.shape_cast %174 : vector<1x32x96xbf16> to vector<32x96xbf16>
    %c1_59 = arith.constant 1 : index
    %c0_60 = arith.constant 0 : index
    %c0_61 = arith.constant 0 : index
    %176 = vector.load %arg2[%c1_59, %c0_60, %c0_61] : memref<4x32x32xf32, #tpu.memory_space<vmem>>, vector<1x32x32xf32>
    %177 = vector.shape_cast %176 : vector<1x32x32xf32> to vector<32x32xf32>
    %c1_62 = arith.constant 1 : index
    %c0_63 = arith.constant 0 : index
    %c0_64 = arith.constant 0 : index
    %178 = vector.load %arg3[%c1_62, %c0_63, %c0_64] : memref<4x32x512xbf16, #tpu.memory_space<vmem>>, vector<1x32x512xbf16>
    %179 = vector.shape_cast %178 : vector<1x32x512xbf16> to vector<32x512xbf16>
    %c1_65 = arith.constant 1 : index
    %c0_66 = arith.constant 0 : index
    %c0_67 = arith.constant 0 : index
    %180 = vector.load %arg4[%c1_65, %c0_66, %c0_67] : memref<4x256x32xbf16, #tpu.memory_space<vmem>>, vector<1x256x32xbf16>
    %181 = vector.shape_cast %180 : vector<1x256x32xbf16> to vector<256x32xbf16>
    %c1_68 = arith.constant 1 : index
    %c0_69 = arith.constant 0 : index
    %c0_70 = arith.constant 0 : index
    %182 = vector.load %arg5[%c1_68, %c0_69, %c0_70] : memref<4x1x32xf32, #tpu.memory_space<vmem>>, vector<1x1x32xf32>
    %183 = vector.shape_cast %182 : vector<1x1x32xf32> to vector<1x32xf32>
    %c1_71 = arith.constant 1 : index
    %c0_72 = arith.constant 0 : index
    %c0_73 = arith.constant 0 : index
    %184 = vector.load %arg6[%c1_71, %c0_72, %c0_73] : memref<4x1x32xf32, #tpu.memory_space<vmem>>, vector<1x1x32xf32>
    %185 = vector.shape_cast %184 : vector<1x1x32xf32> to vector<1x32xf32>
    %186 = arith.mulf %173, %173 : vector<16x32xf32>
    %cst_74 = arith.constant dense<0.000000e+00> : vector<16xf32>
    %187 = vector.multi_reduction <add>, %186, %cst_74 [1] : vector<16x32xf32> to vector<16xf32>
    %188 = vector.shape_cast %187 : vector<16xf32> to vector<16x1xf32>
    %cst_75 = arith.constant 3.200000e+01 : f32
    %189 = vector.broadcast %cst_75 : f32 to vector<16x1xf32>
    %190 = arith.divf %188, %189 : vector<16x1xf32>
    %cst_76 = arith.constant 9.99999974E-6 : f32
    %191 = vector.broadcast %cst_76 : f32 to vector<16x1xf32>
    %192 = arith.addf %190, %191 : vector<16x1xf32>
    %193 = math.rsqrt %192 : vector<16x1xf32>
    %194 = vector.broadcast %193 : vector<16x1xf32> to vector<16x32xf32>
    %195 = arith.mulf %173, %194 : vector<16x32xf32>
    %196 = vector.broadcast %183 : vector<1x32xf32> to vector<16x32xf32>
    %197 = arith.mulf %195, %196 : vector<16x32xf32>
    %198 = arith.truncf %197 : vector<16x32xf32> to vector<16x32xbf16>
    %cst_77 = arith.constant dense<0.000000e+00> : vector<16x96xf32>
    %199 = tpu.matmul %198, %175, %cst_77 {dimension_numbers = #tpu.dot_dimension_numbers<[1], [0], [0], [1], [0, 0, 1, 1], [], []>} : vector<16x32xbf16>, vector<32x96xbf16>, vector<16x96xf32> -> vector<16x96xf32>
    %200 = vector.extract_strided_slice %199 {offsets = [0, 0], sizes = [16, 8], strides = [1, 1]} : vector<16x96xf32> to vector<16x8xf32>
    %201 = arith.truncf %200 : vector<16x8xf32> to vector<16x8xbf16>
    %202 = vector.extract_strided_slice %199 {offsets = [0, 32], sizes = [16, 8], strides = [1, 1]} : vector<16x96xf32> to vector<16x8xf32>
    %203 = arith.truncf %202 : vector<16x8xf32> to vector<16x8xbf16>
    %204 = vector.extract_strided_slice %199 {offsets = [0, 64], sizes = [16, 8], strides = [1, 1]} : vector<16x96xf32> to vector<16x8xf32>
    %205 = arith.truncf %204 : vector<16x8xf32> to vector<16x8xbf16>
    %cst_78 = arith.constant dense<0.000000e+00> : vector<16x16xf32>
    %206 = tpu.matmul %201, %203, %cst_78 {dimension_numbers = #tpu.dot_dimension_numbers<[1], [1], [0], [0], [0, 0, 1, 0], [], []>} : vector<16x8xbf16>, vector<16x8xbf16>, vector<16x16xf32> -> vector<16x16xf32>
    %cst_79 = arith.constant 0.353553385 : f32
    %207 = vector.broadcast %cst_79 : f32 to vector<16x16xf32>
    %208 = arith.mulf %206, %207 : vector<16x16xf32>
    %cst_80 = arith.constant -1.000000e+30 : f32
    %209 = vector.broadcast %cst_80 : f32 to vector<16x16xf32>
    %210 = arith.select %8, %208, %209 : vector<16x16xi1>, vector<16x16xf32>
    %cst_81 = arith.constant dense<0xFF800000> : vector<16xf32>
    %211 = vector.multi_reduction <maximumf>, %210, %cst_81 [1] : vector<16x16xf32> to vector<16xf32>
    %212 = vector.shape_cast %211 : vector<16xf32> to vector<16x1xf32>
    %213 = vector.broadcast %212 : vector<16x1xf32> to vector<16x16xf32>
    %214 = arith.subf %210, %213 : vector<16x16xf32>
    %215 = math.exp %214 : vector<16x16xf32>
    %cst_82 = arith.constant dense<0.000000e+00> : vector<16xf32>
    %216 = vector.multi_reduction <add>, %215, %cst_82 [1] : vector<16x16xf32> to vector<16xf32>
    %217 = vector.shape_cast %216 : vector<16xf32> to vector<16x1xf32>
    %218 = tpu.reciprocal %217 {approx = true} : vector<16x1xf32> -> vector<16x1xf32>
    %219 = vector.broadcast %218 : vector<16x1xf32> to vector<16x16xf32>
    %220 = arith.mulf %215, %219 : vector<16x16xf32>
    %221 = arith.truncf %220 : vector<16x16xf32> to vector<16x16xbf16>
    %cst_83 = arith.constant dense<0.000000e+00> : vector<16x8xf32>
    %222 = tpu.matmul %221, %205, %cst_83 {dimension_numbers = #tpu.dot_dimension_numbers<[1], [0], [0], [1], [0, 0, 1, 1], [], []>} : vector<16x16xbf16>, vector<16x8xbf16>, vector<16x8xf32> -> vector<16x8xf32>
    %223 = vector.extract_strided_slice %177 {offsets = [0, 0], sizes = [8, 32], strides = [1, 1]} : vector<32x32xf32> to vector<8x32xf32>
    %224 = arith.truncf %223 : vector<8x32xf32> to vector<8x32xbf16>
    %225 = arith.truncf %222 : vector<16x8xf32> to vector<16x8xbf16>
    %cst_84 = arith.constant dense<0.000000e+00> : vector<16x32xf32>
    %226 = tpu.matmul %225, %224, %cst_84 {dimension_numbers = #tpu.dot_dimension_numbers<[1], [0], [0], [1], [0, 0, 1, 1], [], []>} : vector<16x8xbf16>, vector<8x32xbf16>, vector<16x32xf32> -> vector<16x32xf32>
    %227 = arith.addf %173, %226 : vector<16x32xf32>
    %228 = vector.extract_strided_slice %199 {offsets = [0, 8], sizes = [16, 8], strides = [1, 1]} : vector<16x96xf32> to vector<16x8xf32>
    %229 = arith.truncf %228 : vector<16x8xf32> to vector<16x8xbf16>
    %230 = vector.extract_strided_slice %199 {offsets = [0, 40], sizes = [16, 8], strides = [1, 1]} : vector<16x96xf32> to vector<16x8xf32>
    %231 = arith.truncf %230 : vector<16x8xf32> to vector<16x8xbf16>
    %232 = vector.extract_strided_slice %199 {offsets = [0, 72], sizes = [16, 8], strides = [1, 1]} : vector<16x96xf32> to vector<16x8xf32>
    %233 = arith.truncf %232 : vector<16x8xf32> to vector<16x8xbf16>
    %cst_85 = arith.constant dense<0.000000e+00> : vector<16x16xf32>
    %234 = tpu.matmul %229, %231, %cst_85 {dimension_numbers = #tpu.dot_dimension_numbers<[1], [1], [0], [0], [0, 0, 1, 0], [], []>} : vector<16x8xbf16>, vector<16x8xbf16>, vector<16x16xf32> -> vector<16x16xf32>
    %cst_86 = arith.constant 0.353553385 : f32
    %235 = vector.broadcast %cst_86 : f32 to vector<16x16xf32>
    %236 = arith.mulf %234, %235 : vector<16x16xf32>
    %cst_87 = arith.constant -1.000000e+30 : f32
    %237 = vector.broadcast %cst_87 : f32 to vector<16x16xf32>
    %238 = arith.select %8, %236, %237 : vector<16x16xi1>, vector<16x16xf32>
    %cst_88 = arith.constant dense<0xFF800000> : vector<16xf32>
    %239 = vector.multi_reduction <maximumf>, %238, %cst_88 [1] : vector<16x16xf32> to vector<16xf32>
    %240 = vector.shape_cast %239 : vector<16xf32> to vector<16x1xf32>
    %241 = vector.broadcast %240 : vector<16x1xf32> to vector<16x16xf32>
    %242 = arith.subf %238, %241 : vector<16x16xf32>
    %243 = math.exp %242 : vector<16x16xf32>
    %cst_89 = arith.constant dense<0.000000e+00> : vector<16xf32>
    %244 = vector.multi_reduction <add>, %243, %cst_89 [1] : vector<16x16xf32> to vector<16xf32>
    %245 = vector.shape_cast %244 : vector<16xf32> to vector<16x1xf32>
    %246 = tpu.reciprocal %245 {approx = true} : vector<16x1xf32> -> vector<16x1xf32>
    %247 = vector.broadcast %246 : vector<16x1xf32> to vector<16x16xf32>
    %248 = arith.mulf %243, %247 : vector<16x16xf32>
    %249 = arith.truncf %248 : vector<16x16xf32> to vector<16x16xbf16>
    %cst_90 = arith.constant dense<0.000000e+00> : vector<16x8xf32>
    %250 = tpu.matmul %249, %233, %cst_90 {dimension_numbers = #tpu.dot_dimension_numbers<[1], [0], [0], [1], [0, 0, 1, 1], [], []>} : vector<16x16xbf16>, vector<16x8xbf16>, vector<16x8xf32> -> vector<16x8xf32>
    %251 = vector.extract_strided_slice %177 {offsets = [8, 0], sizes = [8, 32], strides = [1, 1]} : vector<32x32xf32> to vector<8x32xf32>
    %252 = arith.truncf %251 : vector<8x32xf32> to vector<8x32xbf16>
    %253 = arith.truncf %250 : vector<16x8xf32> to vector<16x8xbf16>
    %cst_91 = arith.constant dense<0.000000e+00> : vector<16x32xf32>
    %254 = tpu.matmul %253, %252, %cst_91 {dimension_numbers = #tpu.dot_dimension_numbers<[1], [0], [0], [1], [0, 0, 1, 1], [], []>} : vector<16x8xbf16>, vector<8x32xbf16>, vector<16x32xf32> -> vector<16x32xf32>
    %255 = arith.addf %227, %254 : vector<16x32xf32>
    %256 = vector.extract_strided_slice %199 {offsets = [0, 16], sizes = [16, 8], strides = [1, 1]} : vector<16x96xf32> to vector<16x8xf32>
    %257 = arith.truncf %256 : vector<16x8xf32> to vector<16x8xbf16>
    %258 = vector.extract_strided_slice %199 {offsets = [0, 48], sizes = [16, 8], strides = [1, 1]} : vector<16x96xf32> to vector<16x8xf32>
    %259 = arith.truncf %258 : vector<16x8xf32> to vector<16x8xbf16>
    %260 = vector.extract_strided_slice %199 {offsets = [0, 80], sizes = [16, 8], strides = [1, 1]} : vector<16x96xf32> to vector<16x8xf32>
    %261 = arith.truncf %260 : vector<16x8xf32> to vector<16x8xbf16>
    %cst_92 = arith.constant dense<0.000000e+00> : vector<16x16xf32>
    %262 = tpu.matmul %257, %259, %cst_92 {dimension_numbers = #tpu.dot_dimension_numbers<[1], [1], [0], [0], [0, 0, 1, 0], [], []>} : vector<16x8xbf16>, vector<16x8xbf16>, vector<16x16xf32> -> vector<16x16xf32>
    %cst_93 = arith.constant 0.353553385 : f32
    %263 = vector.broadcast %cst_93 : f32 to vector<16x16xf32>
    %264 = arith.mulf %262, %263 : vector<16x16xf32>
    %cst_94 = arith.constant -1.000000e+30 : f32
    %265 = vector.broadcast %cst_94 : f32 to vector<16x16xf32>
    %266 = arith.select %8, %264, %265 : vector<16x16xi1>, vector<16x16xf32>
    %cst_95 = arith.constant dense<0xFF800000> : vector<16xf32>
    %267 = vector.multi_reduction <maximumf>, %266, %cst_95 [1] : vector<16x16xf32> to vector<16xf32>
    %268 = vector.shape_cast %267 : vector<16xf32> to vector<16x1xf32>
    %269 = vector.broadcast %268 : vector<16x1xf32> to vector<16x16xf32>
    %270 = arith.subf %266, %269 : vector<16x16xf32>
    %271 = math.exp %270 : vector<16x16xf32>
    %cst_96 = arith.constant dense<0.000000e+00> : vector<16xf32>
    %272 = vector.multi_reduction <add>, %271, %cst_96 [1] : vector<16x16xf32> to vector<16xf32>
    %273 = vector.shape_cast %272 : vector<16xf32> to vector<16x1xf32>
    %274 = tpu.reciprocal %273 {approx = true} : vector<16x1xf32> -> vector<16x1xf32>
    %275 = vector.broadcast %274 : vector<16x1xf32> to vector<16x16xf32>
    %276 = arith.mulf %271, %275 : vector<16x16xf32>
    %277 = arith.truncf %276 : vector<16x16xf32> to vector<16x16xbf16>
    %cst_97 = arith.constant dense<0.000000e+00> : vector<16x8xf32>
    %278 = tpu.matmul %277, %261, %cst_97 {dimension_numbers = #tpu.dot_dimension_numbers<[1], [0], [0], [1], [0, 0, 1, 1], [], []>} : vector<16x16xbf16>, vector<16x8xbf16>, vector<16x8xf32> -> vector<16x8xf32>
    %279 = vector.extract_strided_slice %177 {offsets = [16, 0], sizes = [8, 32], strides = [1, 1]} : vector<32x32xf32> to vector<8x32xf32>
    %280 = arith.truncf %279 : vector<8x32xf32> to vector<8x32xbf16>
    %281 = arith.truncf %278 : vector<16x8xf32> to vector<16x8xbf16>
    %cst_98 = arith.constant dense<0.000000e+00> : vector<16x32xf32>
    %282 = tpu.matmul %281, %280, %cst_98 {dimension_numbers = #tpu.dot_dimension_numbers<[1], [0], [0], [1], [0, 0, 1, 1], [], []>} : vector<16x8xbf16>, vector<8x32xbf16>, vector<16x32xf32> -> vector<16x32xf32>
    %283 = arith.addf %255, %282 : vector<16x32xf32>
    %284 = vector.extract_strided_slice %199 {offsets = [0, 24], sizes = [16, 8], strides = [1, 1]} : vector<16x96xf32> to vector<16x8xf32>
    %285 = arith.truncf %284 : vector<16x8xf32> to vector<16x8xbf16>
    %286 = vector.extract_strided_slice %199 {offsets = [0, 56], sizes = [16, 8], strides = [1, 1]} : vector<16x96xf32> to vector<16x8xf32>
    %287 = arith.truncf %286 : vector<16x8xf32> to vector<16x8xbf16>
    %288 = vector.extract_strided_slice %199 {offsets = [0, 88], sizes = [16, 8], strides = [1, 1]} : vector<16x96xf32> to vector<16x8xf32>
    %289 = arith.truncf %288 : vector<16x8xf32> to vector<16x8xbf16>
    %cst_99 = arith.constant dense<0.000000e+00> : vector<16x16xf32>
    %290 = tpu.matmul %285, %287, %cst_99 {dimension_numbers = #tpu.dot_dimension_numbers<[1], [1], [0], [0], [0, 0, 1, 0], [], []>} : vector<16x8xbf16>, vector<16x8xbf16>, vector<16x16xf32> -> vector<16x16xf32>
    %cst_100 = arith.constant 0.353553385 : f32
    %291 = vector.broadcast %cst_100 : f32 to vector<16x16xf32>
    %292 = arith.mulf %290, %291 : vector<16x16xf32>
    %cst_101 = arith.constant -1.000000e+30 : f32
    %293 = vector.broadcast %cst_101 : f32 to vector<16x16xf32>
    %294 = arith.select %8, %292, %293 : vector<16x16xi1>, vector<16x16xf32>
    %cst_102 = arith.constant dense<0xFF800000> : vector<16xf32>
    %295 = vector.multi_reduction <maximumf>, %294, %cst_102 [1] : vector<16x16xf32> to vector<16xf32>
    %296 = vector.shape_cast %295 : vector<16xf32> to vector<16x1xf32>
    %297 = vector.broadcast %296 : vector<16x1xf32> to vector<16x16xf32>
    %298 = arith.subf %294, %297 : vector<16x16xf32>
    %299 = math.exp %298 : vector<16x16xf32>
    %cst_103 = arith.constant dense<0.000000e+00> : vector<16xf32>
    %300 = vector.multi_reduction <add>, %299, %cst_103 [1] : vector<16x16xf32> to vector<16xf32>
    %301 = vector.shape_cast %300 : vector<16xf32> to vector<16x1xf32>
    %302 = tpu.reciprocal %301 {approx = true} : vector<16x1xf32> -> vector<16x1xf32>
    %303 = vector.broadcast %302 : vector<16x1xf32> to vector<16x16xf32>
    %304 = arith.mulf %299, %303 : vector<16x16xf32>
    %305 = arith.truncf %304 : vector<16x16xf32> to vector<16x16xbf16>
    %cst_104 = arith.constant dense<0.000000e+00> : vector<16x8xf32>
    %306 = tpu.matmul %305, %289, %cst_104 {dimension_numbers = #tpu.dot_dimension_numbers<[1], [0], [0], [1], [0, 0, 1, 1], [], []>} : vector<16x16xbf16>, vector<16x8xbf16>, vector<16x8xf32> -> vector<16x8xf32>
    %307 = vector.extract_strided_slice %177 {offsets = [24, 0], sizes = [8, 32], strides = [1, 1]} : vector<32x32xf32> to vector<8x32xf32>
    %308 = arith.truncf %307 : vector<8x32xf32> to vector<8x32xbf16>
    %309 = arith.truncf %306 : vector<16x8xf32> to vector<16x8xbf16>
    %cst_105 = arith.constant dense<0.000000e+00> : vector<16x32xf32>
    %310 = tpu.matmul %309, %308, %cst_105 {dimension_numbers = #tpu.dot_dimension_numbers<[1], [0], [0], [1], [0, 0, 1, 1], [], []>} : vector<16x8xbf16>, vector<8x32xbf16>, vector<16x32xf32> -> vector<16x32xf32>
    %311 = arith.addf %283, %310 : vector<16x32xf32>
    %312 = arith.mulf %311, %311 : vector<16x32xf32>
    %cst_106 = arith.constant dense<0.000000e+00> : vector<16xf32>
    %313 = vector.multi_reduction <add>, %312, %cst_106 [1] : vector<16x32xf32> to vector<16xf32>
    %314 = vector.shape_cast %313 : vector<16xf32> to vector<16x1xf32>
    %cst_107 = arith.constant 3.200000e+01 : f32
    %315 = vector.broadcast %cst_107 : f32 to vector<16x1xf32>
    %316 = arith.divf %314, %315 : vector<16x1xf32>
    %cst_108 = arith.constant 9.99999974E-6 : f32
    %317 = vector.broadcast %cst_108 : f32 to vector<16x1xf32>
    %318 = arith.addf %316, %317 : vector<16x1xf32>
    %319 = math.rsqrt %318 : vector<16x1xf32>
    %320 = vector.broadcast %319 : vector<16x1xf32> to vector<16x32xf32>
    %321 = arith.mulf %311, %320 : vector<16x32xf32>
    %322 = vector.broadcast %185 : vector<1x32xf32> to vector<16x32xf32>
    %323 = arith.mulf %321, %322 : vector<16x32xf32>
    %324 = arith.truncf %323 : vector<16x32xf32> to vector<16x32xbf16>
    %cst_109 = arith.constant dense<0.000000e+00> : vector<16x512xf32>
    %325 = tpu.matmul %324, %179, %cst_109 {dimension_numbers = #tpu.dot_dimension_numbers<[1], [0], [0], [1], [0, 0, 1, 1], [], []>} : vector<16x32xbf16>, vector<32x512xbf16>, vector<16x512xf32> -> vector<16x512xf32>
    %326 = vector.extract_strided_slice %325 {offsets = [0, 0], sizes = [16, 256], strides = [1, 1]} : vector<16x512xf32> to vector<16x256xf32>
    %327 = vector.extract_strided_slice %325 {offsets = [0, 256], sizes = [16, 256], strides = [1, 1]} : vector<16x512xf32> to vector<16x256xf32>
    %328 = arith.negf %326 : vector<16x256xf32>
    %329 = math.exp %328 : vector<16x256xf32>
    %cst_110 = arith.constant 1.000000e+00 : f32
    %330 = vector.broadcast %cst_110 : f32 to vector<16x256xf32>
    %331 = arith.addf %330, %329 : vector<16x256xf32>
    %332 = arith.divf %330, %331 : vector<16x256xf32>
    %333 = arith.mulf %326, %332 : vector<16x256xf32>
    %334 = arith.mulf %333, %327 : vector<16x256xf32>
    %335 = arith.truncf %334 : vector<16x256xf32> to vector<16x256xbf16>
    %cst_111 = arith.constant dense<0.000000e+00> : vector<16x32xf32>
    %336 = tpu.matmul %335, %181, %cst_111 {dimension_numbers = #tpu.dot_dimension_numbers<[1], [0], [0], [1], [0, 0, 1, 1], [], []>} : vector<16x256xbf16>, vector<256x32xbf16>, vector<16x32xf32> -> vector<16x32xf32>
    %337 = arith.addf %311, %336 : vector<16x32xf32>
    %c2 = arith.constant 2 : index
    %c0_112 = arith.constant 0 : index
    %c0_113 = arith.constant 0 : index
    %338 = vector.load %arg1[%c2, %c0_112, %c0_113] : memref<4x32x96xbf16, #tpu.memory_space<vmem>>, vector<1x32x96xbf16>
    %339 = vector.shape_cast %338 : vector<1x32x96xbf16> to vector<32x96xbf16>
    %c2_114 = arith.constant 2 : index
    %c0_115 = arith.constant 0 : index
    %c0_116 = arith.constant 0 : index
    %340 = vector.load %arg2[%c2_114, %c0_115, %c0_116] : memref<4x32x32xf32, #tpu.memory_space<vmem>>, vector<1x32x32xf32>
    %341 = vector.shape_cast %340 : vector<1x32x32xf32> to vector<32x32xf32>
    %c2_117 = arith.constant 2 : index
    %c0_118 = arith.constant 0 : index
    %c0_119 = arith.constant 0 : index
    %342 = vector.load %arg3[%c2_117, %c0_118, %c0_119] : memref<4x32x512xbf16, #tpu.memory_space<vmem>>, vector<1x32x512xbf16>
    %343 = vector.shape_cast %342 : vector<1x32x512xbf16> to vector<32x512xbf16>
    %c2_120 = arith.constant 2 : index
    %c0_121 = arith.constant 0 : index
    %c0_122 = arith.constant 0 : index
    %344 = vector.load %arg4[%c2_120, %c0_121, %c0_122] : memref<4x256x32xbf16, #tpu.memory_space<vmem>>, vector<1x256x32xbf16>
    %345 = vector.shape_cast %344 : vector<1x256x32xbf16> to vector<256x32xbf16>
    %c2_123 = arith.constant 2 : index
    %c0_124 = arith.constant 0 : index
    %c0_125 = arith.constant 0 : index
    %346 = vector.load %arg5[%c2_123, %c0_124, %c0_125] : memref<4x1x32xf32, #tpu.memory_space<vmem>>, vector<1x1x32xf32>
    %347 = vector.shape_cast %346 : vector<1x1x32xf32> to vector<1x32xf32>
    %c2_126 = arith.constant 2 : index
    %c0_127 = arith.constant 0 : index
    %c0_128 = arith.constant 0 : index
    %348 = vector.load %arg6[%c2_126, %c0_127, %c0_128] : memref<4x1x32xf32, #tpu.memory_space<vmem>>, vector<1x1x32xf32>
    %349 = vector.shape_cast %348 : vector<1x1x32xf32> to vector<1x32xf32>
    %350 = arith.mulf %337, %337 : vector<16x32xf32>
    %cst_129 = arith.constant dense<0.000000e+00> : vector<16xf32>
    %351 = vector.multi_reduction <add>, %350, %cst_129 [1] : vector<16x32xf32> to vector<16xf32>
    %352 = vector.shape_cast %351 : vector<16xf32> to vector<16x1xf32>
    %cst_130 = arith.constant 3.200000e+01 : f32
    %353 = vector.broadcast %cst_130 : f32 to vector<16x1xf32>
    %354 = arith.divf %352, %353 : vector<16x1xf32>
    %cst_131 = arith.constant 9.99999974E-6 : f32
    %355 = vector.broadcast %cst_131 : f32 to vector<16x1xf32>
    %356 = arith.addf %354, %355 : vector<16x1xf32>
    %357 = math.rsqrt %356 : vector<16x1xf32>
    %358 = vector.broadcast %357 : vector<16x1xf32> to vector<16x32xf32>
    %359 = arith.mulf %337, %358 : vector<16x32xf32>
    %360 = vector.broadcast %347 : vector<1x32xf32> to vector<16x32xf32>
    %361 = arith.mulf %359, %360 : vector<16x32xf32>
    %362 = arith.truncf %361 : vector<16x32xf32> to vector<16x32xbf16>
    %cst_132 = arith.constant dense<0.000000e+00> : vector<16x96xf32>
    %363 = tpu.matmul %362, %339, %cst_132 {dimension_numbers = #tpu.dot_dimension_numbers<[1], [0], [0], [1], [0, 0, 1, 1], [], []>} : vector<16x32xbf16>, vector<32x96xbf16>, vector<16x96xf32> -> vector<16x96xf32>
    %364 = vector.extract_strided_slice %363 {offsets = [0, 0], sizes = [16, 8], strides = [1, 1]} : vector<16x96xf32> to vector<16x8xf32>
    %365 = arith.truncf %364 : vector<16x8xf32> to vector<16x8xbf16>
    %366 = vector.extract_strided_slice %363 {offsets = [0, 32], sizes = [16, 8], strides = [1, 1]} : vector<16x96xf32> to vector<16x8xf32>
    %367 = arith.truncf %366 : vector<16x8xf32> to vector<16x8xbf16>
    %368 = vector.extract_strided_slice %363 {offsets = [0, 64], sizes = [16, 8], strides = [1, 1]} : vector<16x96xf32> to vector<16x8xf32>
    %369 = arith.truncf %368 : vector<16x8xf32> to vector<16x8xbf16>
    %cst_133 = arith.constant dense<0.000000e+00> : vector<16x16xf32>
    %370 = tpu.matmul %365, %367, %cst_133 {dimension_numbers = #tpu.dot_dimension_numbers<[1], [1], [0], [0], [0, 0, 1, 0], [], []>} : vector<16x8xbf16>, vector<16x8xbf16>, vector<16x16xf32> -> vector<16x16xf32>
    %cst_134 = arith.constant 0.353553385 : f32
    %371 = vector.broadcast %cst_134 : f32 to vector<16x16xf32>
    %372 = arith.mulf %370, %371 : vector<16x16xf32>
    %cst_135 = arith.constant -1.000000e+30 : f32
    %373 = vector.broadcast %cst_135 : f32 to vector<16x16xf32>
    %374 = arith.select %8, %372, %373 : vector<16x16xi1>, vector<16x16xf32>
    %cst_136 = arith.constant dense<0xFF800000> : vector<16xf32>
    %375 = vector.multi_reduction <maximumf>, %374, %cst_136 [1] : vector<16x16xf32> to vector<16xf32>
    %376 = vector.shape_cast %375 : vector<16xf32> to vector<16x1xf32>
    %377 = vector.broadcast %376 : vector<16x1xf32> to vector<16x16xf32>
    %378 = arith.subf %374, %377 : vector<16x16xf32>
    %379 = math.exp %378 : vector<16x16xf32>
    %cst_137 = arith.constant dense<0.000000e+00> : vector<16xf32>
    %380 = vector.multi_reduction <add>, %379, %cst_137 [1] : vector<16x16xf32> to vector<16xf32>
    %381 = vector.shape_cast %380 : vector<16xf32> to vector<16x1xf32>
    %382 = tpu.reciprocal %381 {approx = true} : vector<16x1xf32> -> vector<16x1xf32>
    %383 = vector.broadcast %382 : vector<16x1xf32> to vector<16x16xf32>
    %384 = arith.mulf %379, %383 : vector<16x16xf32>
    %385 = arith.truncf %384 : vector<16x16xf32> to vector<16x16xbf16>
    %cst_138 = arith.constant dense<0.000000e+00> : vector<16x8xf32>
    %386 = tpu.matmul %385, %369, %cst_138 {dimension_numbers = #tpu.dot_dimension_numbers<[1], [0], [0], [1], [0, 0, 1, 1], [], []>} : vector<16x16xbf16>, vector<16x8xbf16>, vector<16x8xf32> -> vector<16x8xf32>
    %387 = vector.extract_strided_slice %341 {offsets = [0, 0], sizes = [8, 32], strides = [1, 1]} : vector<32x32xf32> to vector<8x32xf32>
    %388 = arith.truncf %387 : vector<8x32xf32> to vector<8x32xbf16>
    %389 = arith.truncf %386 : vector<16x8xf32> to vector<16x8xbf16>
    %cst_139 = arith.constant dense<0.000000e+00> : vector<16x32xf32>
    %390 = tpu.matmul %389, %388, %cst_139 {dimension_numbers = #tpu.dot_dimension_numbers<[1], [0], [0], [1], [0, 0, 1, 1], [], []>} : vector<16x8xbf16>, vector<8x32xbf16>, vector<16x32xf32> -> vector<16x32xf32>
    %391 = arith.addf %337, %390 : vector<16x32xf32>
    %392 = vector.extract_strided_slice %363 {offsets = [0, 8], sizes = [16, 8], strides = [1, 1]} : vector<16x96xf32> to vector<16x8xf32>
    %393 = arith.truncf %392 : vector<16x8xf32> to vector<16x8xbf16>
    %394 = vector.extract_strided_slice %363 {offsets = [0, 40], sizes = [16, 8], strides = [1, 1]} : vector<16x96xf32> to vector<16x8xf32>
    %395 = arith.truncf %394 : vector<16x8xf32> to vector<16x8xbf16>
    %396 = vector.extract_strided_slice %363 {offsets = [0, 72], sizes = [16, 8], strides = [1, 1]} : vector<16x96xf32> to vector<16x8xf32>
    %397 = arith.truncf %396 : vector<16x8xf32> to vector<16x8xbf16>
    %cst_140 = arith.constant dense<0.000000e+00> : vector<16x16xf32>
    %398 = tpu.matmul %393, %395, %cst_140 {dimension_numbers = #tpu.dot_dimension_numbers<[1], [1], [0], [0], [0, 0, 1, 0], [], []>} : vector<16x8xbf16>, vector<16x8xbf16>, vector<16x16xf32> -> vector<16x16xf32>
    %cst_141 = arith.constant 0.353553385 : f32
    %399 = vector.broadcast %cst_141 : f32 to vector<16x16xf32>
    %400 = arith.mulf %398, %399 : vector<16x16xf32>
    %cst_142 = arith.constant -1.000000e+30 : f32
    %401 = vector.broadcast %cst_142 : f32 to vector<16x16xf32>
    %402 = arith.select %8, %400, %401 : vector<16x16xi1>, vector<16x16xf32>
    %cst_143 = arith.constant dense<0xFF800000> : vector<16xf32>
    %403 = vector.multi_reduction <maximumf>, %402, %cst_143 [1] : vector<16x16xf32> to vector<16xf32>
    %404 = vector.shape_cast %403 : vector<16xf32> to vector<16x1xf32>
    %405 = vector.broadcast %404 : vector<16x1xf32> to vector<16x16xf32>
    %406 = arith.subf %402, %405 : vector<16x16xf32>
    %407 = math.exp %406 : vector<16x16xf32>
    %cst_144 = arith.constant dense<0.000000e+00> : vector<16xf32>
    %408 = vector.multi_reduction <add>, %407, %cst_144 [1] : vector<16x16xf32> to vector<16xf32>
    %409 = vector.shape_cast %408 : vector<16xf32> to vector<16x1xf32>
    %410 = tpu.reciprocal %409 {approx = true} : vector<16x1xf32> -> vector<16x1xf32>
    %411 = vector.broadcast %410 : vector<16x1xf32> to vector<16x16xf32>
    %412 = arith.mulf %407, %411 : vector<16x16xf32>
    %413 = arith.truncf %412 : vector<16x16xf32> to vector<16x16xbf16>
    %cst_145 = arith.constant dense<0.000000e+00> : vector<16x8xf32>
    %414 = tpu.matmul %413, %397, %cst_145 {dimension_numbers = #tpu.dot_dimension_numbers<[1], [0], [0], [1], [0, 0, 1, 1], [], []>} : vector<16x16xbf16>, vector<16x8xbf16>, vector<16x8xf32> -> vector<16x8xf32>
    %415 = vector.extract_strided_slice %341 {offsets = [8, 0], sizes = [8, 32], strides = [1, 1]} : vector<32x32xf32> to vector<8x32xf32>
    %416 = arith.truncf %415 : vector<8x32xf32> to vector<8x32xbf16>
    %417 = arith.truncf %414 : vector<16x8xf32> to vector<16x8xbf16>
    %cst_146 = arith.constant dense<0.000000e+00> : vector<16x32xf32>
    %418 = tpu.matmul %417, %416, %cst_146 {dimension_numbers = #tpu.dot_dimension_numbers<[1], [0], [0], [1], [0, 0, 1, 1], [], []>} : vector<16x8xbf16>, vector<8x32xbf16>, vector<16x32xf32> -> vector<16x32xf32>
    %419 = arith.addf %391, %418 : vector<16x32xf32>
    %420 = vector.extract_strided_slice %363 {offsets = [0, 16], sizes = [16, 8], strides = [1, 1]} : vector<16x96xf32> to vector<16x8xf32>
    %421 = arith.truncf %420 : vector<16x8xf32> to vector<16x8xbf16>
    %422 = vector.extract_strided_slice %363 {offsets = [0, 48], sizes = [16, 8], strides = [1, 1]} : vector<16x96xf32> to vector<16x8xf32>
    %423 = arith.truncf %422 : vector<16x8xf32> to vector<16x8xbf16>
    %424 = vector.extract_strided_slice %363 {offsets = [0, 80], sizes = [16, 8], strides = [1, 1]} : vector<16x96xf32> to vector<16x8xf32>
    %425 = arith.truncf %424 : vector<16x8xf32> to vector<16x8xbf16>
    %cst_147 = arith.constant dense<0.000000e+00> : vector<16x16xf32>
    %426 = tpu.matmul %421, %423, %cst_147 {dimension_numbers = #tpu.dot_dimension_numbers<[1], [1], [0], [0], [0, 0, 1, 0], [], []>} : vector<16x8xbf16>, vector<16x8xbf16>, vector<16x16xf32> -> vector<16x16xf32>
    %cst_148 = arith.constant 0.353553385 : f32
    %427 = vector.broadcast %cst_148 : f32 to vector<16x16xf32>
    %428 = arith.mulf %426, %427 : vector<16x16xf32>
    %cst_149 = arith.constant -1.000000e+30 : f32
    %429 = vector.broadcast %cst_149 : f32 to vector<16x16xf32>
    %430 = arith.select %8, %428, %429 : vector<16x16xi1>, vector<16x16xf32>
    %cst_150 = arith.constant dense<0xFF800000> : vector<16xf32>
    %431 = vector.multi_reduction <maximumf>, %430, %cst_150 [1] : vector<16x16xf32> to vector<16xf32>
    %432 = vector.shape_cast %431 : vector<16xf32> to vector<16x1xf32>
    %433 = vector.broadcast %432 : vector<16x1xf32> to vector<16x16xf32>
    %434 = arith.subf %430, %433 : vector<16x16xf32>
    %435 = math.exp %434 : vector<16x16xf32>
    %cst_151 = arith.constant dense<0.000000e+00> : vector<16xf32>
    %436 = vector.multi_reduction <add>, %435, %cst_151 [1] : vector<16x16xf32> to vector<16xf32>
    %437 = vector.shape_cast %436 : vector<16xf32> to vector<16x1xf32>
    %438 = tpu.reciprocal %437 {approx = true} : vector<16x1xf32> -> vector<16x1xf32>
    %439 = vector.broadcast %438 : vector<16x1xf32> to vector<16x16xf32>
    %440 = arith.mulf %435, %439 : vector<16x16xf32>
    %441 = arith.truncf %440 : vector<16x16xf32> to vector<16x16xbf16>
    %cst_152 = arith.constant dense<0.000000e+00> : vector<16x8xf32>
    %442 = tpu.matmul %441, %425, %cst_152 {dimension_numbers = #tpu.dot_dimension_numbers<[1], [0], [0], [1], [0, 0, 1, 1], [], []>} : vector<16x16xbf16>, vector<16x8xbf16>, vector<16x8xf32> -> vector<16x8xf32>
    %443 = vector.extract_strided_slice %341 {offsets = [16, 0], sizes = [8, 32], strides = [1, 1]} : vector<32x32xf32> to vector<8x32xf32>
    %444 = arith.truncf %443 : vector<8x32xf32> to vector<8x32xbf16>
    %445 = arith.truncf %442 : vector<16x8xf32> to vector<16x8xbf16>
    %cst_153 = arith.constant dense<0.000000e+00> : vector<16x32xf32>
    %446 = tpu.matmul %445, %444, %cst_153 {dimension_numbers = #tpu.dot_dimension_numbers<[1], [0], [0], [1], [0, 0, 1, 1], [], []>} : vector<16x8xbf16>, vector<8x32xbf16>, vector<16x32xf32> -> vector<16x32xf32>
    %447 = arith.addf %419, %446 : vector<16x32xf32>
    %448 = vector.extract_strided_slice %363 {offsets = [0, 24], sizes = [16, 8], strides = [1, 1]} : vector<16x96xf32> to vector<16x8xf32>
    %449 = arith.truncf %448 : vector<16x8xf32> to vector<16x8xbf16>
    %450 = vector.extract_strided_slice %363 {offsets = [0, 56], sizes = [16, 8], strides = [1, 1]} : vector<16x96xf32> to vector<16x8xf32>
    %451 = arith.truncf %450 : vector<16x8xf32> to vector<16x8xbf16>
    %452 = vector.extract_strided_slice %363 {offsets = [0, 88], sizes = [16, 8], strides = [1, 1]} : vector<16x96xf32> to vector<16x8xf32>
    %453 = arith.truncf %452 : vector<16x8xf32> to vector<16x8xbf16>
    %cst_154 = arith.constant dense<0.000000e+00> : vector<16x16xf32>
    %454 = tpu.matmul %449, %451, %cst_154 {dimension_numbers = #tpu.dot_dimension_numbers<[1], [1], [0], [0], [0, 0, 1, 0], [], []>} : vector<16x8xbf16>, vector<16x8xbf16>, vector<16x16xf32> -> vector<16x16xf32>
    %cst_155 = arith.constant 0.353553385 : f32
    %455 = vector.broadcast %cst_155 : f32 to vector<16x16xf32>
    %456 = arith.mulf %454, %455 : vector<16x16xf32>
    %cst_156 = arith.constant -1.000000e+30 : f32
    %457 = vector.broadcast %cst_156 : f32 to vector<16x16xf32>
    %458 = arith.select %8, %456, %457 : vector<16x16xi1>, vector<16x16xf32>
    %cst_157 = arith.constant dense<0xFF800000> : vector<16xf32>
    %459 = vector.multi_reduction <maximumf>, %458, %cst_157 [1] : vector<16x16xf32> to vector<16xf32>
    %460 = vector.shape_cast %459 : vector<16xf32> to vector<16x1xf32>
    %461 = vector.broadcast %460 : vector<16x1xf32> to vector<16x16xf32>
    %462 = arith.subf %458, %461 : vector<16x16xf32>
    %463 = math.exp %462 : vector<16x16xf32>
    %cst_158 = arith.constant dense<0.000000e+00> : vector<16xf32>
    %464 = vector.multi_reduction <add>, %463, %cst_158 [1] : vector<16x16xf32> to vector<16xf32>
    %465 = vector.shape_cast %464 : vector<16xf32> to vector<16x1xf32>
    %466 = tpu.reciprocal %465 {approx = true} : vector<16x1xf32> -> vector<16x1xf32>
    %467 = vector.broadcast %466 : vector<16x1xf32> to vector<16x16xf32>
    %468 = arith.mulf %463, %467 : vector<16x16xf32>
    %469 = arith.truncf %468 : vector<16x16xf32> to vector<16x16xbf16>
    %cst_159 = arith.constant dense<0.000000e+00> : vector<16x8xf32>
    %470 = tpu.matmul %469, %453, %cst_159 {dimension_numbers = #tpu.dot_dimension_numbers<[1], [0], [0], [1], [0, 0, 1, 1], [], []>} : vector<16x16xbf16>, vector<16x8xbf16>, vector<16x8xf32> -> vector<16x8xf32>
    %471 = vector.extract_strided_slice %341 {offsets = [24, 0], sizes = [8, 32], strides = [1, 1]} : vector<32x32xf32> to vector<8x32xf32>
    %472 = arith.truncf %471 : vector<8x32xf32> to vector<8x32xbf16>
    %473 = arith.truncf %470 : vector<16x8xf32> to vector<16x8xbf16>
    %cst_160 = arith.constant dense<0.000000e+00> : vector<16x32xf32>
    %474 = tpu.matmul %473, %472, %cst_160 {dimension_numbers = #tpu.dot_dimension_numbers<[1], [0], [0], [1], [0, 0, 1, 1], [], []>} : vector<16x8xbf16>, vector<8x32xbf16>, vector<16x32xf32> -> vector<16x32xf32>
    %475 = arith.addf %447, %474 : vector<16x32xf32>
    %476 = arith.mulf %475, %475 : vector<16x32xf32>
    %cst_161 = arith.constant dense<0.000000e+00> : vector<16xf32>
    %477 = vector.multi_reduction <add>, %476, %cst_161 [1] : vector<16x32xf32> to vector<16xf32>
    %478 = vector.shape_cast %477 : vector<16xf32> to vector<16x1xf32>
    %cst_162 = arith.constant 3.200000e+01 : f32
    %479 = vector.broadcast %cst_162 : f32 to vector<16x1xf32>
    %480 = arith.divf %478, %479 : vector<16x1xf32>
    %cst_163 = arith.constant 9.99999974E-6 : f32
    %481 = vector.broadcast %cst_163 : f32 to vector<16x1xf32>
    %482 = arith.addf %480, %481 : vector<16x1xf32>
    %483 = math.rsqrt %482 : vector<16x1xf32>
    %484 = vector.broadcast %483 : vector<16x1xf32> to vector<16x32xf32>
    %485 = arith.mulf %475, %484 : vector<16x32xf32>
    %486 = vector.broadcast %349 : vector<1x32xf32> to vector<16x32xf32>
    %487 = arith.mulf %485, %486 : vector<16x32xf32>
    %488 = arith.truncf %487 : vector<16x32xf32> to vector<16x32xbf16>
    %cst_164 = arith.constant dense<0.000000e+00> : vector<16x512xf32>
    %489 = tpu.matmul %488, %343, %cst_164 {dimension_numbers = #tpu.dot_dimension_numbers<[1], [0], [0], [1], [0, 0, 1, 1], [], []>} : vector<16x32xbf16>, vector<32x512xbf16>, vector<16x512xf32> -> vector<16x512xf32>
    %490 = vector.extract_strided_slice %489 {offsets = [0, 0], sizes = [16, 256], strides = [1, 1]} : vector<16x512xf32> to vector<16x256xf32>
    %491 = vector.extract_strided_slice %489 {offsets = [0, 256], sizes = [16, 256], strides = [1, 1]} : vector<16x512xf32> to vector<16x256xf32>
    %492 = arith.negf %490 : vector<16x256xf32>
    %493 = math.exp %492 : vector<16x256xf32>
    %cst_165 = arith.constant 1.000000e+00 : f32
    %494 = vector.broadcast %cst_165 : f32 to vector<16x256xf32>
    %495 = arith.addf %494, %493 : vector<16x256xf32>
    %496 = arith.divf %494, %495 : vector<16x256xf32>
    %497 = arith.mulf %490, %496 : vector<16x256xf32>
    %498 = arith.mulf %497, %491 : vector<16x256xf32>
    %499 = arith.truncf %498 : vector<16x256xf32> to vector<16x256xbf16>
    %cst_166 = arith.constant dense<0.000000e+00> : vector<16x32xf32>
    %500 = tpu.matmul %499, %345, %cst_166 {dimension_numbers = #tpu.dot_dimension_numbers<[1], [0], [0], [1], [0, 0, 1, 1], [], []>} : vector<16x256xbf16>, vector<256x32xbf16>, vector<16x32xf32> -> vector<16x32xf32>
    %501 = arith.addf %475, %500 : vector<16x32xf32>
    %c3 = arith.constant 3 : index
    %c0_167 = arith.constant 0 : index
    %c0_168 = arith.constant 0 : index
    %502 = vector.load %arg1[%c3, %c0_167, %c0_168] : memref<4x32x96xbf16, #tpu.memory_space<vmem>>, vector<1x32x96xbf16>
    %503 = vector.shape_cast %502 : vector<1x32x96xbf16> to vector<32x96xbf16>
    %c3_169 = arith.constant 3 : index
    %c0_170 = arith.constant 0 : index
    %c0_171 = arith.constant 0 : index
    %504 = vector.load %arg2[%c3_169, %c0_170, %c0_171] : memref<4x32x32xf32, #tpu.memory_space<vmem>>, vector<1x32x32xf32>
    %505 = vector.shape_cast %504 : vector<1x32x32xf32> to vector<32x32xf32>
    %c3_172 = arith.constant 3 : index
    %c0_173 = arith.constant 0 : index
    %c0_174 = arith.constant 0 : index
    %506 = vector.load %arg3[%c3_172, %c0_173, %c0_174] : memref<4x32x512xbf16, #tpu.memory_space<vmem>>, vector<1x32x512xbf16>
    %507 = vector.shape_cast %506 : vector<1x32x512xbf16> to vector<32x512xbf16>
    %c3_175 = arith.constant 3 : index
    %c0_176 = arith.constant 0 : index
    %c0_177 = arith.constant 0 : index
    %508 = vector.load %arg4[%c3_175, %c0_176, %c0_177] : memref<4x256x32xbf16, #tpu.memory_space<vmem>>, vector<1x256x32xbf16>
    %509 = vector.shape_cast %508 : vector<1x256x32xbf16> to vector<256x32xbf16>
    %c3_178 = arith.constant 3 : index
    %c0_179 = arith.constant 0 : index
    %c0_180 = arith.constant 0 : index
    %510 = vector.load %arg5[%c3_178, %c0_179, %c0_180] : memref<4x1x32xf32, #tpu.memory_space<vmem>>, vector<1x1x32xf32>
    %511 = vector.shape_cast %510 : vector<1x1x32xf32> to vector<1x32xf32>
    %c3_181 = arith.constant 3 : index
    %c0_182 = arith.constant 0 : index
    %c0_183 = arith.constant 0 : index
    %512 = vector.load %arg6[%c3_181, %c0_182, %c0_183] : memref<4x1x32xf32, #tpu.memory_space<vmem>>, vector<1x1x32xf32>
    %513 = vector.shape_cast %512 : vector<1x1x32xf32> to vector<1x32xf32>
    %514 = arith.mulf %501, %501 : vector<16x32xf32>
    %cst_184 = arith.constant dense<0.000000e+00> : vector<16xf32>
    %515 = vector.multi_reduction <add>, %514, %cst_184 [1] : vector<16x32xf32> to vector<16xf32>
    %516 = vector.shape_cast %515 : vector<16xf32> to vector<16x1xf32>
    %cst_185 = arith.constant 3.200000e+01 : f32
    %517 = vector.broadcast %cst_185 : f32 to vector<16x1xf32>
    %518 = arith.divf %516, %517 : vector<16x1xf32>
    %cst_186 = arith.constant 9.99999974E-6 : f32
    %519 = vector.broadcast %cst_186 : f32 to vector<16x1xf32>
    %520 = arith.addf %518, %519 : vector<16x1xf32>
    %521 = math.rsqrt %520 : vector<16x1xf32>
    %522 = vector.broadcast %521 : vector<16x1xf32> to vector<16x32xf32>
    %523 = arith.mulf %501, %522 : vector<16x32xf32>
    %524 = vector.broadcast %511 : vector<1x32xf32> to vector<16x32xf32>
    %525 = arith.mulf %523, %524 : vector<16x32xf32>
    %526 = arith.truncf %525 : vector<16x32xf32> to vector<16x32xbf16>
    %cst_187 = arith.constant dense<0.000000e+00> : vector<16x96xf32>
    %527 = tpu.matmul %526, %503, %cst_187 {dimension_numbers = #tpu.dot_dimension_numbers<[1], [0], [0], [1], [0, 0, 1, 1], [], []>} : vector<16x32xbf16>, vector<32x96xbf16>, vector<16x96xf32> -> vector<16x96xf32>
    %528 = vector.extract_strided_slice %527 {offsets = [0, 0], sizes = [16, 8], strides = [1, 1]} : vector<16x96xf32> to vector<16x8xf32>
    %529 = arith.truncf %528 : vector<16x8xf32> to vector<16x8xbf16>
    %530 = vector.extract_strided_slice %527 {offsets = [0, 32], sizes = [16, 8], strides = [1, 1]} : vector<16x96xf32> to vector<16x8xf32>
    %531 = arith.truncf %530 : vector<16x8xf32> to vector<16x8xbf16>
    %532 = vector.extract_strided_slice %527 {offsets = [0, 64], sizes = [16, 8], strides = [1, 1]} : vector<16x96xf32> to vector<16x8xf32>
    %533 = arith.truncf %532 : vector<16x8xf32> to vector<16x8xbf16>
    %cst_188 = arith.constant dense<0.000000e+00> : vector<16x16xf32>
    %534 = tpu.matmul %529, %531, %cst_188 {dimension_numbers = #tpu.dot_dimension_numbers<[1], [1], [0], [0], [0, 0, 1, 0], [], []>} : vector<16x8xbf16>, vector<16x8xbf16>, vector<16x16xf32> -> vector<16x16xf32>
    %cst_189 = arith.constant 0.353553385 : f32
    %535 = vector.broadcast %cst_189 : f32 to vector<16x16xf32>
    %536 = arith.mulf %534, %535 : vector<16x16xf32>
    %cst_190 = arith.constant -1.000000e+30 : f32
    %537 = vector.broadcast %cst_190 : f32 to vector<16x16xf32>
    %538 = arith.select %8, %536, %537 : vector<16x16xi1>, vector<16x16xf32>
    %cst_191 = arith.constant dense<0xFF800000> : vector<16xf32>
    %539 = vector.multi_reduction <maximumf>, %538, %cst_191 [1] : vector<16x16xf32> to vector<16xf32>
    %540 = vector.shape_cast %539 : vector<16xf32> to vector<16x1xf32>
    %541 = vector.broadcast %540 : vector<16x1xf32> to vector<16x16xf32>
    %542 = arith.subf %538, %541 : vector<16x16xf32>
    %543 = math.exp %542 : vector<16x16xf32>
    %cst_192 = arith.constant dense<0.000000e+00> : vector<16xf32>
    %544 = vector.multi_reduction <add>, %543, %cst_192 [1] : vector<16x16xf32> to vector<16xf32>
    %545 = vector.shape_cast %544 : vector<16xf32> to vector<16x1xf32>
    %546 = tpu.reciprocal %545 {approx = true} : vector<16x1xf32> -> vector<16x1xf32>
    %547 = vector.broadcast %546 : vector<16x1xf32> to vector<16x16xf32>
    %548 = arith.mulf %543, %547 : vector<16x16xf32>
    %549 = arith.truncf %548 : vector<16x16xf32> to vector<16x16xbf16>
    %cst_193 = arith.constant dense<0.000000e+00> : vector<16x8xf32>
    %550 = tpu.matmul %549, %533, %cst_193 {dimension_numbers = #tpu.dot_dimension_numbers<[1], [0], [0], [1], [0, 0, 1, 1], [], []>} : vector<16x16xbf16>, vector<16x8xbf16>, vector<16x8xf32> -> vector<16x8xf32>
    %551 = vector.extract_strided_slice %505 {offsets = [0, 0], sizes = [8, 32], strides = [1, 1]} : vector<32x32xf32> to vector<8x32xf32>
    %552 = arith.truncf %551 : vector<8x32xf32> to vector<8x32xbf16>
    %553 = arith.truncf %550 : vector<16x8xf32> to vector<16x8xbf16>
    %cst_194 = arith.constant dense<0.000000e+00> : vector<16x32xf32>
    %554 = tpu.matmul %553, %552, %cst_194 {dimension_numbers = #tpu.dot_dimension_numbers<[1], [0], [0], [1], [0, 0, 1, 1], [], []>} : vector<16x8xbf16>, vector<8x32xbf16>, vector<16x32xf32> -> vector<16x32xf32>
    %555 = arith.addf %501, %554 : vector<16x32xf32>
    %556 = vector.extract_strided_slice %527 {offsets = [0, 8], sizes = [16, 8], strides = [1, 1]} : vector<16x96xf32> to vector<16x8xf32>
    %557 = arith.truncf %556 : vector<16x8xf32> to vector<16x8xbf16>
    %558 = vector.extract_strided_slice %527 {offsets = [0, 40], sizes = [16, 8], strides = [1, 1]} : vector<16x96xf32> to vector<16x8xf32>
    %559 = arith.truncf %558 : vector<16x8xf32> to vector<16x8xbf16>
    %560 = vector.extract_strided_slice %527 {offsets = [0, 72], sizes = [16, 8], strides = [1, 1]} : vector<16x96xf32> to vector<16x8xf32>
    %561 = arith.truncf %560 : vector<16x8xf32> to vector<16x8xbf16>
    %cst_195 = arith.constant dense<0.000000e+00> : vector<16x16xf32>
    %562 = tpu.matmul %557, %559, %cst_195 {dimension_numbers = #tpu.dot_dimension_numbers<[1], [1], [0], [0], [0, 0, 1, 0], [], []>} : vector<16x8xbf16>, vector<16x8xbf16>, vector<16x16xf32> -> vector<16x16xf32>
    %cst_196 = arith.constant 0.353553385 : f32
    %563 = vector.broadcast %cst_196 : f32 to vector<16x16xf32>
    %564 = arith.mulf %562, %563 : vector<16x16xf32>
    %cst_197 = arith.constant -1.000000e+30 : f32
    %565 = vector.broadcast %cst_197 : f32 to vector<16x16xf32>
    %566 = arith.select %8, %564, %565 : vector<16x16xi1>, vector<16x16xf32>
    %cst_198 = arith.constant dense<0xFF800000> : vector<16xf32>
    %567 = vector.multi_reduction <maximumf>, %566, %cst_198 [1] : vector<16x16xf32> to vector<16xf32>
    %568 = vector.shape_cast %567 : vector<16xf32> to vector<16x1xf32>
    %569 = vector.broadcast %568 : vector<16x1xf32> to vector<16x16xf32>
    %570 = arith.subf %566, %569 : vector<16x16xf32>
    %571 = math.exp %570 : vector<16x16xf32>
    %cst_199 = arith.constant dense<0.000000e+00> : vector<16xf32>
    %572 = vector.multi_reduction <add>, %571, %cst_199 [1] : vector<16x16xf32> to vector<16xf32>
    %573 = vector.shape_cast %572 : vector<16xf32> to vector<16x1xf32>
    %574 = tpu.reciprocal %573 {approx = true} : vector<16x1xf32> -> vector<16x1xf32>
    %575 = vector.broadcast %574 : vector<16x1xf32> to vector<16x16xf32>
    %576 = arith.mulf %571, %575 : vector<16x16xf32>
    %577 = arith.truncf %576 : vector<16x16xf32> to vector<16x16xbf16>
    %cst_200 = arith.constant dense<0.000000e+00> : vector<16x8xf32>
    %578 = tpu.matmul %577, %561, %cst_200 {dimension_numbers = #tpu.dot_dimension_numbers<[1], [0], [0], [1], [0, 0, 1, 1], [], []>} : vector<16x16xbf16>, vector<16x8xbf16>, vector<16x8xf32> -> vector<16x8xf32>
    %579 = vector.extract_strided_slice %505 {offsets = [8, 0], sizes = [8, 32], strides = [1, 1]} : vector<32x32xf32> to vector<8x32xf32>
    %580 = arith.truncf %579 : vector<8x32xf32> to vector<8x32xbf16>
    %581 = arith.truncf %578 : vector<16x8xf32> to vector<16x8xbf16>
    %cst_201 = arith.constant dense<0.000000e+00> : vector<16x32xf32>
    %582 = tpu.matmul %581, %580, %cst_201 {dimension_numbers = #tpu.dot_dimension_numbers<[1], [0], [0], [1], [0, 0, 1, 1], [], []>} : vector<16x8xbf16>, vector<8x32xbf16>, vector<16x32xf32> -> vector<16x32xf32>
    %583 = arith.addf %555, %582 : vector<16x32xf32>
    %584 = vector.extract_strided_slice %527 {offsets = [0, 16], sizes = [16, 8], strides = [1, 1]} : vector<16x96xf32> to vector<16x8xf32>
    %585 = arith.truncf %584 : vector<16x8xf32> to vector<16x8xbf16>
    %586 = vector.extract_strided_slice %527 {offsets = [0, 48], sizes = [16, 8], strides = [1, 1]} : vector<16x96xf32> to vector<16x8xf32>
    %587 = arith.truncf %586 : vector<16x8xf32> to vector<16x8xbf16>
    %588 = vector.extract_strided_slice %527 {offsets = [0, 80], sizes = [16, 8], strides = [1, 1]} : vector<16x96xf32> to vector<16x8xf32>
    %589 = arith.truncf %588 : vector<16x8xf32> to vector<16x8xbf16>
    %cst_202 = arith.constant dense<0.000000e+00> : vector<16x16xf32>
    %590 = tpu.matmul %585, %587, %cst_202 {dimension_numbers = #tpu.dot_dimension_numbers<[1], [1], [0], [0], [0, 0, 1, 0], [], []>} : vector<16x8xbf16>, vector<16x8xbf16>, vector<16x16xf32> -> vector<16x16xf32>
    %cst_203 = arith.constant 0.353553385 : f32
    %591 = vector.broadcast %cst_203 : f32 to vector<16x16xf32>
    %592 = arith.mulf %590, %591 : vector<16x16xf32>
    %cst_204 = arith.constant -1.000000e+30 : f32
    %593 = vector.broadcast %cst_204 : f32 to vector<16x16xf32>
    %594 = arith.select %8, %592, %593 : vector<16x16xi1>, vector<16x16xf32>
    %cst_205 = arith.constant dense<0xFF800000> : vector<16xf32>
    %595 = vector.multi_reduction <maximumf>, %594, %cst_205 [1] : vector<16x16xf32> to vector<16xf32>
    %596 = vector.shape_cast %595 : vector<16xf32> to vector<16x1xf32>
    %597 = vector.broadcast %596 : vector<16x1xf32> to vector<16x16xf32>
    %598 = arith.subf %594, %597 : vector<16x16xf32>
    %599 = math.exp %598 : vector<16x16xf32>
    %cst_206 = arith.constant dense<0.000000e+00> : vector<16xf32>
    %600 = vector.multi_reduction <add>, %599, %cst_206 [1] : vector<16x16xf32> to vector<16xf32>
    %601 = vector.shape_cast %600 : vector<16xf32> to vector<16x1xf32>
    %602 = tpu.reciprocal %601 {approx = true} : vector<16x1xf32> -> vector<16x1xf32>
    %603 = vector.broadcast %602 : vector<16x1xf32> to vector<16x16xf32>
    %604 = arith.mulf %599, %603 : vector<16x16xf32>
    %605 = arith.truncf %604 : vector<16x16xf32> to vector<16x16xbf16>
    %cst_207 = arith.constant dense<0.000000e+00> : vector<16x8xf32>
    %606 = tpu.matmul %605, %589, %cst_207 {dimension_numbers = #tpu.dot_dimension_numbers<[1], [0], [0], [1], [0, 0, 1, 1], [], []>} : vector<16x16xbf16>, vector<16x8xbf16>, vector<16x8xf32> -> vector<16x8xf32>
    %607 = vector.extract_strided_slice %505 {offsets = [16, 0], sizes = [8, 32], strides = [1, 1]} : vector<32x32xf32> to vector<8x32xf32>
    %608 = arith.truncf %607 : vector<8x32xf32> to vector<8x32xbf16>
    %609 = arith.truncf %606 : vector<16x8xf32> to vector<16x8xbf16>
    %cst_208 = arith.constant dense<0.000000e+00> : vector<16x32xf32>
    %610 = tpu.matmul %609, %608, %cst_208 {dimension_numbers = #tpu.dot_dimension_numbers<[1], [0], [0], [1], [0, 0, 1, 1], [], []>} : vector<16x8xbf16>, vector<8x32xbf16>, vector<16x32xf32> -> vector<16x32xf32>
    %611 = arith.addf %583, %610 : vector<16x32xf32>
    %612 = vector.extract_strided_slice %527 {offsets = [0, 24], sizes = [16, 8], strides = [1, 1]} : vector<16x96xf32> to vector<16x8xf32>
    %613 = arith.truncf %612 : vector<16x8xf32> to vector<16x8xbf16>
    %614 = vector.extract_strided_slice %527 {offsets = [0, 56], sizes = [16, 8], strides = [1, 1]} : vector<16x96xf32> to vector<16x8xf32>
    %615 = arith.truncf %614 : vector<16x8xf32> to vector<16x8xbf16>
    %616 = vector.extract_strided_slice %527 {offsets = [0, 88], sizes = [16, 8], strides = [1, 1]} : vector<16x96xf32> to vector<16x8xf32>
    %617 = arith.truncf %616 : vector<16x8xf32> to vector<16x8xbf16>
    %cst_209 = arith.constant dense<0.000000e+00> : vector<16x16xf32>
    %618 = tpu.matmul %613, %615, %cst_209 {dimension_numbers = #tpu.dot_dimension_numbers<[1], [1], [0], [0], [0, 0, 1, 0], [], []>} : vector<16x8xbf16>, vector<16x8xbf16>, vector<16x16xf32> -> vector<16x16xf32>
    %cst_210 = arith.constant 0.353553385 : f32
    %619 = vector.broadcast %cst_210 : f32 to vector<16x16xf32>
    %620 = arith.mulf %618, %619 : vector<16x16xf32>
    %cst_211 = arith.constant -1.000000e+30 : f32
    %621 = vector.broadcast %cst_211 : f32 to vector<16x16xf32>
    %622 = arith.select %8, %620, %621 : vector<16x16xi1>, vector<16x16xf32>
    %cst_212 = arith.constant dense<0xFF800000> : vector<16xf32>
    %623 = vector.multi_reduction <maximumf>, %622, %cst_212 [1] : vector<16x16xf32> to vector<16xf32>
    %624 = vector.shape_cast %623 : vector<16xf32> to vector<16x1xf32>
    %625 = vector.broadcast %624 : vector<16x1xf32> to vector<16x16xf32>
    %626 = arith.subf %622, %625 : vector<16x16xf32>
    %627 = math.exp %626 : vector<16x16xf32>
    %cst_213 = arith.constant dense<0.000000e+00> : vector<16xf32>
    %628 = vector.multi_reduction <add>, %627, %cst_213 [1] : vector<16x16xf32> to vector<16xf32>
    %629 = vector.shape_cast %628 : vector<16xf32> to vector<16x1xf32>
    %630 = tpu.reciprocal %629 {approx = true} : vector<16x1xf32> -> vector<16x1xf32>
    %631 = vector.broadcast %630 : vector<16x1xf32> to vector<16x16xf32>
    %632 = arith.mulf %627, %631 : vector<16x16xf32>
    %633 = arith.truncf %632 : vector<16x16xf32> to vector<16x16xbf16>
    %cst_214 = arith.constant dense<0.000000e+00> : vector<16x8xf32>
    %634 = tpu.matmul %633, %617, %cst_214 {dimension_numbers = #tpu.dot_dimension_numbers<[1], [0], [0], [1], [0, 0, 1, 1], [], []>} : vector<16x16xbf16>, vector<16x8xbf16>, vector<16x8xf32> -> vector<16x8xf32>
    %635 = vector.extract_strided_slice %505 {offsets = [24, 0], sizes = [8, 32], strides = [1, 1]} : vector<32x32xf32> to vector<8x32xf32>
    %636 = arith.truncf %635 : vector<8x32xf32> to vector<8x32xbf16>
    %637 = arith.truncf %634 : vector<16x8xf32> to vector<16x8xbf16>
    %cst_215 = arith.constant dense<0.000000e+00> : vector<16x32xf32>
    %638 = tpu.matmul %637, %636, %cst_215 {dimension_numbers = #tpu.dot_dimension_numbers<[1], [0], [0], [1], [0, 0, 1, 1], [], []>} : vector<16x8xbf16>, vector<8x32xbf16>, vector<16x32xf32> -> vector<16x32xf32>
    %639 = arith.addf %611, %638 : vector<16x32xf32>
    %640 = arith.mulf %639, %639 : vector<16x32xf32>
    %cst_216 = arith.constant dense<0.000000e+00> : vector<16xf32>
    %641 = vector.multi_reduction <add>, %640, %cst_216 [1] : vector<16x32xf32> to vector<16xf32>
    %642 = vector.shape_cast %641 : vector<16xf32> to vector<16x1xf32>
    %cst_217 = arith.constant 3.200000e+01 : f32
    %643 = vector.broadcast %cst_217 : f32 to vector<16x1xf32>
    %644 = arith.divf %642, %643 : vector<16x1xf32>
    %cst_218 = arith.constant 9.99999974E-6 : f32
    %645 = vector.broadcast %cst_218 : f32 to vector<16x1xf32>
    %646 = arith.addf %644, %645 : vector<16x1xf32>
    %647 = math.rsqrt %646 : vector<16x1xf32>
    %648 = vector.broadcast %647 : vector<16x1xf32> to vector<16x32xf32>
    %649 = arith.mulf %639, %648 : vector<16x32xf32>
    %650 = vector.broadcast %513 : vector<1x32xf32> to vector<16x32xf32>
    %651 = arith.mulf %649, %650 : vector<16x32xf32>
    %652 = arith.truncf %651 : vector<16x32xf32> to vector<16x32xbf16>
    %cst_219 = arith.constant dense<0.000000e+00> : vector<16x512xf32>
    %653 = tpu.matmul %652, %507, %cst_219 {dimension_numbers = #tpu.dot_dimension_numbers<[1], [0], [0], [1], [0, 0, 1, 1], [], []>} : vector<16x32xbf16>, vector<32x512xbf16>, vector<16x512xf32> -> vector<16x512xf32>
    %654 = vector.extract_strided_slice %653 {offsets = [0, 0], sizes = [16, 256], strides = [1, 1]} : vector<16x512xf32> to vector<16x256xf32>
    %655 = vector.extract_strided_slice %653 {offsets = [0, 256], sizes = [16, 256], strides = [1, 1]} : vector<16x512xf32> to vector<16x256xf32>
    %656 = arith.negf %654 : vector<16x256xf32>
    %657 = math.exp %656 : vector<16x256xf32>
    %cst_220 = arith.constant 1.000000e+00 : f32
    %658 = vector.broadcast %cst_220 : f32 to vector<16x256xf32>
    %659 = arith.addf %658, %657 : vector<16x256xf32>
    %660 = arith.divf %658, %659 : vector<16x256xf32>
    %661 = arith.mulf %654, %660 : vector<16x256xf32>
    %662 = arith.mulf %661, %655 : vector<16x256xf32>
    %663 = arith.truncf %662 : vector<16x256xf32> to vector<16x256xbf16>
    %cst_221 = arith.constant dense<0.000000e+00> : vector<16x32xf32>
    %664 = tpu.matmul %663, %509, %cst_221 {dimension_numbers = #tpu.dot_dimension_numbers<[1], [0], [0], [1], [0, 0, 1, 1], [], []>} : vector<16x256xbf16>, vector<256x32xbf16>, vector<16x32xf32> -> vector<16x32xf32>
    %665 = arith.addf %639, %664 : vector<16x32xf32>
    %c0_222 = arith.constant 0 : index
    %c0_223 = arith.constant 0 : index
    %666 = vector.load %arg7[%c0_222, %c0_223] : memref<16x32xf32, #tpu.memory_space<vmem>>, vector<16x32xf32>
    tpu.vector_store %arg7[%c0_222, %c0_223], %665 {strides = array<i32>} : memref<16x32xf32, #tpu.memory_space<vmem>>, vector<16x32xf32>,
    return
  }
}

</mosaic_0001>

<bundles_post_ra>
// kernel: tpu_custom_call.1
= control target key start
LH: loop header
LB: loop body
LE: loop exit
PB: predicated region body
PF: predicated region fallthrough
CT: control target
= control target key end

     0   :  { %vm96_vm0 = vcmask 261120   ;;  %v6028_v8 = vmov 0.0   ;;  %vm6029_vm1 = vmmov 0   ;;  %s7097_s0 = inlined_call_operand.vmem [shape: f32[16,32], index: 0, kind: input, shape index: {}]   ;;  %s7098_s1 = inlined_call_operand.vmem [shape: bf16[4,32,96], index: 1, kind: input, shape index: {}]   ;;  %s7099_s2 = inlined_call_operand.vmem [shape: f32[4,32,32], index: 2, kind: input, shape index: {}]   ;;  %s7100_s3 = inlined_call_operand.vmem [shape: bf16[4,32,512], index: 3, kind: input, shape index: {}]   ;;  %s7101_s4 = inlined_call_operand.vmem [shape: bf16[4,256,32], index: 4, kind: input, shape index: {}]   ;;  %s7102_s5 = inlined_call_operand.vmem [shape: f32[4,1,32], index: 5, kind: input, shape index: {}]   ;;  %s7103_s6 = inlined_call_operand.vmem [shape: f32[4,1,32], index: 6, kind: input, shape index: {}]   ;;  %s7104_s7 = inlined_call_operand.hbm [shape: f32[16,32], index: 7, kind: output, shape index: {}]  }
   0x1   :  { %v6088_v0 = vld [vmem:[%s7097_s0] sm:$0xff]  ;;  %v6093_v1 = vld [vmem:[%s7097_s0 + $0x8] sm:$0xff]  ;;  %5267 = vmatprep.subr.bf16.mxu1 %v6028_v8  ;;  %5271 = vmatprep.mubr.msk.bf16.mxu1 %vm6029_vm1, %v6028_v8 }
   0x2   :  { %v94_v2 = vmul.f32 %v6088_v0, %v6088_v0  ;;  %v95_v3 = vmul.f32 %v6093_v1, %v6093_v1  ;;  %v5660_v6 = vld [vmem:[%s7098_s1] sm:$0xff]   ;;  %v5661_v7 = vld [vmem:[%s7098_s1 + $0x8] sm:$0xff]   ;;  %5293 = vmatprep.subr.bf16.mxu0 %v6028_v8  ;;  %5295 = vmatprep.mubr.msk.bf16.mxu0 %vm6029_vm1, %v6028_v8 }
   0x3   :  { %5268 = vmatpush3.bf16.msra.mxu1 %v5660_v6 }
   0x4   :  { %v97_v4 = vsel %vm96_vm0, %v94_v2, 0.0  ;;  %v100_v5 = vsel %vm96_vm0, %v95_v3, 0.0  ;;  %5269 = vmatprep.subr.bf16.mxu1 %v6028_v8 }
   0x5   :  { %98 = vadd.xlane.f32.xlu0 %v97_v4 }
   0x7   :  { %5270 = vmatpush3.bf16.msra.mxu1 %v5661_v7 }
   0x8   :  { %5275 = vmatprep.subr.bf16.mxu1 %v6028_v8 }
   0x9   :  { %101 = vadd.xlane.f32.xlu0 %v100_v5 }
   0xa   :  { %12 = vsyncpa [#allocation3], 0  ;;  %v4733_v18 = vld [vmem:[%s7102_s5] ss:$0 sm:$0xff]  ;;  %s6030_s10 = smov 120   ;;  %s6031_s11 = smov 96   ;;  %v28_v36 = vlaneseq }
   0xb   :  { %s6032_s12 = smov 88   ;;  %s6033_s13 = smov 80   ;;  %vm181_vm2 = vcmask 64512   ;;  %vm233_vm8 = vcmask 130048   ;;  %vm309_vm10 = vcmask 1043456  }
   0xc   :  { %s6034_s14 = smov 112   ;;  %v29_v37 = vshrl.u32 %v28_v36, 7  ;;  %v32_v38 = vand.u32 127, %v28_v36  ;;  %s6035_s15 = smov 64  }
   0xd   :  { %s6036_s16 = smov 72   ;;  %s6037_s17 = smov 104  }
   0xe   :  { %v30_v39 = vadd.s32 8, %v29_v37  ;;  %v33_v40 = vshra.s32 %v29_v37, 3  ;;  %v35_v41 = vshra.s32 %v32_v38, 3  ;;  %vm38_vm4 = vcmp.ge.s32.totalorder %v29_v37, %v32_v38  ;;  %s6038_s18 = smov 48   ;;  %s6039_s19 = smov 56  }
   0xf   :  { %s6040_s24 = smov 40  }
  0x10   :  { %v34_v42 = vshra.s32 %v30_v39, 3  ;;  %vm36_vm3 = vcmp.eq.s32.totalorder %v33_v40, %v35_v41  ;;  %vm39_vm6 = vcmp.ge.s32.totalorder %v30_v39, %v32_v38 }
  0x11   :  { %vm6151_vm7 = vmand %vm36_vm3, %vm38_vm4 }
  0x12   :  { %vm37_vm5 = vcmp.eq.s32.totalorder %v34_v42, %v35_v41 }
  0x13   :  { %vm6155_vm9 = vmand %vm37_vm5, %vm39_vm6 }
  0x92   :  { %v99_v9 = vpop.xlane.xlu0 %98 }
  0x93   :  { %v104_v10 = vmul.f32 0.03125, %v99_v9 }
  0x95   :  { %v106_v11 = vadd.f32 1e-05, %v104_v10 }
  0x96   :  { %v102_v12 = vpop.xlane.xlu0 %101 }
  0x97   :  { %5780 = vrsqrt.f32 %v106_v11  ;;  %v105_v13 = vmul.f32 0.03125, %v102_v12 }
  0x99   :  { %v107_v14 = vadd.f32 1e-05, %v105_v13 }
  0x9b   :  { %5782 = vrsqrt.f32 %v107_v14 }
  0xa1   :  { %v5781_v15 = vpop.eup %5780 }
  0xa2   :  { %v110_v16 = vmul.f32 %v5781_v15, %v6088_v0 }
  0xa4   :  { %v118_v20 = vmul.f32 %v4733_v18, %v110_v16 }
  0xa5   :  { %v5783_v17 = vpop.eup %5782 }
  0xa6   :  { %v111_v19 = vmul.f32 %v5783_v17, %v6093_v1 }
  0xa8   :  { %v119_v21 = vmul.f32 %v4733_v18, %v111_v19 }
  0xaa   :  { %v120_v22 = vpack.c.bf16 %v119_v21, %v118_v20 }
  0xac   :  { %5272 = vmatmul.mubr.msk.bf16.vlgmr.msra.gmra.mrb[0].mxu1 %vm96_vm0, %v120_v22 }
  0xad   :  { %5277 = vmatprep.mubr.msk.bf16.mxu1 %vm6029_vm1, %v6028_v8 }
 0x17f   :  { %v170_v23 = vpop.f32.mrb[0].mxu1 }
 0x180   :  { %v5273_v24 = vpop.f32.mrb[1].mxu1 }
 0x181   :  { %v173_v25 = vpop.f32.mrb[2].mxu1 }
 0x182   :  { %v6123_v26 = vpack.c.bf16 %v173_v25, %v170_v23  ;;  %v5274_v27 = vpop.f32.mrb[3].mxu1 }
 0x184   :  { %356 = vrot.lane.b32.xlu0 %v6123_v26, %s6030_s10  ;;  %179 = vrot.lane.b32.xlu1 %v6123_v26, %s6031_s11 }
 0x188   :  { %358 = vrot.lane.b32.xlu1 %v6123_v26, %s6032_s12 }
 0x18c   :  { %534 = vrot.lane.b32.xlu1 %v6123_v26, %s6033_s13 }
 0x190   :  { %532 = vrot.lane.b32.xlu1 %v6123_v26, %s6034_s14 }
 0x1f6   :  { %v180_v28 = vpop.permute.xlu1 %179  ;;  %v357_v33 = vpop.permute.xlu0 %356 }
 0x1f7   :  { %v186_v29 = vsel %vm181_vm2, %v180_v28, 0 }
 0x1f8   :  { %5276 = vmatpush3.bf16.xpose.msra.mxu1 %v186_v29 }
 0x1f9   :  { %5281 = vmatprep.subr.bf16.mxu1 %v6028_v8 }
 0x1fa   :  { %v359_v30 = vpop.permute.xlu1 %358 }
 0x1fb   :  { %v364_v31 = vsel %vm181_vm2, %v359_v30, 0 }
 0x1fc   :  { %5294 = vmatpush3.bf16.xpose.msra.mxu0 %v364_v31 }
 0x1fd   :  { %5311 = vmatprep.subr.bf16.mxu0 %v6028_v8 }
 0x1fe   :  { %v535_v32 = vpop.permute.xlu1 %534 }
 0x1ff   :  { %5278 = vmatmul.mubr.msk.bf16.vlgmr.msra.gmra.mrb[4].mxu1 %vm181_vm2, %v6123_v26  ;;  %v540_v34 = vsel %vm181_vm2, %v535_v32, 0 }
 0x200   :  { %5283 = vmatprep.mubr.msk.bf16.mxu1 %vm6029_vm1, %v6028_v8 }
 0x202   :  { %v533_v35 = vpop.permute.xlu1 %532 }
 0x203   :  { %5296 = vmatmul.mubr.msk.bf16.vlgmr.msra.gmra.mrb[0].mxu0 %vm181_vm2, %v357_v33 }
 0x204   :  { %5312 = vmatpush3.bf16.xpose.msra.mxu0 %v540_v34  ;;  %5313 = vmatprep.mubr.msk.bf16.mxu0 %vm6029_vm1, %v6028_v8 }
 0x205   :  { %5317 = vmatprep.subr.bf16.mxu0 %v6028_v8 }
 0x20b   :  { %5314 = vmatmul.mubr.msk.bf16.vlgmr.msra.gmra.mrb[4].mxu0 %vm181_vm2, %v533_v35 }
 0x20c   :  { %5319 = vmatprep.mubr.msk.bf16.mxu0 %vm6029_vm1, %v6028_v8 }
 0x2d2   :  { %v222_v43 = vpop.f32.mrb[4].mxu1 }
 0x2d3   :  { %v229_v45 = vmul.f32 0.35355338, %v222_v43  ;;  %v5279_v46 = vpop.f32.mrb[5].mxu1 }
 0x2d4   :  { %v225_v47 = vpop.f32.mrb[6].mxu1 }
 0x2d5   :  { %v230_v49 = vmul.f32 0.35355338, %v225_v47  ;;  %v5280_v50 = vpop.f32.mrb[7].mxu1  ;;  %v231_v51 = vsel %vm6151_vm7, %v229_v45, -1e+30 }
 0x2d6   :  { %v400_v52 = vpop.f32.mrb[0].mxu0  ;;  %v234_v53 = vsel %vm233_vm8, %v231_v51, -inf }
 0x2d7   :  { %v5297_v54 = vpop.f32.mrb[1].mxu0  ;;  %235 = vmax.xlane.f32.xlu1 %v234_v53  ;;  %v232_v55 = vsel %vm6155_vm9, %v230_v49, -1e+30  ;;  %v407_v29 = vmul.f32 0.35355338, %v400_v52 }
 0x2d8   :  { %v403_v56 = vpop.f32.mrb[2].mxu0  ;;  %v237_v57 = vsel %vm233_vm8, %v232_v55, -inf }
 0x2d9   :  { %v5298_v58 = vpop.f32.mrb[3].mxu0  ;;  %238 = vmax.xlane.f32.xlu0 %v237_v57  ;;  %v409_v30 = vsel %vm6151_vm7, %v407_v29, -1e+30  ;;  %v408_v32 = vmul.f32 0.35355338, %v403_v56 }
 0x2da   :  { %v411_v31 = vsel %vm233_vm8, %v409_v30, -inf }
 0x2db   :  { %v410_v33 = vsel %vm6155_vm9, %v408_v32, -1e+30 }
 0x2dc   :  { %v414_v34 = vsel %vm233_vm8, %v410_v33, -inf }
 0x2de   :  { %v576_v59 = vpop.f32.mrb[4].mxu0 }
 0x2df   :  { %v583_v60 = vmul.f32 0.35355338, %v576_v59  ;;  %v5315_v61 = vpop.f32.mrb[5].mxu0 }
 0x2e0   :  { %v579_v62 = vpop.f32.mrb[6].mxu0 }
 0x2e1   :  { %v584_v63 = vmul.f32 0.35355338, %v579_v62  ;;  %v5316_v2 = vpop.f32.mrb[7].mxu0  ;;  %v585_v3 = vsel %vm6151_vm7, %v583_v60, -1e+30 }
 0x2e2   :  { %v587_v4 = vsel %vm233_vm8, %v585_v3, -inf }
 0x2e3   :  { %588 = vmax.xlane.f32.xlu1 %v587_v4  ;;  %v586_v5 = vsel %vm6155_vm9, %v584_v63, -1e+30  ;;  %v48_v4 = vld [vmem:[%s7099_s2] sm:$0xff] }
 0x2e4   :  { %v590_v6 = vsel %vm233_vm8, %v586_v5, -inf }
 0x2e7   :  { %591 = vmax.xlane.f32.xlu1 %v590_v6 }
 0x364   :  { %v236_v7 = vpop.xlane.xlu1 %235 }
 0x365   :  { %v240_v9 = vsub.f32 %v231_v51, %v236_v7 }
 0x366   :  { %v239_v10 = vpop.xlane.xlu0 %238 }
 0x367   :  { %v242_v11 = vmul.f32 1.442695, %v240_v9  ;;  %v241_v12 = vsub.f32 %v232_v55, %v239_v10 }
 0x369   :  { %5784 = vpow2.f32 %v242_v11  ;;  %v244_v13 = vmul.f32 1.442695, %v241_v12 }
 0x36b   :  { %5786 = vpow2.f32 %v244_v13 }
 0x370   :  { %v589_v14 = vpop.xlane.xlu1 %588 }
 0x371   :  { %v593_v15 = vsub.f32 %v585_v3, %v589_v14 }
 0x373   :  { %v5785_v16 = vpop.eup %5784  ;;  %v595_v17 = vmul.f32 1.442695, %v593_v15 }
 0x374   :  { %v592_v18 = vpop.xlane.xlu1 %591  ;;  %v246_v19 = vsel %vm233_vm8, %v5785_v16, 0.0 }
 0x375   :  { %v5787_v20 = vpop.eup %5786  ;;  %5788 = vpow2.f32 %v595_v17  ;;  %v594_v21 = vsub.f32 %v586_v5, %v592_v18  ;;  %247 = vadd.xlane.f32.xlu1 %v246_v19  ;;  %v304_v5 = vpack.c.bf16 %v48_v4, %v48_v4 }
 0x376   :  { %v249_v22 = vsel %vm233_vm8, %v5787_v20, 0.0 }
 0x377   :  { %v597_v23 = vmul.f32 1.442695, %v594_v21  ;;  %250 = vadd.xlane.f32.xlu0 %v249_v22  ;;  %v311_v6 = vsel %vm309_vm10, %v304_v5, 0 }
 0x379   :  { %5790 = vpow2.f32 %v597_v23 }
 0x37f   :  { %v5789_v24 = vpop.eup %5788 }
 0x380   :  { %v599_v25 = vsel %vm233_vm8, %v5789_v24, 0.0 }
 0x381   :  { %600 = vadd.xlane.f32.xlu0 %v599_v25 }
 0x383   :  { %v5791_v27 = vpop.eup %5790 }
 0x384   :  { %v602_v28 = vsel %vm233_vm8, %v5791_v27, 0.0 }
 0x385   :  { %603 = vadd.xlane.f32.xlu0 %v602_v28 }
 0x386   :  { %257 = vrot.lane.b32.xlu1 %v6123_v26, %s6035_s15 }
 0x38a   :  { %710 = vrot.lane.b32.xlu1 %v6123_v26, %s6036_s16 }
 0x38e   :  { %708 = vrot.lane.b32.xlu1 %v6123_v26, %s6037_s17 }
 0x39b   :  { %610 = vrot.lane.b32.xlu0 %v6123_v26, %s6038_s18 }
 0x3b2   :  { %412 = vmax.xlane.f32.xlu1 %v411_v31 }
 0x3ba   :  { %415 = vmax.xlane.f32.xlu0 %v414_v34 }
 0x402   :  { %v248_v35 = vpop.xlane.xlu1 %247 }
 0x403   :  { %5792 = vrcp.f32 %v248_v35 }
 0x404   :  { %v251_v36 = vpop.xlane.xlu0 %250 }
 0x405   :  { %5794 = vrcp.f32 %v251_v36 }
 0x406   :  { %v258_v37 = vpop.permute.xlu1 %257 }
 0x407   :  { %5282 = vmatpush3.bf16.msra.mxu1 %v258_v37  ;;  %v49_v37 = vld [vmem:[%s7099_s2 + $0x8] sm:$0xff] }
 0x408   :  { %5287 = vmatprep.subr.bf16.mxu1 %v6028_v8 }
 0x40a   :  { %v711_v52 = vpop.permute.xlu1 %710 }
 0x40b   :  { %v716_v54 = vsel %vm181_vm2, %v711_v52, 0  ;;  %v50_v52 = vld [vmem:[%s7099_s2 + $0x10] sm:$0xff] }
 0x40d   :  { %v5793_v38 = vpop.eup %5792 }
 0x40e   :  { %v601_v39 = vpop.xlane.xlu0 %600  ;;  %v254_v41 = vmul.f32 %v5793_v38, %v5785_v16  ;;  %v709_v55 = vpop.permute.xlu1 %708  ;;  %v481_v38 = vpack.c.bf16 %v49_v37, %v49_v37 }
 0x40f   :  { %v5795_v40 = vpop.eup %5794  ;;  %5796 = vrcp.f32 %v601_v39 }
 0x410   :  { %v255_v42 = vmul.f32 %v5795_v40, %v5787_v20  ;;  %v487_v39 = vsel %vm309_vm10, %v481_v38, 0  ;;  %v4749_v38 = vld [vmem:[%s7103_s6] ss:$0 sm:$0xff] }
 0x412   :  { %v604_v43 = vpop.xlane.xlu0 %603  ;;  %v256_v45 = vpack.c.bf16 %v255_v42, %v254_v41 }
 0x413   :  { %5798 = vrcp.f32 %v604_v43 }
 0x414   :  { %5284 = vmatmul.mubr.msk.bf16.vlgmr.msra.gmra.mrb[8].mxu1 %vm233_vm8, %v256_v45 }
 0x415   :  { %5289 = vmatprep.mubr.msk.bf16.mxu1 %vm6029_vm1, %v6028_v8  ;;  %5288 = vmatpush3.bf16.msra.mxu1 %v311_v6 }
 0x416   :  { %v611_v46 = vpop.permute.xlu0 %610  ;;  %5299 = vmatprep.subr.bf16.mxu1 %v6028_v8 }
 0x417   :  { %5318 = vmatpush3.bf16.msra.mxu0 %v611_v46 }
 0x418   :  { %5329 = vmatprep.subr.bf16.mxu0 %v6028_v8 }
 0x419   :  { %v5797_v47 = vpop.eup %5796 }
 0x41a   :  { %v607_v50 = vmul.f32 %v5797_v47, %v5789_v24 }
 0x41d   :  { %v5799_v49 = vpop.eup %5798 }
 0x41e   :  { %v608_v51 = vmul.f32 %v5799_v49, %v5791_v27 }
 0x420   :  { %v609_v53 = vpack.c.bf16 %v608_v51, %v607_v50 }
 0x422   :  { %5320 = vmatmul.mubr.msk.bf16.vlgmr.msra.gmra.mrb[8].mxu0 %vm233_vm8, %v609_v53  ;;  %v657_v53 = vpack.c.bf16 %v50_v52, %v50_v52  ;;  %v5678_v52 = vld [vmem:[%s7101_s4 + $0x50] sm:$0xff]  }
 0x423   :  { %5330 = vmatpush3.bf16.xpose.msra.mxu0 %v716_v54  ;;  %5331 = vmatprep.mubr.msk.bf16.mxu0 %vm6029_vm1, %v6028_v8 }
 0x42a   :  { %5332 = vmatmul.mubr.msk.bf16.vlgmr.msra.gmra.mrb[12].mxu0 %vm181_vm2, %v709_v55 }
 0x43f   :  { %v413_v56 = vpop.xlane.xlu1 %412 }
 0x440   :  { %v417_v57 = vsub.f32 %v409_v30, %v413_v56 }
 0x442   :  { %v419_v58 = vmul.f32 1.442695, %v417_v57 }
 0x444   :  { %5800 = vpow2.f32 %v419_v58 }
 0x447   :  { %v416_v59 = vpop.xlane.xlu0 %415 }
 0x448   :  { %v418_v60 = vsub.f32 %v410_v33, %v416_v59  ;;  %v663_v59 = vsel %vm309_vm10, %v657_v53, 0  ;;  %v5679_v53 = vld [vmem:[%s7101_s4 + $0x10] sm:$0xff]  }
 0x44a   :  { %v421_v61 = vmul.f32 1.442695, %v418_v60 }
 0x44c   :  { %5802 = vpow2.f32 %v421_v61 }
 0x44e   :  { %v5801_v62 = vpop.eup %5800 }
 0x44f   :  { %v423_v63 = vsel %vm233_vm8, %v5801_v62, 0.0 }
 0x450   :  { %424 = vadd.xlane.f32.xlu1 %v423_v63 }
 0x456   :  { %v5803_v2 = vpop.eup %5802 }
 0x457   :  { %v426_v3 = vsel %vm233_vm8, %v5803_v2, 0.0 }
 0x458   :  { %427 = vadd.xlane.f32.xlu0 %v426_v3 }
 0x461   :  { %434 = vrot.lane.b32.xlu1 %v6123_v26, %s6039_s19 }
 0x4dd   :  { %v425_v7 = vpop.xlane.xlu1 %424 }
 0x4de   :  { %5804 = vrcp.f32 %v425_v7 }
 0x4e1   :  { %v435_v15 = vpop.permute.xlu1 %434 }
 0x4e5   :  { %v428_v9 = vpop.xlane.xlu0 %427 }
 0x4e6   :  { %5806 = vrcp.f32 %v428_v9 }
 0x4e7   :  { %v297_v10 = vpop.f32.mrb[8].mxu1 }
 0x4e8   :  { %v5285_v11 = vpop.f32.mrb[9].mxu1  ;;  %v5805_v16 = vpop.eup %5804 }
 0x4e9   :  { %v300_v12 = vpop.f32.mrb[10].mxu1  ;;  %v431_v18 = vmul.f32 %v5805_v16, %v5801_v62  ;;  %v51_v62 = vld [vmem:[%s7099_s2 + $0x18] sm:$0xff] }
 0x4ea   :  { %v305_v13 = vpack.c.bf16 %v300_v12, %v297_v10  ;;  %v5286_v14 = vpop.f32.mrb[11].mxu1 }
 0x4ec   :  { %5290 = vmatmul.mubr.msk.bf16.vlgmr.msra.gmra.mrb[12].mxu1 %vm181_vm2, %v305_v13 }
 0x4ed   :  { %5300 = vmatpush3.bf16.msra.mxu1 %v435_v15  ;;  %5301 = vmatprep.mubr.msk.bf16.mxu1 %vm6029_vm1, %v6028_v8 }
 0x4ee   :  { %5305 = vmatprep.subr.bf16.mxu1 %v6028_v8 }
 0x4f0   :  { %v5807_v17 = vpop.eup %5806 }
 0x4f1   :  { %v432_v19 = vmul.f32 %v5807_v17, %v5803_v2  ;;  %v833_v2 = vpack.c.bf16 %v51_v62, %v51_v62  ;;  %v5689_v62 = vld [vmem:[%s7101_s4 + $0x38] sm:$0xff]  }
 0x4f3   :  { %v433_v20 = vpack.c.bf16 %v432_v19, %v431_v18  ;;  %v839_v7 = vsel %vm309_vm10, %v833_v2, 0 }
 0x4f5   :  { %5302 = vmatmul.mubr.msk.bf16.vlgmr.msra.gmra.mrb[16].mxu1 %vm233_vm8, %v433_v20  ;;  %v650_v21 = vpop.f32.mrb[8].mxu0 }
 0x4f6   :  { %v5321_v22 = vpop.f32.mrb[9].mxu0  ;;  %5307 = vmatprep.mubr.msk.bf16.mxu1 %vm6029_vm1, %v6028_v8  ;;  %5306 = vmatpush3.bf16.msra.mxu1 %v487_v39 }
 0x4f7   :  { %v653_v23 = vpop.f32.mrb[10].mxu0  ;;  %5323 = vmatprep.subr.bf16.mxu1 %v6028_v8 }
 0x4f8   :  { %v658_v24 = vpack.c.bf16 %v653_v23, %v650_v21  ;;  %v5322_v25 = vpop.f32.mrb[11].mxu0 }
 0x4f9   :  { %v5667_v25 = vld [vmem:[%s7100_s3 + $0x24] ss:$16 sps:$4 sm:$0xff]  }
 0x4fd   :  { %v752_v27 = vpop.f32.mrb[12].mxu0 }
 0x4fe   :  { %v759_v28 = vmul.f32 0.35355338, %v752_v27  ;;  %v5333_v29 = vpop.f32.mrb[13].mxu0  ;;  %v6041_v27 = vmov 0  }
 0x4ff   :  { %v755_v30 = vpop.f32.mrb[14].mxu0  ;;  %984 = vmatprep.mubr.bf16.mxu0 %v6041_v27 }
 0x500   :  { %v760_v31 = vmul.f32 0.35355338, %v755_v30  ;;  %v5334_v32 = vpop.f32.mrb[15].mxu0  ;;  %v761_v33 = vsel %vm6151_vm7, %v759_v28, -1e+30 }
 0x501   :  { %v763_v34 = vsel %vm233_vm8, %v761_v33, -inf  ;;  %v5670_v28 = vld [vmem:[%s7100_s3 + $0xc] ss:$16 sps:$4 sm:$0xff]  }
 0x502   :  { %764 = vmax.xlane.f32.xlu0 %v763_v34  ;;  %v762_v35 = vsel %vm6155_vm9, %v760_v31, -1e+30 }
 0x503   :  { %v766_v36 = vsel %vm233_vm8, %v762_v35, -inf }
 0x506   :  { %767 = vmax.xlane.f32.xlu0 %v766_v36 }
 0x58f   :  { %v765_v40 = vpop.xlane.xlu0 %764 }
 0x590   :  { %v769_v41 = vsub.f32 %v761_v33, %v765_v40 }
 0x592   :  { %v771_v42 = vmul.f32 1.442695, %v769_v41 }
 0x593   :  { %v768_v43 = vpop.xlane.xlu0 %767 }
 0x594   :  { %5808 = vpow2.f32 %v771_v42  ;;  %v770_v45 = vsub.f32 %v762_v35, %v768_v43  ;;  %v5668_v42 = vld [vmem:[%s7100_s3 + $0x8] ss:$16 sps:$4 sm:$0xff]  }
 0x596   :  { %v773_v46 = vmul.f32 1.442695, %v770_v45  ;;  %v5673_v45 = vld [vmem:[%s7100_s3 + $0x2c] ss:$16 sps:$4 sm:$0xff]  }
 0x598   :  { %5810 = vpow2.f32 %v773_v46  ;;  %v5671_v46 = vld [vmem:[%s7100_s3 + $0x28] ss:$16 sps:$4 sm:$0xff]  }
 0x59e   :  { %v5809_v47 = vpop.eup %5808 }
 0x59f   :  { %v775_v49 = vsel %vm233_vm8, %v5809_v47, 0.0 }
 0x5a0   :  { %776 = vadd.xlane.f32.xlu0 %v775_v49  ;;  %v5675_v49 = vld [vmem:[%s7101_s4] sm:$0xff]  }
 0x5a2   :  { %v5811_v50 = vpop.eup %5810 }
 0x5a3   :  { %v778_v51 = vsel %vm233_vm8, %v5811_v50, 0.0 }
 0x5a4   :  { %779 = vadd.xlane.f32.xlu0 %v778_v51  ;;  %v5677_v51 = vld [vmem:[%s7101_s4 + $0x8] sm:$0xff]  }
 0x5ba   :  { %786 = vrot.lane.b32.xlu0 %v6123_v26, %s6040_s24 }
 0x5c8   :  { %v474_v54 = vpop.f32.mrb[16].mxu1 }
 0x5c9   :  { %v5303_v55 = vpop.f32.mrb[17].mxu1 }
 0x5ca   :  { %v477_v56 = vpop.f32.mrb[18].mxu1  ;;  %v5681_v55 = vld [vmem:[%s7101_s4 + $0x18] sm:$0xff]  }
 0x5cb   :  { %v482_v57 = vpack.c.bf16 %v477_v56, %v474_v54  ;;  %v5304_v58 = vpop.f32.mrb[19].mxu1  ;;  %v5680_v54 = vld [vmem:[%s7101_s4 + $0x58] sm:$0xff]   ;;  %v5682_v56 = vld [vmem:[%s7101_s4 + $0x60] sm:$0xff]  }
 0x5cc   :  { %v5684_v58 = vld [vmem:[%s7101_s4 + $0x68] sm:$0xff]  }
 0x5cd   :  { %5308 = vmatmul.mubr.msk.bf16.vlgmr.msra.gmra.mrb[12].mxu1 %vm181_vm2, %v482_v57  ;;  %v5683_v57 = vld [vmem:[%s7101_s4 + $0x20] sm:$0xff]  }
 0x5ce   :  { %5324 = vmatpush3.bf16.msra.mxu1 %v663_v59  ;;  %5325 = vmatprep.mubr.msk.bf16.mxu1 %vm6029_vm1, %v6028_v8  ;;  %v5685_v59 = vld [vmem:[%s7101_s4 + $0x28] sm:$0xff]  }
 0x5cf   :  { %5335 = vmatprep.subr.bf16.mxu1 %v6028_v8 }
 0x5d9   :  { %5326 = vmatmul.mubr.msk.bf16.vlgmr.msra.gmra.mrb[12].mxu1 %vm181_vm2, %v658_v24  ;;  %v5665_v24 = vld [vmem:[%s7100_s3 + $0x20] ss:$16 sps:$4 sm:$0xff]  }
 0x5da   :  { %5337 = vmatprep.mubr.msk.bf16.mxu1 %vm6029_vm1, %v6028_v8 }
 0x62d   :  { %v777_v26 = vpop.xlane.xlu0 %776 }
 0x62e   :  { %5812 = vrcp.f32 %v777_v26  ;;  %v5686_v26 = vld [vmem:[%s7101_s4 + $0x70] sm:$0xff]  }
 0x631   :  { %v780_v60 = vpop.xlane.xlu0 %779 }
 0x632   :  { %5814 = vrcp.f32 %v780_v60  ;;  %v5687_v60 = vld [vmem:[%s7101_s4 + $0x30] sm:$0xff]  }
 0x635   :  { %v787_v61 = vpop.permute.xlu0 %786 }
 0x636   :  { %5336 = vmatpush3.bf16.msra.mxu1 %v787_v61  ;;  %v5688_v61 = vld [vmem:[%s7101_s4 + $0x78] sm:$0xff]  }
 0x637   :  { %5341 = vmatprep.subr.bf16.mxu1 %v6028_v8 }
 0x638   :  { %v5813_v63 = vpop.eup %5812 }
 0x639   :  { %v783_v4 = vmul.f32 %v5813_v63, %v5809_v47  ;;  %v5674_v47 = vld [vmem:[%s7101_s4 + $0x40] sm:$0xff]  }
 0x63c   :  { %v5815_v3 = vpop.eup %5814 }
 0x63d   :  { %v784_v5 = vmul.f32 %v5815_v3, %v5811_v50  ;;  %v5676_v50 = vld [vmem:[%s7101_s4 + $0x48] sm:$0xff]  }
 0x63f   :  { %v785_v6 = vpack.c.bf16 %v784_v5, %v783_v4 }
 0x641   :  { %5338 = vmatmul.mubr.msk.bf16.vlgmr.msra.gmra.mrb[20].mxu1 %vm233_vm8, %v785_v6 }
 0x642   :  { %5342 = vmatpush3.bf16.msra.mxu1 %v839_v7  ;;  %5343 = vmatprep.mubr.msk.bf16.mxu1 %vm6029_vm1, %v6028_v8 }
 0x643   :  { %5098 = vmatprep.subr.bf16.mxu1 %v5674_v47 }
 0x714   :  { %v826_v9 = vpop.f32.mrb[20].mxu1 }
 0x715   :  { %v5339_v10 = vpop.f32.mrb[21].mxu1 }
 0x716   :  { %v829_v11 = vpop.f32.mrb[22].mxu1 }
 0x717   :  { %v834_v12 = vpack.c.bf16 %v829_v11, %v826_v9  ;;  %v5340_v13 = vpop.f32.mrb[23].mxu1 }
 0x719   :  { %5344 = vmatmul.mubr.msk.bf16.vlgmr.msra.gmra.mrb[12].mxu1 %vm181_vm2, %v834_v12 }
 0x71a   :  { %5099 = vmatpush3.bf16.msra.mxu1 %v5675_v49 }
 0x71b   :  { %5100 = vmatprep.subr.bf16.mxu1 %v5676_v50 }
 0x71e   :  { %5101 = vmatpush3.bf16.msra.mxu1 %v5677_v51 }
 0x71f   :  { %5102 = vmatprep.subr.bf16.mxu1 %v5678_v52 }
 0x722   :  { %5103 = vmatpush3.bf16.msra.mxu1 %v5679_v53 }
 0x723   :  { %5104 = vmatprep.subr.bf16.mxu1 %v5680_v54 }
 0x726   :  { %5105 = vmatpush3.bf16.msra.mxu1 %v5681_v55 }
 0x727   :  { %5106 = vmatprep.subr.bf16.mxu1 %v5682_v56 }
 0x72a   :  { %5107 = vmatpush3.bf16.msra.mxu1 %v5683_v57 }
 0x72b   :  { %5108 = vmatprep.subr.bf16.mxu1 %v5684_v58 }
 0x72e   :  { %5109 = vmatpush3.bf16.msra.mxu1 %v5685_v59 }
 0x72f   :  { %5110 = vmatprep.subr.bf16.mxu1 %v5686_v26 }
 0x732   :  { %5111 = vmatpush3.bf16.msra.mxu1 %v5687_v60  ;;  %v4830_v60 = vld [vmem:[%s7102_s5 + $0x1] ss:$0 sm:$0xff] }
 0x733   :  { %5112 = vmatprep.subr.bf16.mxu1 %v5688_v61 }
 0x736   :  { %5113 = vmatpush3.bf16.msra.mxu1 %v5689_v62 }
 0x737   :  { %5373 = vmatprep.subr.bf16.mxu1 %v6028_v8 }
 0x7ec   :  { %v875_v14 = vpop.f32.mrb[12].mxu1 }
 0x7ed   :  { %v6251_v15 = vadd.f32 %v875_v14, %v6088_v0  ;;  %v5345_v16 = vpop.f32.mrb[13].mxu1  ;;  %v5664_v0 = vld [vmem:[%s7100_s3 + $0x4] ss:$16 sps:$4 sm:$0xff]  }
 0x7ee   :  { %v878_v17 = vpop.f32.mrb[14].mxu1  ;;  %952 = vmatprep.subr.bf16.mxu0 %v5664_v0 }
 0x7ef   :  { %v6254_v18 = vadd.f32 %v878_v17, %v6093_v1  ;;  %v5346_v19 = vpop.f32.mrb[15].mxu1  ;;  %v884_v20 = vmul.f32 %v6251_v15, %v6251_v15  ;;  %v5662_v1 = vld [vmem:[%s7100_s3] ss:$16 sps:$4 sm:$0xff]  }
 0x7f0   :  { %953 = vmatpush1.bf16.msra.mxu0 %v5662_v1 }
 0x7f1   :  { %v886_v21 = vsel %vm96_vm0, %v884_v20, 0.0  ;;  %v885_v22 = vmul.f32 %v6254_v18, %v6254_v18  ;;  %954 = vmatprep.subr.bf16.mxu0 %v5667_v25 }
 0x7f2   :  { %887 = vadd.xlane.f32.xlu1 %v886_v21 }
 0x7f3   :  { %v889_v23 = vsel %vm96_vm0, %v885_v22, 0.0 }
 0x7f4   :  { %890 = vadd.xlane.f32.xlu0 %v889_v23  ;;  %955 = vmatpush1.bf16.msra.mxu0 %v5665_v24 }
 0x7f5   :  { %995 = vmatprep.subr.bf16.mxu0 %v5670_v28 }
 0x87f   :  { %v888_v29 = vpop.xlane.xlu1 %887 }
 0x880   :  { %v892_v30 = vmul.f32 0.03125, %v888_v29 }
 0x881   :  { %v891_v31 = vpop.xlane.xlu0 %890 }
 0x882   :  { %v894_v32 = vadd.f32 1e-05, %v892_v30  ;;  %v893_v33 = vmul.f32 0.03125, %v891_v31 }
 0x884   :  { %5816 = vrsqrt.f32 %v894_v32  ;;  %v895_v34 = vadd.f32 1e-05, %v893_v33 }
 0x886   :  { %5818 = vrsqrt.f32 %v895_v34 }
 0x88e   :  { %v5817_v35 = vpop.eup %5816 }
 0x88f   :  { %v898_v36 = vmul.f32 %v5817_v35, %v6251_v15 }
 0x890   :  { %v5819_v37 = vpop.eup %5818 }
 0x891   :  { %v899_v39 = vmul.f32 %v5819_v37, %v6254_v18  ;;  %v906_v40 = vmul.f32 %v4749_v38, %v898_v36 }
 0x893   :  { %v907_v41 = vmul.f32 %v4749_v38, %v899_v39 }
 0x895   :  { %v908_v43 = vpack.c.bf16 %v907_v41, %v906_v40 }
 0x897   :  { %4758 = vmatmul.mubr.msk.bf16.vlgmr.msra.gmra.mrb[16].mxu0 %vm96_vm0, %v908_v43 }
 0x898   :  { %996 = vmatpush1.bf16.msra.mxu0 %v5668_v42  ;;  %1027 = vmatprep.mubr.bf16.mxu0 %v6041_v27 }
 0x899   :  { %997 = vmatprep.subr.bf16.mxu0 %v5673_v45 }
 0x89c   :  { %998 = vmatpush1.bf16.msra.mxu0 %v5671_v46 }
 0x89d   :  { %5347 = vmatprep.subr.bf16.mxu0 %v6028_v8 }
 0x89f   :  { %4759 = vmatmul.mubr.msk.bf16.vlgmr.msra.gmra.mrb[20].mxu0 %vm96_vm0, %v908_v43 }
 0x8a0   :  { %5351 = vmatprep.mubr.msk.bf16.mxu0 %vm6029_vm1, %v6028_v8 }
 0x96a   :  { %v986_v63 = vpop.f32.mrb[16].mxu0 }
 0x96b   :  { %v4760_v2 = vmul.f32 -1.442695, %v986_v63  ;;  %v988_v3 = vpop.f32.mrb[17].mxu0 }
 0x96c   :  { %v4761_v4 = vmul.f32 -1.442695, %v988_v3  ;;  %v990_v5 = vpop.f32.mrb[18].mxu0 }
 0x96d   :  { %5820 = vpow2.f32 %v4760_v2  ;;  %v4762_v6 = vmul.f32 -1.442695, %v990_v5  ;;  %v992_v7 = vpop.f32.mrb[19].mxu0 }
 0x96e   :  { %5822 = vpow2.f32 %v4761_v4  ;;  %v4763_v9 = vmul.f32 -1.442695, %v992_v7 }
 0x96f   :  { %5824 = vpow2.f32 %v4762_v6 }
 0x970   :  { %5826 = vpow2.f32 %v4763_v9 }
 0x972   :  { %v1029_v10 = vpop.f32.mrb[20].mxu0 }
 0x973   :  { %v1031_v11 = vpop.f32.mrb[21].mxu0 }
 0x974   :  { %v1033_v12 = vpop.f32.mrb[22].mxu0 }
 0x975   :  { %v1035_v13 = vpop.f32.mrb[23].mxu0 }
 0x977   :  { %v5821_v14 = vpop.eup %5820 }
 0x978   :  { %v5823_v16 = vpop.eup %5822  ;;  %v1050_v17 = vadd.f32 1.0, %v5821_v14 }
 0x979   :  { %v5825_v19 = vpop.eup %5824  ;;  %v1051_v20 = vadd.f32 1.0, %v5823_v16 }
 0x97a   :  { %v5827_v21 = vpop.eup %5826  ;;  %5828 = vrcp.f32 %v1050_v17  ;;  %v1052_v22 = vadd.f32 1.0, %v5825_v19 }
 0x97b   :  { %5830 = vrcp.f32 %v1051_v20  ;;  %v1053_v23 = vadd.f32 1.0, %v5827_v21 }
 0x97c   :  { %5832 = vrcp.f32 %v1052_v22 }
 0x97d   :  { %5834 = vrcp.f32 %v1053_v23 }
 0x984   :  { %v5829_v0 = vpop.eup %5828 }
 0x985   :  { %v5831_v1 = vpop.eup %5830  ;;  %v1062_v24 = vmul.f32 %v5829_v0, %v986_v63 }
 0x986   :  { %v5833_v25 = vpop.eup %5832  ;;  %v1063_v28 = vmul.f32 %v5831_v1, %v988_v3 }
 0x987   :  { %v5835_v29 = vpop.eup %5834  ;;  %v1064_v30 = vmul.f32 %v5833_v25, %v990_v5  ;;  %v1066_v31 = vmul.f32 %v1062_v24, %v1029_v10 }
 0x988   :  { %v1065_v32 = vmul.f32 %v5835_v29, %v992_v7  ;;  %v1067_v33 = vmul.f32 %v1063_v28, %v1031_v11 }
 0x989   :  { %v1068_v34 = vmul.f32 %v1064_v30, %v1033_v12 }
 0x98a   :  { %v1069_v35 = vmul.f32 %v1065_v32, %v1035_v13 }
 0x98b   :  { %v1070_v36 = vpack.c.bf16 %v1068_v34, %v1066_v31 }
 0x98c   :  { %v1071_v37 = vpack.c.bf16 %v1069_v35, %v1067_v33 }
 0x98e   :  { %1200 = vmatprep.mubr.bf16.mxu1 %v1071_v37 }
 0x98f   :  { %1201 = vmatmul.mubr.bf16.vlgmr.msra.gmra.mrb[24].mxu1 %v1070_v36 }
 0x990   :  { %5375 = vmatprep.mubr.msk.bf16.mxu1 %vm6029_vm1, %v6028_v8 }
 0xa62   :  { %v5114_v38 = vpop.f32.mrb[24].mxu1 }
 0xa63   :  { %v5115_v39 = vpop.f32.mrb[25].mxu1 }
 0xa64   :  { %v5116_v40 = vadd.f32 %v5115_v39, %v5114_v38  ;;  %v5117_v41 = vpop.f32.mrb[26].mxu1 }
 0xa65   :  { %v5118_v42 = vpop.f32.mrb[27].mxu1 }
 0xa66   :  { %v6350_v43 = vadd.f32 %v6251_v15, %v5116_v40  ;;  %v5119_v45 = vadd.f32 %v5118_v42, %v5117_v41  ;;  %v5690_v15 = vld [vmem:[%s7098_s1 + $0x10] sm:$0xff]  }
 0xa67   :  { %5348 = vmatpush3.bf16.msra.mxu0 %v5690_v15 }
 0xa68   :  { %v6353_v46 = vadd.f32 %v6254_v18, %v5119_v45  ;;  %v1267_v47 = vmul.f32 %v6350_v43, %v6350_v43  ;;  %v5691_v18 = vld [vmem:[%s7098_s1 + $0x18] sm:$0xff]   ;;  %5349 = vmatprep.subr.bf16.mxu0 %v6028_v8 }
 0xa6a   :  { %v1269_v49 = vsel %vm96_vm0, %v1267_v47, 0.0  ;;  %v1268_v50 = vmul.f32 %v6353_v46, %v6353_v46 }
 0xa6b   :  { %1270 = vadd.xlane.f32.xlu1 %v1269_v49  ;;  %5350 = vmatpush3.bf16.msra.mxu0 %v5691_v18 }
 0xa6c   :  { %v1272_v51 = vsel %vm96_vm0, %v1268_v50, 0.0  ;;  %5355 = vmatprep.subr.bf16.mxu0 %v6028_v8 }
 0xa6f   :  { %1273 = vadd.xlane.f32.xlu1 %v1272_v51 }
 0xaf8   :  { %v1271_v52 = vpop.xlane.xlu1 %1270 }
 0xaf9   :  { %v1275_v53 = vmul.f32 0.03125, %v1271_v52 }
 0xafb   :  { %v1277_v54 = vadd.f32 1e-05, %v1275_v53 }
 0xafc   :  { %v1274_v55 = vpop.xlane.xlu1 %1273 }
 0xafd   :  { %5836 = vrsqrt.f32 %v1277_v54  ;;  %v1276_v56 = vmul.f32 0.03125, %v1274_v55 }
 0xaff   :  { %v1278_v57 = vadd.f32 1e-05, %v1276_v56 }
 0xb01   :  { %5838 = vrsqrt.f32 %v1278_v57 }
 0xb07   :  { %v5837_v58 = vpop.eup %5836 }
 0xb08   :  { %v1281_v59 = vmul.f32 %v5837_v58, %v6350_v43 }
 0xb0a   :  { %v1289_v62 = vmul.f32 %v4830_v60, %v1281_v59 }
 0xb0b   :  { %v5839_v26 = vpop.eup %5838 }
 0xb0c   :  { %v1282_v61 = vmul.f32 %v5839_v26, %v6353_v46 }
 0xb0e   :  { %v1290_v63 = vmul.f32 %v4830_v60, %v1282_v61 }
 0xb10   :  { %v1291_v2 = vpack.c.bf16 %v1290_v63, %v1289_v62 }
 0xb12   :  { %5352 = vmatmul.mubr.msk.bf16.vlgmr.msra.gmra.mrb[24].mxu0 %vm96_vm0, %v1291_v2 }
 0xb13   :  { %5357 = vmatprep.mubr.msk.bf16.mxu0 %vm6029_vm1, %v6028_v8 }
 0xbe5   :  { %v1341_v3 = vpop.f32.mrb[24].mxu0 }
 0xbe6   :  { %v5353_v4 = vpop.f32.mrb[25].mxu0 }
 0xbe7   :  { %v1344_v5 = vpop.f32.mrb[26].mxu0 }
 0xbe8   :  { %v6377_v6 = vpack.c.bf16 %v1344_v5, %v1341_v3  ;;  %v5354_v7 = vpop.f32.mrb[27].mxu0 }
 0xbea   :  { %1526 = vrot.lane.b32.xlu0 %v6377_v6, %s6032_s12  ;;  %1350 = vrot.lane.b32.xlu1 %v6377_v6, %s6031_s11 }
 0xbee   :  { %1524 = vrot.lane.b32.xlu1 %v6377_v6, %s6030_s10 }
 0xbf2   :  { %1702 = vrot.lane.b32.xlu1 %v6377_v6, %s6033_s13 }
 0xbf6   :  { %1700 = vrot.lane.b32.xlu1 %v6377_v6, %s6034_s14 }
 0xc5c   :  { %v1527_v9 = vpop.permute.xlu0 %1526  ;;  %v1351_v10 = vpop.permute.xlu1 %1350 }
 0xc5d   :  { %v1532_v11 = vsel %vm181_vm2, %v1527_v9, 0  ;;  %v1356_v12 = vsel %vm181_vm2, %v1351_v10, 0 }
 0xc5e   :  { %5356 = vmatpush3.bf16.xpose.msra.mxu0 %v1356_v12  ;;  %5374 = vmatpush3.bf16.xpose.msra.mxu1 %v1532_v11 }
 0xc5f   :  { %5391 = vmatprep.subr.bf16.mxu1 %v6028_v8  ;;  %5361 = vmatprep.subr.bf16.mxu0 %v6028_v8 }
 0xc60   :  { %v1525_v13 = vpop.permute.xlu1 %1524 }
 0xc64   :  { %v1703_v14 = vpop.permute.xlu1 %1702 }
 0xc65   :  { %v1708_v16 = vsel %vm181_vm2, %v1703_v14, 0  ;;  %5358 = vmatmul.mubr.msk.bf16.vlgmr.msra.gmra.mrb[28].mxu0 %vm181_vm2, %v6377_v6  ;;  %5376 = vmatmul.mubr.msk.bf16.vlgmr.msra.gmra.mrb[28].mxu1 %vm181_vm2, %v1525_v13 }
 0xc66   :  { %5392 = vmatpush3.bf16.xpose.msra.mxu1 %v1708_v16  ;;  %5393 = vmatprep.mubr.msk.bf16.mxu1 %vm6029_vm1, %v6028_v8 }
 0xc67   :  { %5397 = vmatprep.subr.bf16.mxu1 %v6028_v8  ;;  %5363 = vmatprep.mubr.msk.bf16.mxu0 %vm6029_vm1, %v6028_v8 }
 0xc68   :  { %v1701_v17 = vpop.permute.xlu1 %1700 }
 0xc6d   :  { %5394 = vmatmul.mubr.msk.bf16.vlgmr.msra.gmra.mrb[32].mxu1 %vm181_vm2, %v1701_v17 }
 0xc6e   :  { %5399 = vmatprep.mubr.msk.bf16.mxu1 %vm6029_vm1, %v6028_v8 }
 0xd38   :  { %v1392_v19 = vpop.f32.mrb[28].mxu0  ;;  %v1568_v20 = vpop.f32.mrb[28].mxu1 }
 0xd39   :  { %v1399_v21 = vmul.f32 0.35355338, %v1392_v19  ;;  %v5359_v22 = vpop.f32.mrb[29].mxu0  ;;  %v5377_v23 = vpop.f32.mrb[29].mxu1  ;;  %v1575_v3 = vmul.f32 0.35355338, %v1568_v20 }
 0xd3a   :  { %v1395_v0 = vpop.f32.mrb[30].mxu0  ;;  %v1571_v1 = vpop.f32.mrb[30].mxu1 }
 0xd3b   :  { %v1400_v24 = vmul.f32 0.35355338, %v1395_v0  ;;  %v5360_v25 = vpop.f32.mrb[31].mxu0  ;;  %v5378_v28 = vpop.f32.mrb[31].mxu1  ;;  %v1401_v29 = vsel %vm6151_vm7, %v1399_v21, -1e+30 }
 0xd3c   :  { %v1403_v30 = vsel %vm233_vm8, %v1401_v29, -inf  ;;  %v1576_v2 = vmul.f32 0.35355338, %v1571_v1  ;;  %v1577_v7 = vsel %vm6151_vm7, %v1575_v3, -1e+30 }
 0xd3d   :  { %v1402_v31 = vsel %vm6155_vm9, %v1400_v24, -1e+30  ;;  %1404 = vmax.xlane.f32.xlu1 %v1403_v30  ;;  %v1579_v9 = vsel %vm233_vm8, %v1577_v7, -inf }
 0xd3e   :  { %v1406_v32 = vsel %vm233_vm8, %v1402_v31, -inf  ;;  %v1578_v4 = vsel %vm6155_vm9, %v1576_v2, -1e+30 }
 0xd3f   :  { %1407 = vmax.xlane.f32.xlu0 %v1406_v32  ;;  %v1582_v5 = vsel %vm233_vm8, %v1578_v4, -inf }
 0xd40   :  { %v1744_v33 = vpop.f32.mrb[32].mxu1 }
 0xd41   :  { %v1751_v34 = vmul.f32 0.35355338, %v1744_v33  ;;  %v5395_v35 = vpop.f32.mrb[33].mxu1 }
 0xd42   :  { %v1747_v36 = vpop.f32.mrb[34].mxu1 }
 0xd43   :  { %v1752_v37 = vmul.f32 0.35355338, %v1747_v36  ;;  %v5396_v38 = vpop.f32.mrb[35].mxu1  ;;  %v1753_v39 = vsel %vm6151_vm7, %v1751_v34, -1e+30 }
 0xd44   :  { %v1755_v40 = vsel %vm233_vm8, %v1753_v39, -inf }
 0xd45   :  { %1756 = vmax.xlane.f32.xlu0 %v1755_v40  ;;  %v1754_v41 = vsel %vm6155_vm9, %v1752_v37, -1e+30 }
 0xd46   :  { %v1758_v42 = vsel %vm233_vm8, %v1754_v41, -inf }
 0xd47   :  { %1759 = vmax.xlane.f32.xlu1 %v1758_v42 }
 0xdca   :  { %v1405_v45 = vpop.xlane.xlu1 %1404 }
 0xdcb   :  { %v1409_v47 = vsub.f32 %v1401_v29, %v1405_v45 }
 0xdcc   :  { %v1408_v49 = vpop.xlane.xlu0 %1407 }
 0xdcd   :  { %v1410_v50 = vsub.f32 %v1402_v31, %v1408_v49  ;;  %v1411_v51 = vmul.f32 1.442695, %v1409_v47 }
 0xdcf   :  { %v1413_v15 = vmul.f32 1.442695, %v1410_v50  ;;  %5840 = vpow2.f32 %v1411_v51 }
 0xdd1   :  { %5842 = vpow2.f32 %v1413_v15 }
 0xdd2   :  { %v1757_v18 = vpop.xlane.xlu0 %1756 }
 0xdd3   :  { %v1761_v52 = vsub.f32 %v1753_v39, %v1757_v18 }
 0xdd4   :  { %v1760_v53 = vpop.xlane.xlu1 %1759 }
 0xdd5   :  { %v1763_v54 = vmul.f32 1.442695, %v1761_v52  ;;  %v1762_v55 = vsub.f32 %v1754_v41, %v1760_v53  ;;  %v4784_v41 = vld [vmem:[%s7099_s2 + $0x20] sm:$0xff] }
 0xdd6   :  { %v1473_v42 = vpack.c.bf16 %v4784_v41, %v4784_v41 }
 0xdd7   :  { %5844 = vpow2.f32 %v1763_v54  ;;  %v1765_v56 = vmul.f32 1.442695, %v1762_v55 }
 0xdd8   :  { %v1479_v45 = vsel %vm309_vm10, %v1473_v42, 0 }
 0xdd9   :  { %5846 = vpow2.f32 %v1765_v56  ;;  %v5841_v57 = vpop.eup %5840 }
 0xdda   :  { %v1415_v59 = vsel %vm233_vm8, %v5841_v57, 0.0 }
 0xddb   :  { %v5843_v58 = vpop.eup %5842  ;;  %1416 = vadd.xlane.f32.xlu0 %v1415_v59 }
 0xddc   :  { %v1418_v26 = vsel %vm233_vm8, %v5843_v58, 0.0 }
 0xddd   :  { %1419 = vadd.xlane.f32.xlu1 %v1418_v26 }
 0xde1   :  { %v5845_v60 = vpop.eup %5844 }
 0xde2   :  { %v1767_v61 = vsel %vm233_vm8, %v5845_v60, 0.0 }
 0xde3   :  { %v5847_v62 = vpop.eup %5846  ;;  %1768 = vadd.xlane.f32.xlu1 %v1767_v61 }
 0xde4   :  { %v1770_v63 = vsel %vm233_vm8, %v5847_v62, 0.0 }
 0xde7   :  { %1771 = vadd.xlane.f32.xlu1 %v1770_v63 }
 0xdf1   :  { %1426 = vrot.lane.b32.xlu0 %v6377_v6, %s6035_s15 }
 0xdf5   :  { %1878 = vrot.lane.b32.xlu0 %v6377_v6, %s6036_s16 }
 0xdf8   :  { %1778 = vrot.lane.b32.xlu1 %v6377_v6, %s6038_s18 }
 0xdf9   :  { %1876 = vrot.lane.b32.xlu0 %v6377_v6, %s6037_s17 }
 0xe18   :  { %1583 = vmax.xlane.f32.xlu0 %v1582_v5 }
 0xe1c   :  { %1580 = vmax.xlane.f32.xlu1 %v1579_v9 }
 0xe68   :  { %v1417_v10 = vpop.xlane.xlu0 %1416 }
 0xe69   :  { %5848 = vrcp.f32 %v1417_v10 }
 0xe6a   :  { %v1420_v11 = vpop.xlane.xlu1 %1419 }
 0xe6b   :  { %5850 = vrcp.f32 %v1420_v11 }
 0xe6c   :  { %v1427_v12 = vpop.permute.xlu0 %1426 }
 0xe6d   :  { %5362 = vmatpush3.bf16.msra.mxu0 %v1427_v12 }
 0xe6e   :  { %5367 = vmatprep.subr.bf16.mxu0 %v6028_v8 }
 0xe70   :  { %v1769_v13 = vpop.xlane.xlu1 %1768  ;;  %v1879_v25 = vpop.permute.xlu0 %1878 }
 0xe71   :  { %5852 = vrcp.f32 %v1769_v13  ;;  %v1884_v29 = vsel %vm181_vm2, %v1879_v25, 0  ;;  %v4785_v13 = vld [vmem:[%s7099_s2 + $0x28] sm:$0xff] }
 0xe73   :  { %v5849_v14 = vpop.eup %5848 }
 0xe74   :  { %v1772_v16 = vpop.xlane.xlu1 %1771  ;;  %v1423_v19 = vmul.f32 %v5849_v14, %v5841_v57  ;;  %v1877_v30 = vpop.permute.xlu0 %1876  ;;  %v1649_v14 = vpack.c.bf16 %v4785_v13, %v4785_v13 }
 0xe75   :  { %v5851_v17 = vpop.eup %5850  ;;  %5854 = vrcp.f32 %v1772_v16 }
 0xe76   :  { %v1424_v20 = vmul.f32 %v5851_v17, %v5843_v58  ;;  %v1655_v16 = vsel %vm309_vm10, %v1649_v14, 0  ;;  %v4846_v14 = vld [vmem:[%s7103_s6 + $0x1] ss:$0 sm:$0xff] }
 0xe78   :  { %v1779_v21 = vpop.permute.xlu1 %1778  ;;  %v1425_v22 = vpack.c.bf16 %v1424_v20, %v1423_v19 }
 0xe79   :  { %5398 = vmatpush3.bf16.msra.mxu1 %v1779_v21 }
 0xe7a   :  { %5364 = vmatmul.mubr.msk.bf16.vlgmr.msra.gmra.mrb[32].mxu0 %vm233_vm8, %v1425_v22  ;;  %5409 = vmatprep.subr.bf16.mxu1 %v6028_v8 }
 0xe7b   :  { %5369 = vmatprep.mubr.msk.bf16.mxu0 %vm6029_vm1, %v6028_v8  ;;  %v5853_v23 = vpop.eup %5852  ;;  %5368 = vmatpush3.bf16.msra.mxu0 %v1479_v45 }
 0xe7c   :  { %v1775_v1 = vmul.f32 %v5853_v23, %v5845_v60  ;;  %5379 = vmatprep.subr.bf16.mxu0 %v6028_v8 }
 0xe7f   :  { %v5855_v0 = vpop.eup %5854 }
 0xe80   :  { %v1776_v24 = vmul.f32 %v5855_v0, %v5847_v62 }
 0xe82   :  { %v1777_v28 = vpack.c.bf16 %v1776_v24, %v1775_v1 }
 0xe84   :  { %5400 = vmatmul.mubr.msk.bf16.vlgmr.msra.gmra.mrb[36].mxu1 %vm233_vm8, %v1777_v28  ;;  %v4786_v28 = vld [vmem:[%s7099_s2 + $0x30] sm:$0xff] }
 0xe85   :  { %5410 = vmatpush3.bf16.xpose.msra.mxu1 %v1884_v29  ;;  %5411 = vmatprep.mubr.msk.bf16.mxu1 %vm6029_vm1, %v6028_v8  ;;  %v1825_v29 = vpack.c.bf16 %v4786_v28, %v4786_v28  ;;  %v5708_v28 = vld [vmem:[%s7101_s4 + $0xd0] sm:$0xff]  }
 0xe8c   :  { %5412 = vmatmul.mubr.msk.bf16.vlgmr.msra.gmra.mrb[40].mxu1 %vm181_vm2, %v1877_v30 }
 0xe8d   :  { %2152 = vmatprep.mubr.bf16.mxu1 %v6041_v27 }
 0xea5   :  { %v1584_v31 = vpop.xlane.xlu0 %1583 }
 0xea6   :  { %v1586_v32 = vsub.f32 %v1578_v4, %v1584_v31 }
 0xea8   :  { %v1589_v33 = vmul.f32 1.442695, %v1586_v32 }
 0xea9   :  { %v1581_v34 = vpop.xlane.xlu1 %1580 }
 0xeaa   :  { %v1585_v35 = vsub.f32 %v1577_v7, %v1581_v34  ;;  %5856 = vpow2.f32 %v1589_v33 }
 0xeac   :  { %v1587_v36 = vmul.f32 1.442695, %v1585_v35  ;;  %v1831_v35 = vsel %vm309_vm10, %v1825_v29, 0  ;;  %v5709_v29 = vld [vmem:[%s7101_s4 + $0x90] sm:$0xff]  }
 0xeae   :  { %5858 = vpow2.f32 %v1587_v36 }
 0xeb4   :  { %v5857_v37 = vpop.eup %5856 }
 0xeb5   :  { %v1594_v38 = vsel %vm233_vm8, %v5857_v37, 0.0 }
 0xeb6   :  { %1595 = vadd.xlane.f32.xlu1 %v1594_v38  ;;  %v4787_v38 = vld [vmem:[%s7099_s2 + $0x38] sm:$0xff] }
 0xeb8   :  { %v5859_v39 = vpop.eup %5858 }
 0xeb9   :  { %v1591_v40 = vsel %vm233_vm8, %v5859_v39, 0.0 }
 0xeba   :  { %1592 = vadd.xlane.f32.xlu0 %v1591_v40  ;;  %v2001_v40 = vpack.c.bf16 %v4787_v38, %v4787_v38  ;;  %v5719_v38 = vld [vmem:[%s7101_s4 + $0xb8] sm:$0xff]  }
 0xed0   :  { %1602 = vrot.lane.b32.xlu0 %v6377_v6, %s6039_s19 }
 0xf43   :  { %v1596_v47 = vpop.xlane.xlu1 %1595 }
 0xf47   :  { %v1593_v49 = vpop.xlane.xlu0 %1592 }
 0xf48   :  { %5860 = vrcp.f32 %v1593_v49  ;;  %v2007_v49 = vsel %vm309_vm10, %v2001_v40, 0 }
 0xf49   :  { %5862 = vrcp.f32 %v1596_v47 }
 0xf4b   :  { %v1603_v54 = vpop.permute.xlu0 %1602 }
 0xf4d   :  { %v1466_v50 = vpop.f32.mrb[32].mxu0 }
 0xf4e   :  { %v5365_v51 = vpop.f32.mrb[33].mxu0 }
 0xf4f   :  { %v1469_v15 = vpop.f32.mrb[34].mxu0 }
 0xf50   :  { %v1474_v18 = vpack.c.bf16 %v1469_v15, %v1466_v50  ;;  %v5366_v52 = vpop.f32.mrb[35].mxu0 }
 0xf52   :  { %v5861_v53 = vpop.eup %5860  ;;  %5370 = vmatmul.mubr.msk.bf16.vlgmr.msra.gmra.mrb[36].mxu0 %vm181_vm2, %v1474_v18 }
 0xf53   :  { %v5863_v55 = vpop.eup %5862  ;;  %5380 = vmatpush3.bf16.msra.mxu0 %v1603_v54  ;;  %5381 = vmatprep.mubr.msk.bf16.mxu0 %vm6029_vm1, %v6028_v8  ;;  %v1599_v56 = vmul.f32 %v5861_v53, %v5859_v39 }
 0xf54   :  { %5385 = vmatprep.subr.bf16.mxu0 %v6028_v8  ;;  %v1600_v57 = vmul.f32 %v5863_v55, %v5857_v37 }
 0xf56   :  { %v1601_v26 = vpack.c.bf16 %v1600_v57, %v1599_v56 }
 0xf57   :  { %v1818_v58 = vpop.f32.mrb[36].mxu1 }
 0xf58   :  { %v5401_v59 = vpop.f32.mrb[37].mxu1 }
 0xf59   :  { %v1821_v60 = vpop.f32.mrb[38].mxu1 }
 0xf5a   :  { %v1826_v61 = vpack.c.bf16 %v1821_v60, %v1818_v58  ;;  %5382 = vmatmul.mubr.msk.bf16.vlgmr.msra.gmra.mrb[40].mxu0 %vm233_vm8, %v1601_v26  ;;  %v5402_v62 = vpop.f32.mrb[39].mxu1 }
 0xf5b   :  { %5387 = vmatprep.mubr.msk.bf16.mxu0 %vm6029_vm1, %v6028_v8  ;;  %5386 = vmatpush3.bf16.msra.mxu0 %v1655_v16  ;;  %v5695_v62 = vld [vmem:[%s7100_s3 + $0x60] ss:$16 sps:$4 sm:$0xff]  }
 0xf5c   :  { %5403 = vmatprep.subr.bf16.mxu0 %v6028_v8 }
 0xf5f   :  { %v1920_v63 = vpop.f32.mrb[40].mxu1 }
 0xf60   :  { %v1927_v2 = vmul.f32 0.35355338, %v1920_v63  ;;  %v5413_v3 = vpop.f32.mrb[41].mxu1  ;;  %v5697_v63 = vld [vmem:[%s7100_s3 + $0x64] ss:$16 sps:$4 sm:$0xff]  }
 0xf61   :  { %v1923_v4 = vpop.f32.mrb[42].mxu1 }
 0xf62   :  { %v1928_v5 = vmul.f32 0.35355338, %v1923_v4  ;;  %v5414_v7 = vpop.f32.mrb[43].mxu1  ;;  %v1929_v9 = vsel %vm6151_vm7, %v1927_v2, -1e+30 }
 0xf63   :  { %v1931_v10 = vsel %vm233_vm8, %v1929_v9, -inf  ;;  %v5700_v2 = vld [vmem:[%s7100_s3 + $0x4c] ss:$16 sps:$4 sm:$0xff]  }
 0xf64   :  { %1932 = vmax.xlane.f32.xlu1 %v1931_v10  ;;  %v1930_v11 = vsel %vm6155_vm9, %v1928_v5, -1e+30 }
 0xf65   :  { %v1934_v12 = vsel %vm233_vm8, %v1930_v11, -inf }
 0xf68   :  { %1935 = vmax.xlane.f32.xlu1 %v1934_v12 }
 0xff1   :  { %v1933_v17 = vpop.xlane.xlu1 %1932 }
 0xff2   :  { %v1937_v19 = vsub.f32 %v1929_v9, %v1933_v17 }
 0xff4   :  { %v1939_v20 = vmul.f32 1.442695, %v1937_v19 }
 0xff5   :  { %v1936_v21 = vpop.xlane.xlu1 %1935 }
 0xff6   :  { %5864 = vpow2.f32 %v1939_v20  ;;  %v1938_v22 = vsub.f32 %v1930_v11, %v1936_v21  ;;  %v5698_v20 = vld [vmem:[%s7100_s3 + $0x48] ss:$16 sps:$4 sm:$0xff]  }
 0xff8   :  { %v1941_v23 = vmul.f32 1.442695, %v1938_v22  ;;  %v5703_v22 = vld [vmem:[%s7100_s3 + $0x6c] ss:$16 sps:$4 sm:$0xff]  }
 0xffa   :  { %5866 = vpow2.f32 %v1941_v23  ;;  %v5701_v23 = vld [vmem:[%s7100_s3 + $0x68] ss:$16 sps:$4 sm:$0xff]  }
0x1000   :  { %v5865_v0 = vpop.eup %5864 }
0x1001   :  { %v1943_v1 = vsel %vm233_vm8, %v5865_v0, 0.0 }
0x1002   :  { %1944 = vadd.xlane.f32.xlu1 %v1943_v1  ;;  %v5705_v1 = vld [vmem:[%s7101_s4 + $0x80] sm:$0xff]  }
0x1004   :  { %v5867_v24 = vpop.eup %5866 }
0x1005   :  { %v1946_v25 = vsel %vm233_vm8, %v5867_v24, 0.0 }
0x1006   :  { %1947 = vadd.xlane.f32.xlu1 %v1946_v25  ;;  %v5707_v25 = vld [vmem:[%s7101_s4 + $0x88] sm:$0xff]  }
0x1017   :  { %1954 = vrot.lane.b32.xlu1 %v6377_v6, %s6040_s24 }
0x102d   :  { %v1642_v30 = vpop.f32.mrb[40].mxu0 }
0x102e   :  { %v5383_v31 = vpop.f32.mrb[41].mxu0 }
0x102f   :  { %v1645_v32 = vpop.f32.mrb[42].mxu0  ;;  %v5711_v31 = vld [vmem:[%s7101_s4 + $0x98] sm:$0xff]  }
0x1030   :  { %v1650_v33 = vpack.c.bf16 %v1645_v32, %v1642_v30  ;;  %v5384_v34 = vpop.f32.mrb[43].mxu0  ;;  %v5710_v30 = vld [vmem:[%s7101_s4 + $0xd8] sm:$0xff]   ;;  %v5712_v32 = vld [vmem:[%s7101_s4 + $0xe0] sm:$0xff]  }
0x1031   :  { %v5714_v34 = vld [vmem:[%s7101_s4 + $0xe8] sm:$0xff]  }
0x1032   :  { %5388 = vmatmul.mubr.msk.bf16.vlgmr.msra.gmra.mrb[36].mxu0 %vm181_vm2, %v1650_v33  ;;  %v5713_v33 = vld [vmem:[%s7101_s4 + $0xa0] sm:$0xff]  }
0x1033   :  { %5404 = vmatpush3.bf16.msra.mxu0 %v1831_v35  ;;  %5405 = vmatprep.mubr.msk.bf16.mxu0 %vm6029_vm1, %v6028_v8  ;;  %v5715_v35 = vld [vmem:[%s7101_s4 + $0xa8] sm:$0xff]  }
0x1034   :  { %5415 = vmatprep.subr.bf16.mxu0 %v6028_v8 }
0x103e   :  { %5406 = vmatmul.mubr.msk.bf16.vlgmr.msra.gmra.mrb[36].mxu0 %vm181_vm2, %v1826_v61 }
0x103f   :  { %5417 = vmatprep.mubr.msk.bf16.mxu0 %vm6029_vm1, %v6028_v8 }
0x108f   :  { %v1945_v6 = vpop.xlane.xlu1 %1944 }
0x1090   :  { %5868 = vrcp.f32 %v1945_v6  ;;  %v5716_v6 = vld [vmem:[%s7101_s4 + $0xf0] sm:$0xff]  }
0x1093   :  { %v1948_v36 = vpop.xlane.xlu1 %1947 }
0x1094   :  { %5870 = vrcp.f32 %v1948_v36  ;;  %v5717_v36 = vld [vmem:[%s7101_s4 + $0xb0] sm:$0xff]  }
0x1097   :  { %v1955_v37 = vpop.permute.xlu1 %1954 }
0x1098   :  { %5416 = vmatpush3.bf16.msra.mxu0 %v1955_v37  ;;  %v5718_v37 = vld [vmem:[%s7101_s4 + $0xf8] sm:$0xff]  }
0x1099   :  { %5421 = vmatprep.subr.bf16.mxu0 %v6028_v8 }
0x109a   :  { %v5869_v39 = vpop.eup %5868 }
0x109b   :  { %v1951_v42 = vmul.f32 %v5869_v39, %v5865_v0  ;;  %v5704_v0 = vld [vmem:[%s7101_s4 + $0xc0] sm:$0xff]  }
0x109e   :  { %v5871_v41 = vpop.eup %5870 }
0x109f   :  { %v1952_v45 = vmul.f32 %v5871_v41, %v5867_v24  ;;  %v5706_v24 = vld [vmem:[%s7101_s4 + $0xc8] sm:$0xff]  }
0x10a1   :  { %v1953_v47 = vpack.c.bf16 %v1952_v45, %v1951_v42 }
0x10a3   :  { %5418 = vmatmul.mubr.msk.bf16.vlgmr.msra.gmra.mrb[44].mxu0 %vm233_vm8, %v1953_v47 }
0x10a4   :  { %5422 = vmatpush3.bf16.msra.mxu0 %v2007_v49  ;;  %5423 = vmatprep.mubr.msk.bf16.mxu0 %vm6029_vm1, %v6028_v8 }
0x10a5   :  { %5147 = vmatprep.subr.bf16.mxu0 %v5704_v0 }
0x1176   :  { %v1994_v50 = vpop.f32.mrb[44].mxu0 }
0x1177   :  { %v5419_v51 = vpop.f32.mrb[45].mxu0 }
0x1178   :  { %v1997_v15 = vpop.f32.mrb[46].mxu0 }
0x1179   :  { %v2002_v18 = vpack.c.bf16 %v1997_v15, %v1994_v50  ;;  %v5420_v52 = vpop.f32.mrb[47].mxu0 }
0x117b   :  { %5424 = vmatmul.mubr.msk.bf16.vlgmr.msra.gmra.mrb[36].mxu0 %vm181_vm2, %v2002_v18 }
0x117c   :  { %5148 = vmatpush3.bf16.msra.mxu0 %v5705_v1 }
0x117d   :  { %5149 = vmatprep.subr.bf16.mxu0 %v5706_v24 }
0x1180   :  { %5150 = vmatpush3.bf16.msra.mxu0 %v5707_v25 }
0x1181   :  { %5151 = vmatprep.subr.bf16.mxu0 %v5708_v28 }
0x1184   :  { %5152 = vmatpush3.bf16.msra.mxu0 %v5709_v29 }
0x1185   :  { %5153 = vmatprep.subr.bf16.mxu0 %v5710_v30 }
0x1188   :  { %5154 = vmatpush3.bf16.msra.mxu0 %v5711_v31 }
0x1189   :  { %5155 = vmatprep.subr.bf16.mxu0 %v5712_v32 }
0x118c   :  { %5156 = vmatpush3.bf16.msra.mxu0 %v5713_v33 }
0x118d   :  { %5157 = vmatprep.subr.bf16.mxu0 %v5714_v34 }
0x1190   :  { %5158 = vmatpush3.bf16.msra.mxu0 %v5715_v35 }
0x1191   :  { %5159 = vmatprep.subr.bf16.mxu0 %v5716_v6 }
0x1194   :  { %5160 = vmatpush3.bf16.msra.mxu0 %v5717_v36  ;;  %v4927_v36 = vld [vmem:[%s7102_s5 + $0x2] ss:$0 sm:$0xff] }
0x1195   :  { %5161 = vmatprep.subr.bf16.mxu0 %v5718_v37 }
0x1198   :  { %5162 = vmatpush3.bf16.msra.mxu0 %v5719_v38 }
0x1199   :  { %5453 = vmatprep.subr.bf16.mxu0 %v6028_v8 }
0x124e   :  { %v2043_v53 = vpop.f32.mrb[36].mxu0 }
0x124f   :  { %v6498_v54 = vadd.f32 %v2043_v53, %v6350_v43  ;;  %v5425_v55 = vpop.f32.mrb[37].mxu0  ;;  %v5694_v43 = vld [vmem:[%s7100_s3 + $0x44] ss:$16 sps:$4 sm:$0xff]  }
0x1250   :  { %v2046_v56 = vpop.f32.mrb[38].mxu0  ;;  %2120 = vmatprep.subr.bf16.mxu1 %v5694_v43 }
0x1251   :  { %v6501_v57 = vadd.f32 %v2046_v56, %v6353_v46  ;;  %v5426_v58 = vpop.f32.mrb[39].mxu0  ;;  %v2052_v59 = vmul.f32 %v6498_v54, %v6498_v54  ;;  %v5692_v46 = vld [vmem:[%s7100_s3 + $0x40] ss:$16 sps:$4 sm:$0xff]  }
0x1252   :  { %2121 = vmatpush1.bf16.msra.mxu1 %v5692_v46 }
0x1253   :  { %v2054_v26 = vsel %vm96_vm0, %v2052_v59, 0.0  ;;  %v2053_v60 = vmul.f32 %v6501_v57, %v6501_v57  ;;  %2122 = vmatprep.subr.bf16.mxu1 %v5697_v63 }
0x1254   :  { %2055 = vadd.xlane.f32.xlu0 %v2054_v26 }
0x1255   :  { %v2057_v61 = vsel %vm96_vm0, %v2053_v60, 0.0 }
0x1256   :  { %2058 = vadd.xlane.f32.xlu1 %v2057_v61  ;;  %2123 = vmatpush1.bf16.msra.mxu1 %v5695_v62 }
0x1257   :  { %2163 = vmatprep.subr.bf16.mxu1 %v5700_v2 }
0x12e1   :  { %v2056_v3 = vpop.xlane.xlu0 %2055 }
0x12e2   :  { %v2060_v4 = vmul.f32 0.03125, %v2056_v3 }
0x12e3   :  { %v2059_v5 = vpop.xlane.xlu1 %2058 }
0x12e4   :  { %v2062_v7 = vadd.f32 1e-05, %v2060_v4  ;;  %v2061_v9 = vmul.f32 0.03125, %v2059_v5 }
0x12e6   :  { %5872 = vrsqrt.f32 %v2062_v7  ;;  %v2063_v10 = vadd.f32 1e-05, %v2061_v9 }
0x12e8   :  { %5874 = vrsqrt.f32 %v2063_v10 }
0x12f0   :  { %v5873_v11 = vpop.eup %5872 }
0x12f1   :  { %v2066_v12 = vmul.f32 %v5873_v11, %v6498_v54 }
0x12f2   :  { %v5875_v13 = vpop.eup %5874 }
0x12f3   :  { %v2067_v16 = vmul.f32 %v5875_v13, %v6501_v57  ;;  %v2074_v17 = vmul.f32 %v4846_v14, %v2066_v12 }
0x12f5   :  { %v2075_v19 = vmul.f32 %v4846_v14, %v2067_v16 }
0x12f7   :  { %v2076_v21 = vpack.c.bf16 %v2075_v19, %v2074_v17 }
0x12f9   :  { %4855 = vmatmul.mubr.msk.bf16.vlgmr.msra.gmra.mrb[44].mxu1 %vm96_vm0, %v2076_v21 }
0x12fa   :  { %2164 = vmatpush1.bf16.msra.mxu1 %v5698_v20  ;;  %2195 = vmatprep.mubr.bf16.mxu1 %v6041_v27 }
0x12fb   :  { %2165 = vmatprep.subr.bf16.mxu1 %v5703_v22 }
0x12fe   :  { %2166 = vmatpush1.bf16.msra.mxu1 %v5701_v23 }
0x12ff   :  { %5427 = vmatprep.subr.bf16.mxu1 %v6028_v8 }
0x1301   :  { %4856 = vmatmul.mubr.msk.bf16.vlgmr.msra.gmra.mrb[48].mxu1 %vm96_vm0, %v2076_v21 }
0x1302   :  { %5431 = vmatprep.mubr.msk.bf16.mxu1 %vm6029_vm1, %v6028_v8 }
0x13cc   :  { %v2154_v39 = vpop.f32.mrb[44].mxu1 }
0x13cd   :  { %v4857_v40 = vmul.f32 -1.442695, %v2154_v39  ;;  %v2156_v41 = vpop.f32.mrb[45].mxu1 }
0x13ce   :  { %v4858_v42 = vmul.f32 -1.442695, %v2156_v41  ;;  %v2158_v45 = vpop.f32.mrb[46].mxu1 }
0x13cf   :  { %5876 = vpow2.f32 %v4857_v40  ;;  %v4859_v47 = vmul.f32 -1.442695, %v2158_v45  ;;  %v2160_v49 = vpop.f32.mrb[47].mxu1 }
0x13d0   :  { %5878 = vpow2.f32 %v4858_v42  ;;  %v4860_v50 = vmul.f32 -1.442695, %v2160_v49 }
0x13d1   :  { %5880 = vpow2.f32 %v4859_v47 }
0x13d2   :  { %5882 = vpow2.f32 %v4860_v50 }
0x13d4   :  { %v2197_v51 = vpop.f32.mrb[48].mxu1 }
0x13d5   :  { %v2199_v15 = vpop.f32.mrb[49].mxu1 }
0x13d6   :  { %v2201_v18 = vpop.f32.mrb[50].mxu1 }
0x13d7   :  { %v2203_v52 = vpop.f32.mrb[51].mxu1 }
0x13d9   :  { %v5877_v53 = vpop.eup %5876 }
0x13da   :  { %v5879_v55 = vpop.eup %5878  ;;  %v2218_v56 = vadd.f32 1.0, %v5877_v53 }
0x13db   :  { %v5881_v58 = vpop.eup %5880  ;;  %v2219_v59 = vadd.f32 1.0, %v5879_v55 }
0x13dc   :  { %v5883_v26 = vpop.eup %5882  ;;  %5884 = vrcp.f32 %v2218_v56  ;;  %v2220_v60 = vadd.f32 1.0, %v5881_v58 }
0x13dd   :  { %5886 = vrcp.f32 %v2219_v59  ;;  %v2221_v61 = vadd.f32 1.0, %v5883_v26 }
0x13de   :  { %5888 = vrcp.f32 %v2220_v60 }
0x13df   :  { %5890 = vrcp.f32 %v2221_v61 }
0x13e6   :  { %v5885_v43 = vpop.eup %5884 }
0x13e7   :  { %v5887_v46 = vpop.eup %5886  ;;  %v2230_v62 = vmul.f32 %v5885_v43, %v2154_v39 }
0x13e8   :  { %v5889_v63 = vpop.eup %5888  ;;  %v2231_v2 = vmul.f32 %v5887_v46, %v2156_v41 }
0x13e9   :  { %v5891_v3 = vpop.eup %5890  ;;  %v2232_v4 = vmul.f32 %v5889_v63, %v2158_v45  ;;  %v2234_v5 = vmul.f32 %v2230_v62, %v2197_v51 }
0x13ea   :  { %v2233_v7 = vmul.f32 %v5891_v3, %v2160_v49  ;;  %v2235_v9 = vmul.f32 %v2231_v2, %v2199_v15 }
0x13eb   :  { %v2236_v10 = vmul.f32 %v2232_v4, %v2201_v18 }
0x13ec   :  { %v2237_v11 = vmul.f32 %v2233_v7, %v2203_v52 }
0x13ed   :  { %v2238_v12 = vpack.c.bf16 %v2236_v10, %v2234_v5 }
0x13ee   :  { %v2239_v13 = vpack.c.bf16 %v2237_v11, %v2235_v9 }
0x13f0   :  { %2368 = vmatprep.mubr.bf16.mxu0 %v2239_v13 }
0x13f1   :  { %2369 = vmatmul.mubr.bf16.vlgmr.msra.gmra.mrb[48].mxu0 %v2238_v12 }
0x13f2   :  { %5455 = vmatprep.mubr.msk.bf16.mxu0 %vm6029_vm1, %v6028_v8 }
0x14c4   :  { %v5163_v14 = vpop.f32.mrb[48].mxu0 }
0x14c5   :  { %v5164_v16 = vpop.f32.mrb[49].mxu0 }
0x14c6   :  { %v5165_v17 = vadd.f32 %v5164_v16, %v5163_v14  ;;  %v5166_v19 = vpop.f32.mrb[50].mxu0 }
0x14c7   :  { %v5167_v20 = vpop.f32.mrb[51].mxu0 }
0x14c8   :  { %v6596_v21 = vadd.f32 %v6498_v54, %v5165_v17  ;;  %v5168_v22 = vadd.f32 %v5167_v20, %v5166_v19  ;;  %v5720_v54 = vld [vmem:[%s7098_s1 + $0x20] sm:$0xff]  }
0x14c9   :  { %5428 = vmatpush3.bf16.msra.mxu1 %v5720_v54 }
0x14ca   :  { %v6599_v23 = vadd.f32 %v6501_v57, %v5168_v22  ;;  %v2435_v0 = vmul.f32 %v6596_v21, %v6596_v21  ;;  %v5721_v57 = vld [vmem:[%s7098_s1 + $0x28] sm:$0xff]   ;;  %5429 = vmatprep.subr.bf16.mxu1 %v6028_v8 }
0x14cc   :  { %v2437_v1 = vsel %vm96_vm0, %v2435_v0, 0.0  ;;  %v2436_v24 = vmul.f32 %v6599_v23, %v6599_v23 }
0x14cd   :  { %2438 = vadd.xlane.f32.xlu0 %v2437_v1  ;;  %5430 = vmatpush3.bf16.msra.mxu1 %v5721_v57 }
0x14ce   :  { %v2440_v25 = vsel %vm96_vm0, %v2436_v24, 0.0  ;;  %5435 = vmatprep.subr.bf16.mxu1 %v6028_v8 }
0x14d1   :  { %2441 = vadd.xlane.f32.xlu0 %v2440_v25 }
0x155a   :  { %v2439_v28 = vpop.xlane.xlu0 %2438 }
0x155b   :  { %v2443_v29 = vmul.f32 0.03125, %v2439_v28 }
0x155d   :  { %v2445_v30 = vadd.f32 1e-05, %v2443_v29 }
0x155e   :  { %v2442_v31 = vpop.xlane.xlu0 %2441 }
0x155f   :  { %5892 = vrsqrt.f32 %v2445_v30  ;;  %v2444_v32 = vmul.f32 0.03125, %v2442_v31 }
0x1561   :  { %v2446_v33 = vadd.f32 1e-05, %v2444_v32 }
0x1563   :  { %5894 = vrsqrt.f32 %v2446_v33 }
0x1569   :  { %v5893_v34 = vpop.eup %5892 }
0x156a   :  { %v2449_v35 = vmul.f32 %v5893_v34, %v6596_v21 }
0x156c   :  { %v2457_v38 = vmul.f32 %v4927_v36, %v2449_v35 }
0x156d   :  { %v5895_v6 = vpop.eup %5894 }
0x156e   :  { %v2450_v37 = vmul.f32 %v5895_v6, %v6599_v23 }
0x1570   :  { %v2458_v39 = vmul.f32 %v4927_v36, %v2450_v37 }
0x1572   :  { %v2459_v40 = vpack.c.bf16 %v2458_v39, %v2457_v38 }
0x1574   :  { %5432 = vmatmul.mubr.msk.bf16.vlgmr.msra.gmra.mrb[52].mxu1 %vm96_vm0, %v2459_v40 }
0x1575   :  { %5437 = vmatprep.mubr.msk.bf16.mxu1 %vm6029_vm1, %v6028_v8 }
0x1647   :  { %v2509_v41 = vpop.f32.mrb[52].mxu1 }
0x1648   :  { %v5433_v42 = vpop.f32.mrb[53].mxu1 }
0x1649   :  { %v2512_v45 = vpop.f32.mrb[54].mxu1 }
0x164a   :  { %v6623_v47 = vpack.c.bf16 %v2512_v45, %v2509_v41  ;;  %v5434_v49 = vpop.f32.mrb[55].mxu1 }
0x164c   :  { %2694 = vrot.lane.b32.xlu1 %v6623_v47, %s6032_s12  ;;  %2518 = vrot.lane.b32.xlu0 %v6623_v47, %s6031_s11 }
0x1650   :  { %2868 = vrot.lane.b32.xlu1 %v6623_v47, %s6034_s14  ;;  %2692 = vrot.lane.b32.xlu0 %v6623_v47, %s6030_s10 }
0x1654   :  { %2870 = vrot.lane.b32.xlu0 %v6623_v47, %s6033_s13 }
0x16be   :  { %v2695_v50 = vpop.permute.xlu1 %2694  ;;  %v2519_v51 = vpop.permute.xlu0 %2518 }
0x16bf   :  { %v2700_v15 = vsel %vm181_vm2, %v2695_v50, 0  ;;  %v2524_v18 = vsel %vm181_vm2, %v2519_v51, 0 }
0x16c0   :  { %5436 = vmatpush3.bf16.xpose.msra.mxu1 %v2524_v18  ;;  %5454 = vmatpush3.bf16.xpose.msra.mxu0 %v2700_v15 }
0x16c1   :  { %5471 = vmatprep.subr.bf16.mxu0 %v6028_v8  ;;  %5441 = vmatprep.subr.bf16.mxu1 %v6028_v8 }
0x16c2   :  { %v2693_v52 = vpop.permute.xlu0 %2692  ;;  %v2869_v56 = vpop.permute.xlu1 %2868 }
0x16c6   :  { %v2871_v53 = vpop.permute.xlu0 %2870 }
0x16c7   :  { %v2876_v55 = vsel %vm181_vm2, %v2871_v53, 0  ;;  %5438 = vmatmul.mubr.msk.bf16.vlgmr.msra.gmra.mrb[56].mxu1 %vm181_vm2, %v6623_v47  ;;  %5456 = vmatmul.mubr.msk.bf16.vlgmr.msra.gmra.mrb[52].mxu0 %vm181_vm2, %v2693_v52 }
0x16c8   :  { %5472 = vmatpush3.bf16.xpose.msra.mxu0 %v2876_v55  ;;  %5473 = vmatprep.mubr.msk.bf16.mxu0 %vm6029_vm1, %v6028_v8 }
0x16c9   :  { %5477 = vmatprep.subr.bf16.mxu0 %v6028_v8  ;;  %5443 = vmatprep.mubr.msk.bf16.mxu1 %vm6029_vm1, %v6028_v8 }
0x16cf   :  { %5474 = vmatmul.mubr.msk.bf16.vlgmr.msra.gmra.mrb[56].mxu0 %vm181_vm2, %v2869_v56 }
0x16d0   :  { %5479 = vmatprep.mubr.msk.bf16.mxu0 %vm6029_vm1, %v6028_v8 }
0x179a   :  { %v2560_v58 = vpop.f32.mrb[56].mxu1  ;;  %v2736_v59 = vpop.f32.mrb[52].mxu0 }
0x179b   :  { %v2567_v26 = vmul.f32 0.35355338, %v2560_v58  ;;  %v5439_v60 = vpop.f32.mrb[57].mxu1  ;;  %v5457_v61 = vpop.f32.mrb[53].mxu0  ;;  %v2743_v40 = vmul.f32 0.35355338, %v2736_v59 }
0x179c   :  { %v2563_v43 = vpop.f32.mrb[58].mxu1  ;;  %v2739_v46 = vpop.f32.mrb[54].mxu0 }
0x179d   :  { %v2568_v62 = vmul.f32 0.35355338, %v2563_v43  ;;  %v5440_v63 = vpop.f32.mrb[59].mxu1  ;;  %v5458_v2 = vpop.f32.mrb[55].mxu0  ;;  %v2569_v3 = vsel %vm6151_vm7, %v2567_v26, -1e+30 }
0x179e   :  { %v2571_v4 = vsel %vm233_vm8, %v2569_v3, -inf  ;;  %v2744_v41 = vmul.f32 0.35355338, %v2739_v46  ;;  %v2745_v42 = vsel %vm6151_vm7, %v2743_v40, -1e+30 }
0x179f   :  { %v2570_v5 = vsel %vm6155_vm9, %v2568_v62, -1e+30  ;;  %2572 = vmax.xlane.f32.xlu0 %v2571_v4  ;;  %v2747_v45 = vsel %vm233_vm8, %v2745_v42, -inf }
0x17a0   :  { %v2574_v7 = vsel %vm233_vm8, %v2570_v5, -inf  ;;  %v2746_v49 = vsel %vm6155_vm9, %v2744_v41, -1e+30 }
0x17a1   :  { %2575 = vmax.xlane.f32.xlu1 %v2574_v7  ;;  %v2750_v50 = vsel %vm233_vm8, %v2746_v49, -inf }
0x17a2   :  { %v2912_v9 = vpop.f32.mrb[56].mxu0 }
0x17a3   :  { %v2919_v10 = vmul.f32 0.35355338, %v2912_v9  ;;  %v5475_v11 = vpop.f32.mrb[57].mxu0 }
0x17a4   :  { %v2915_v12 = vpop.f32.mrb[58].mxu0 }
0x17a5   :  { %v2920_v13 = vmul.f32 0.35355338, %v2915_v12  ;;  %v5476_v14 = vpop.f32.mrb[59].mxu0  ;;  %v2921_v16 = vsel %vm6151_vm7, %v2919_v10, -1e+30 }
0x17a6   :  { %v2923_v17 = vsel %vm233_vm8, %v2921_v16, -inf }
0x17a7   :  { %2924 = vmax.xlane.f32.xlu0 %v2923_v17  ;;  %v2922_v19 = vsel %vm6155_vm9, %v2920_v13, -1e+30 }
0x17a8   :  { %v2926_v20 = vsel %vm233_vm8, %v2922_v19, -inf }
0x17ab   :  { %2927 = vmax.xlane.f32.xlu0 %v2926_v20 }
0x182c   :  { %v2573_v22 = vpop.xlane.xlu0 %2572 }
0x182d   :  { %v2577_v0 = vsub.f32 %v2569_v3, %v2573_v22 }
0x182e   :  { %v2576_v1 = vpop.xlane.xlu1 %2575 }
0x182f   :  { %v2578_v24 = vsub.f32 %v2570_v5, %v2576_v1  ;;  %v2579_v25 = vmul.f32 1.442695, %v2577_v0 }
0x1831   :  { %v2581_v54 = vmul.f32 1.442695, %v2578_v24  ;;  %5896 = vpow2.f32 %v2579_v25 }
0x1833   :  { %5898 = vpow2.f32 %v2581_v54 }
0x1834   :  { %v2925_v57 = vpop.xlane.xlu0 %2924 }
0x1835   :  { %v2929_v28 = vsub.f32 %v2921_v16, %v2925_v57 }
0x1837   :  { %v2931_v29 = vmul.f32 1.442695, %v2929_v28 }
0x1838   :  { %v2928_v30 = vpop.xlane.xlu0 %2927 }
0x1839   :  { %5900 = vpow2.f32 %v2931_v29  ;;  %v2930_v31 = vsub.f32 %v2922_v19, %v2928_v30  ;;  %v4881_v19 = vld [vmem:[%s7099_s2 + $0x40] sm:$0xff] }
0x183a   :  { %v2641_v20 = vpack.c.bf16 %v4881_v19, %v4881_v19 }
0x183b   :  { %v2933_v32 = vmul.f32 1.442695, %v2930_v31  ;;  %v5897_v33 = vpop.eup %5896 }
0x183c   :  { %v2583_v35 = vsel %vm233_vm8, %v5897_v33, 0.0  ;;  %v2647_v22 = vsel %vm309_vm10, %v2641_v20, 0 }
0x183d   :  { %v5899_v34 = vpop.eup %5898  ;;  %5902 = vpow2.f32 %v2933_v32  ;;  %2584 = vadd.xlane.f32.xlu1 %v2583_v35 }
0x183e   :  { %v2586_v6 = vsel %vm233_vm8, %v5899_v34, 0.0 }
0x183f   :  { %2587 = vadd.xlane.f32.xlu0 %v2586_v6 }
0x1843   :  { %v5901_v36 = vpop.eup %5900 }
0x1844   :  { %v2935_v37 = vsel %vm233_vm8, %v5901_v36, 0.0 }
0x1845   :  { %2936 = vadd.xlane.f32.xlu0 %v2935_v37 }
0x1847   :  { %v5903_v38 = vpop.eup %5902 }
0x1848   :  { %v2938_v39 = vsel %vm233_vm8, %v5903_v38, 0.0 }
0x1849   :  { %2939 = vadd.xlane.f32.xlu0 %v2938_v39 }
0x184e   :  { %2594 = vrot.lane.b32.xlu1 %v6623_v47, %s6035_s15 }
0x1852   :  { %3046 = vrot.lane.b32.xlu1 %v6623_v47, %s6036_s16 }
0x1856   :  { %3044 = vrot.lane.b32.xlu1 %v6623_v47, %s6037_s17 }
0x185f   :  { %2946 = vrot.lane.b32.xlu0 %v6623_v47, %s6038_s18 }
0x187a   :  { %2748 = vmax.xlane.f32.xlu1 %v2747_v45 }
0x187e   :  { %2751 = vmax.xlane.f32.xlu0 %v2750_v50 }
0x18ca   :  { %v2585_v51 = vpop.xlane.xlu1 %2584 }
0x18cb   :  { %5904 = vrcp.f32 %v2585_v51 }
0x18cc   :  { %v2588_v15 = vpop.xlane.xlu0 %2587 }
0x18cd   :  { %5906 = vrcp.f32 %v2588_v15 }
0x18ce   :  { %v2595_v18 = vpop.permute.xlu1 %2594 }
0x18cf   :  { %5442 = vmatpush3.bf16.msra.mxu1 %v2595_v18 }
0x18d0   :  { %5447 = vmatprep.subr.bf16.mxu1 %v6028_v8 }
0x18d2   :  { %v2937_v52 = vpop.xlane.xlu0 %2936  ;;  %v3047_v63 = vpop.permute.xlu1 %3046 }
0x18d3   :  { %5908 = vrcp.f32 %v2937_v52  ;;  %v3052_v3 = vsel %vm181_vm2, %v3047_v63, 0  ;;  %v4882_v52 = vld [vmem:[%s7099_s2 + $0x48] sm:$0xff] }
0x18d5   :  { %v5905_v53 = vpop.eup %5904 }
0x18d6   :  { %v2940_v55 = vpop.xlane.xlu0 %2939  ;;  %v2591_v58 = vmul.f32 %v5905_v53, %v5897_v33  ;;  %v3045_v4 = vpop.permute.xlu1 %3044  ;;  %v2817_v53 = vpack.c.bf16 %v4882_v52, %v4882_v52 }
0x18d7   :  { %v5907_v56 = vpop.eup %5906  ;;  %5910 = vrcp.f32 %v2940_v55 }
0x18d8   :  { %v2592_v59 = vmul.f32 %v5907_v56, %v5899_v34  ;;  %v2823_v55 = vsel %vm309_vm10, %v2817_v53, 0  ;;  %v4943_v53 = vld [vmem:[%s7103_s6 + $0x2] ss:$0 sm:$0xff] }
0x18da   :  { %v2947_v26 = vpop.permute.xlu0 %2946  ;;  %v2593_v60 = vpack.c.bf16 %v2592_v59, %v2591_v58 }
0x18db   :  { %5478 = vmatpush3.bf16.msra.mxu0 %v2947_v26 }
0x18dc   :  { %5444 = vmatmul.mubr.msk.bf16.vlgmr.msra.gmra.mrb[60].mxu1 %vm233_vm8, %v2593_v60  ;;  %5489 = vmatprep.subr.bf16.mxu0 %v6028_v8 }
0x18dd   :  { %5449 = vmatprep.mubr.msk.bf16.mxu1 %vm6029_vm1, %v6028_v8  ;;  %v5909_v61 = vpop.eup %5908  ;;  %5448 = vmatpush3.bf16.msra.mxu1 %v2647_v22 }
0x18de   :  { %v2943_v46 = vmul.f32 %v5909_v61, %v5901_v36  ;;  %5459 = vmatprep.subr.bf16.mxu1 %v6028_v8 }
0x18e1   :  { %v5911_v43 = vpop.eup %5910 }
0x18e2   :  { %v2944_v62 = vmul.f32 %v5911_v43, %v5903_v38 }
0x18e4   :  { %v2945_v2 = vpack.c.bf16 %v2944_v62, %v2943_v46 }
0x18e6   :  { %5480 = vmatmul.mubr.msk.bf16.vlgmr.msra.gmra.mrb[60].mxu0 %vm233_vm8, %v2945_v2  ;;  %v4883_v2 = vld [vmem:[%s7099_s2 + $0x50] sm:$0xff] }
0x18e7   :  { %5490 = vmatpush3.bf16.xpose.msra.mxu0 %v3052_v3  ;;  %5491 = vmatprep.mubr.msk.bf16.mxu0 %vm6029_vm1, %v6028_v8  ;;  %v2993_v3 = vpack.c.bf16 %v4883_v2, %v4883_v2  ;;  %v5738_v2 = vld [vmem:[%s7101_s4 + $0x150] sm:$0xff]  }
0x18ee   :  { %5492 = vmatmul.mubr.msk.bf16.vlgmr.msra.gmra.mrb[64].mxu0 %vm181_vm2, %v3045_v4 }
0x18ef   :  { %3320 = vmatprep.mubr.bf16.mxu0 %v6041_v27 }
0x1907   :  { %v2749_v5 = vpop.xlane.xlu1 %2748 }
0x1908   :  { %v2753_v7 = vsub.f32 %v2745_v42, %v2749_v5 }
0x190a   :  { %v2755_v9 = vmul.f32 1.442695, %v2753_v7 }
0x190b   :  { %v2752_v10 = vpop.xlane.xlu0 %2751 }
0x190c   :  { %v2754_v11 = vsub.f32 %v2746_v49, %v2752_v10  ;;  %5912 = vpow2.f32 %v2755_v9 }
0x190e   :  { %v2757_v12 = vmul.f32 1.442695, %v2754_v11  ;;  %v2999_v11 = vsel %vm309_vm10, %v2993_v3, 0  ;;  %v5739_v3 = vld [vmem:[%s7101_s4 + $0x110] sm:$0xff]  }
0x1910   :  { %5914 = vpow2.f32 %v2757_v12 }
0x1916   :  { %v5913_v13 = vpop.eup %5912 }
0x1917   :  { %v2759_v14 = vsel %vm233_vm8, %v5913_v13, 0.0 }
0x1918   :  { %2760 = vadd.xlane.f32.xlu1 %v2759_v14  ;;  %v4884_v14 = vld [vmem:[%s7099_s2 + $0x58] sm:$0xff] }
0x191a   :  { %v5915_v16 = vpop.eup %5914 }
0x191b   :  { %v2762_v17 = vsel %vm233_vm8, %v5915_v16, 0.0 }
0x191c   :  { %2763 = vadd.xlane.f32.xlu0 %v2762_v17  ;;  %v3169_v17 = vpack.c.bf16 %v4884_v14, %v4884_v14  ;;  %v5749_v14 = vld [vmem:[%s7101_s4 + $0x138] sm:$0xff]  }
0x1929   :  { %2770 = vrot.lane.b32.xlu1 %v6623_v47, %s6039_s19 }
0x19a5   :  { %v2761_v0 = vpop.xlane.xlu1 %2760 }
0x19a9   :  { %v2764_v1 = vpop.xlane.xlu0 %2763  ;;  %v2771_v30 = vpop.permute.xlu1 %2770 }
0x19aa   :  { %5916 = vrcp.f32 %v2764_v1  ;;  %v3175_v1 = vsel %vm309_vm10, %v3169_v17, 0 }
0x19ab   :  { %5918 = vrcp.f32 %v2761_v0 }
0x19af   :  { %v2634_v24 = vpop.f32.mrb[60].mxu1 }
0x19b0   :  { %v5445_v25 = vpop.f32.mrb[61].mxu1 }
0x19b1   :  { %v2637_v54 = vpop.f32.mrb[62].mxu1 }
0x19b2   :  { %v2642_v57 = vpack.c.bf16 %v2637_v54, %v2634_v24  ;;  %v5446_v28 = vpop.f32.mrb[63].mxu1 }
0x19b4   :  { %v5917_v29 = vpop.eup %5916  ;;  %5450 = vmatmul.mubr.msk.bf16.vlgmr.msra.gmra.mrb[64].mxu1 %vm181_vm2, %v2642_v57 }
0x19b5   :  { %v5919_v31 = vpop.eup %5918  ;;  %5460 = vmatpush3.bf16.msra.mxu1 %v2771_v30  ;;  %5461 = vmatprep.mubr.msk.bf16.mxu1 %vm6029_vm1, %v6028_v8  ;;  %v2768_v32 = vmul.f32 %v5917_v29, %v5915_v16 }
0x19b6   :  { %5465 = vmatprep.subr.bf16.mxu1 %v6028_v8  ;;  %v2767_v33 = vmul.f32 %v5919_v31, %v5913_v13 }
0x19b8   :  { %v2769_v6 = vpack.c.bf16 %v2768_v32, %v2767_v33 }
0x19b9   :  { %v2986_v34 = vpop.f32.mrb[60].mxu0 }
0x19ba   :  { %v5481_v35 = vpop.f32.mrb[61].mxu0 }
0x19bb   :  { %v2989_v36 = vpop.f32.mrb[62].mxu0 }
0x19bc   :  { %v2994_v37 = vpack.c.bf16 %v2989_v36, %v2986_v34  ;;  %5462 = vmatmul.mubr.msk.bf16.vlgmr.msra.gmra.mrb[68].mxu1 %vm233_vm8, %v2769_v6  ;;  %v5482_v38 = vpop.f32.mrb[63].mxu0 }
0x19bd   :  { %5467 = vmatprep.mubr.msk.bf16.mxu1 %vm6029_vm1, %v6028_v8  ;;  %5466 = vmatpush3.bf16.msra.mxu1 %v2823_v55  ;;  %v5725_v38 = vld [vmem:[%s7100_s3 + $0xa0] ss:$16 sps:$4 sm:$0xff]  }
0x19be   :  { %5483 = vmatprep.subr.bf16.mxu1 %v6028_v8 }
0x19c1   :  { %v3088_v39 = vpop.f32.mrb[64].mxu0 }
0x19c2   :  { %v3095_v40 = vmul.f32 0.35355338, %v3088_v39  ;;  %v5493_v41 = vpop.f32.mrb[65].mxu0  ;;  %v5727_v39 = vld [vmem:[%s7100_s3 + $0xa4] ss:$16 sps:$4 sm:$0xff]  }
0x19c3   :  { %v3091_v42 = vpop.f32.mrb[66].mxu0 }
0x19c4   :  { %v3096_v45 = vmul.f32 0.35355338, %v3091_v42  ;;  %v5494_v49 = vpop.f32.mrb[67].mxu0  ;;  %v3097_v50 = vsel %vm6151_vm7, %v3095_v40, -1e+30 }
0x19c5   :  { %v3099_v51 = vsel %vm233_vm8, %v3097_v50, -inf  ;;  %v5730_v40 = vld [vmem:[%s7100_s3 + $0x8c] ss:$16 sps:$4 sm:$0xff]  }
0x19c6   :  { %3100 = vmax.xlane.f32.xlu0 %v3099_v51  ;;  %v3098_v15 = vsel %vm6155_vm9, %v3096_v45, -1e+30 }
0x19c7   :  { %v3102_v18 = vsel %vm233_vm8, %v3098_v15, -inf }
0x19ca   :  { %3103 = vmax.xlane.f32.xlu0 %v3102_v18 }
0x1a53   :  { %v3101_v56 = vpop.xlane.xlu0 %3100 }
0x1a54   :  { %v3105_v58 = vsub.f32 %v3097_v50, %v3101_v56 }
0x1a56   :  { %v3107_v59 = vmul.f32 1.442695, %v3105_v58 }
0x1a57   :  { %v3104_v26 = vpop.xlane.xlu0 %3103 }
0x1a58   :  { %5920 = vpow2.f32 %v3107_v59  ;;  %v3106_v60 = vsub.f32 %v3098_v15, %v3104_v26  ;;  %v5728_v59 = vld [vmem:[%s7100_s3 + $0x88] ss:$16 sps:$4 sm:$0xff]  }
0x1a5a   :  { %v3109_v61 = vmul.f32 1.442695, %v3106_v60  ;;  %v5733_v60 = vld [vmem:[%s7100_s3 + $0xac] ss:$16 sps:$4 sm:$0xff]  }
0x1a5c   :  { %5922 = vpow2.f32 %v3109_v61  ;;  %v5731_v61 = vld [vmem:[%s7100_s3 + $0xa8] ss:$16 sps:$4 sm:$0xff]  }
0x1a62   :  { %v5921_v43 = vpop.eup %5920 }
0x1a63   :  { %v3111_v46 = vsel %vm233_vm8, %v5921_v43, 0.0 }
0x1a64   :  { %3112 = vadd.xlane.f32.xlu0 %v3111_v46  ;;  %v5735_v46 = vld [vmem:[%s7101_s4 + $0x100] sm:$0xff]  }
0x1a66   :  { %v5923_v62 = vpop.eup %5922 }
0x1a67   :  { %v3114_v63 = vsel %vm233_vm8, %v5923_v62, 0.0 }
0x1a68   :  { %3115 = vadd.xlane.f32.xlu0 %v3114_v63  ;;  %v5737_v63 = vld [vmem:[%s7101_s4 + $0x108] sm:$0xff]  }
0x1a7e   :  { %3122 = vrot.lane.b32.xlu0 %v6623_v47, %s6040_s24 }
0x1a8f   :  { %v2810_v4 = vpop.f32.mrb[68].mxu1 }
0x1a90   :  { %v5463_v5 = vpop.f32.mrb[69].mxu1 }
0x1a91   :  { %v2813_v7 = vpop.f32.mrb[70].mxu1  ;;  %v5741_v5 = vld [vmem:[%s7101_s4 + $0x118] sm:$0xff]  }
0x1a92   :  { %v2818_v9 = vpack.c.bf16 %v2813_v7, %v2810_v4  ;;  %v5464_v10 = vpop.f32.mrb[71].mxu1  ;;  %v5740_v4 = vld [vmem:[%s7101_s4 + $0x158] sm:$0xff]   ;;  %v5742_v7 = vld [vmem:[%s7101_s4 + $0x160] sm:$0xff]  }
0x1a93   :  { %v5744_v10 = vld [vmem:[%s7101_s4 + $0x168] sm:$0xff]  }
0x1a94   :  { %5468 = vmatmul.mubr.msk.bf16.vlgmr.msra.gmra.mrb[64].mxu1 %vm181_vm2, %v2818_v9  ;;  %v5743_v9 = vld [vmem:[%s7101_s4 + $0x120] sm:$0xff]  }
0x1a95   :  { %5484 = vmatpush3.bf16.msra.mxu1 %v2999_v11  ;;  %5485 = vmatprep.mubr.msk.bf16.mxu1 %vm6029_vm1, %v6028_v8  ;;  %v5745_v11 = vld [vmem:[%s7101_s4 + $0x128] sm:$0xff]  }
0x1a96   :  { %5495 = vmatprep.subr.bf16.mxu1 %v6028_v8 }
0x1aa0   :  { %5486 = vmatmul.mubr.msk.bf16.vlgmr.msra.gmra.mrb[64].mxu1 %vm181_vm2, %v2994_v37 }
0x1aa1   :  { %5497 = vmatprep.mubr.msk.bf16.mxu1 %vm6029_vm1, %v6028_v8 }
0x1af1   :  { %v3113_v47 = vpop.xlane.xlu0 %3112 }
0x1af2   :  { %5924 = vrcp.f32 %v3113_v47  ;;  %v5746_v47 = vld [vmem:[%s7101_s4 + $0x170] sm:$0xff]  }
0x1af5   :  { %v3116_v12 = vpop.xlane.xlu0 %3115 }
0x1af6   :  { %5926 = vrcp.f32 %v3116_v12  ;;  %v5747_v12 = vld [vmem:[%s7101_s4 + $0x130] sm:$0xff]  }
0x1af9   :  { %v3123_v13 = vpop.permute.xlu0 %3122 }
0x1afa   :  { %5496 = vmatpush3.bf16.msra.mxu1 %v3123_v13  ;;  %v5748_v13 = vld [vmem:[%s7101_s4 + $0x178] sm:$0xff]  }
0x1afb   :  { %5501 = vmatprep.subr.bf16.mxu1 %v6028_v8 }
0x1afc   :  { %v5925_v16 = vpop.eup %5924 }
0x1afd   :  { %v3119_v20 = vmul.f32 %v5925_v16, %v5921_v43  ;;  %v5734_v43 = vld [vmem:[%s7101_s4 + $0x140] sm:$0xff]  }
0x1b00   :  { %v5927_v19 = vpop.eup %5926 }
0x1b01   :  { %v3120_v22 = vmul.f32 %v5927_v19, %v5923_v62  ;;  %v5736_v62 = vld [vmem:[%s7101_s4 + $0x148] sm:$0xff]  }
0x1b03   :  { %v3121_v0 = vpack.c.bf16 %v3120_v22, %v3119_v20 }
0x1b05   :  { %5498 = vmatmul.mubr.msk.bf16.vlgmr.msra.gmra.mrb[72].mxu1 %vm233_vm8, %v3121_v0 }
0x1b06   :  { %5502 = vmatpush3.bf16.msra.mxu1 %v3175_v1  ;;  %5503 = vmatprep.mubr.msk.bf16.mxu1 %vm6029_vm1, %v6028_v8 }
0x1b07   :  { %5196 = vmatprep.subr.bf16.mxu1 %v5734_v43 }
0x1bd8   :  { %v3162_v24 = vpop.f32.mrb[72].mxu1 }
0x1bd9   :  { %v5499_v25 = vpop.f32.mrb[73].mxu1 }
0x1bda   :  { %v3165_v54 = vpop.f32.mrb[74].mxu1 }
0x1bdb   :  { %v3170_v57 = vpack.c.bf16 %v3165_v54, %v3162_v24  ;;  %v5500_v28 = vpop.f32.mrb[75].mxu1 }
0x1bdd   :  { %5504 = vmatmul.mubr.msk.bf16.vlgmr.msra.gmra.mrb[64].mxu1 %vm181_vm2, %v3170_v57 }
0x1bde   :  { %5197 = vmatpush3.bf16.msra.mxu1 %v5735_v46 }
0x1bdf   :  { %5198 = vmatprep.subr.bf16.mxu1 %v5736_v62 }
0x1be2   :  { %5199 = vmatpush3.bf16.msra.mxu1 %v5737_v63 }
0x1be3   :  { %5200 = vmatprep.subr.bf16.mxu1 %v5738_v2 }
0x1be6   :  { %5201 = vmatpush3.bf16.msra.mxu1 %v5739_v3 }
0x1be7   :  { %5202 = vmatprep.subr.bf16.mxu1 %v5740_v4 }
0x1bea   :  { %5203 = vmatpush3.bf16.msra.mxu1 %v5741_v5 }
0x1beb   :  { %5204 = vmatprep.subr.bf16.mxu1 %v5742_v7 }
0x1bee   :  { %5205 = vmatpush3.bf16.msra.mxu1 %v5743_v9 }
0x1bef   :  { %5206 = vmatprep.subr.bf16.mxu1 %v5744_v10 }
0x1bf2   :  { %5207 = vmatpush3.bf16.msra.mxu1 %v5745_v11 }
0x1bf3   :  { %5208 = vmatprep.subr.bf16.mxu1 %v5746_v47 }
0x1bf6   :  { %5209 = vmatpush3.bf16.msra.mxu1 %v5747_v12  ;;  %v5024_v12 = vld [vmem:[%s7102_s5 + $0x3] ss:$0 sm:$0xff] }
0x1bf7   :  { %5210 = vmatprep.subr.bf16.mxu1 %v5748_v13 }
0x1bfa   :  { %5211 = vmatpush3.bf16.msra.mxu1 %v5749_v14 }
0x1bfb   :  { %5533 = vmatprep.subr.bf16.mxu1 %v6028_v8 }
0x1cb0   :  { %v3211_v29 = vpop.f32.mrb[64].mxu1 }
0x1cb1   :  { %v6744_v30 = vadd.f32 %v3211_v29, %v6596_v21  ;;  %v5505_v31 = vpop.f32.mrb[65].mxu1  ;;  %v5724_v21 = vld [vmem:[%s7100_s3 + $0x84] ss:$16 sps:$4 sm:$0xff]  }
0x1cb2   :  { %v3214_v32 = vpop.f32.mrb[66].mxu1  ;;  %3288 = vmatprep.subr.bf16.mxu0 %v5724_v21 }
0x1cb3   :  { %v6747_v33 = vadd.f32 %v3214_v32, %v6599_v23  ;;  %v5506_v34 = vpop.f32.mrb[67].mxu1  ;;  %v3220_v35 = vmul.f32 %v6744_v30, %v6744_v30  ;;  %v5722_v23 = vld [vmem:[%s7100_s3 + $0x80] ss:$16 sps:$4 sm:$0xff]  }
0x1cb4   :  { %3289 = vmatpush1.bf16.msra.mxu0 %v5722_v23 }
0x1cb5   :  { %v3222_v6 = vsel %vm96_vm0, %v3220_v35, 0.0  ;;  %v3221_v36 = vmul.f32 %v6747_v33, %v6747_v33  ;;  %3290 = vmatprep.subr.bf16.mxu0 %v5727_v39 }
0x1cb6   :  { %3223 = vadd.xlane.f32.xlu1 %v3222_v6 }
0x1cb7   :  { %v3225_v37 = vsel %vm96_vm0, %v3221_v36, 0.0 }
0x1cb8   :  { %3226 = vadd.xlane.f32.xlu0 %v3225_v37  ;;  %3291 = vmatpush1.bf16.msra.mxu0 %v5725_v38 }
0x1cb9   :  { %3331 = vmatprep.subr.bf16.mxu0 %v5730_v40 }
0x1d43   :  { %v3224_v41 = vpop.xlane.xlu1 %3223 }
0x1d44   :  { %v3228_v42 = vmul.f32 0.03125, %v3224_v41 }
0x1d45   :  { %v3227_v45 = vpop.xlane.xlu0 %3226 }
0x1d46   :  { %v3230_v49 = vadd.f32 1e-05, %v3228_v42  ;;  %v3229_v50 = vmul.f32 0.03125, %v3227_v45 }
0x1d48   :  { %5928 = vrsqrt.f32 %v3230_v49  ;;  %v3231_v51 = vadd.f32 1e-05, %v3229_v50 }
0x1d4a   :  { %5930 = vrsqrt.f32 %v3231_v51 }
0x1d52   :  { %v5929_v15 = vpop.eup %5928 }
0x1d53   :  { %v3234_v18 = vmul.f32 %v5929_v15, %v6744_v30 }
0x1d54   :  { %v5931_v52 = vpop.eup %5930 }
0x1d55   :  { %v3235_v55 = vmul.f32 %v5931_v52, %v6747_v33  ;;  %v3242_v56 = vmul.f32 %v4943_v53, %v3234_v18 }
0x1d57   :  { %v3243_v58 = vmul.f32 %v4943_v53, %v3235_v55 }
0x1d59   :  { %v3244_v26 = vpack.c.bf16 %v3243_v58, %v3242_v56 }
0x1d5b   :  { %4952 = vmatmul.mubr.msk.bf16.vlgmr.msra.gmra.mrb[68].mxu0 %vm96_vm0, %v3244_v26 }
0x1d5c   :  { %3332 = vmatpush1.bf16.msra.mxu0 %v5728_v59  ;;  %3363 = vmatprep.mubr.bf16.mxu0 %v6041_v27 }
0x1d5d   :  { %3333 = vmatprep.subr.bf16.mxu0 %v5733_v60 }
0x1d60   :  { %3334 = vmatpush1.bf16.msra.mxu0 %v5731_v61 }
0x1d61   :  { %5507 = vmatprep.subr.bf16.mxu0 %v6028_v8 }
0x1d63   :  { %4953 = vmatmul.mubr.msk.bf16.vlgmr.msra.gmra.mrb[72].mxu0 %vm96_vm0, %v3244_v26 }
0x1d64   :  { %5511 = vmatprep.mubr.msk.bf16.mxu0 %vm6029_vm1, %v6028_v8 }
0x1e2e   :  { %v3322_v16 = vpop.f32.mrb[68].mxu0 }
0x1e2f   :  { %v4954_v17 = vmul.f32 -1.442695, %v3322_v16  ;;  %v3324_v19 = vpop.f32.mrb[69].mxu0 }
0x1e30   :  { %v4955_v20 = vmul.f32 -1.442695, %v3324_v19  ;;  %v3326_v22 = vpop.f32.mrb[70].mxu0 }
0x1e31   :  { %5932 = vpow2.f32 %v4954_v17  ;;  %v4956_v0 = vmul.f32 -1.442695, %v3326_v22  ;;  %v3328_v1 = vpop.f32.mrb[71].mxu0 }
0x1e32   :  { %5934 = vpow2.f32 %v4955_v20  ;;  %v4957_v24 = vmul.f32 -1.442695, %v3328_v1 }
0x1e33   :  { %5936 = vpow2.f32 %v4956_v0 }
0x1e34   :  { %5938 = vpow2.f32 %v4957_v24 }
0x1e36   :  { %v3365_v25 = vpop.f32.mrb[72].mxu0 }
0x1e37   :  { %v3367_v54 = vpop.f32.mrb[73].mxu0 }
0x1e38   :  { %v3369_v57 = vpop.f32.mrb[74].mxu0 }
0x1e39   :  { %v3371_v28 = vpop.f32.mrb[75].mxu0 }
0x1e3b   :  { %v5933_v29 = vpop.eup %5932 }
0x1e3c   :  { %v5935_v31 = vpop.eup %5934  ;;  %v3386_v32 = vadd.f32 1.0, %v5933_v29 }
0x1e3d   :  { %v5937_v34 = vpop.eup %5936  ;;  %v3387_v35 = vadd.f32 1.0, %v5935_v31 }
0x1e3e   :  { %v5939_v6 = vpop.eup %5938  ;;  %5940 = vrcp.f32 %v3386_v32  ;;  %v3388_v36 = vadd.f32 1.0, %v5937_v34 }
0x1e3f   :  { %5942 = vrcp.f32 %v3387_v35  ;;  %v3389_v37 = vadd.f32 1.0, %v5939_v6 }
0x1e40   :  { %5944 = vrcp.f32 %v3388_v36 }
0x1e41   :  { %5946 = vrcp.f32 %v3389_v37 }
0x1e48   :  { %v5941_v21 = vpop.eup %5940 }
0x1e49   :  { %v5943_v23 = vpop.eup %5942  ;;  %v3398_v38 = vmul.f32 %v5941_v21, %v3322_v16 }
0x1e4a   :  { %v5945_v39 = vpop.eup %5944  ;;  %v3399_v40 = vmul.f32 %v5943_v23, %v3324_v19 }
0x1e4b   :  { %v5947_v41 = vpop.eup %5946  ;;  %v3400_v42 = vmul.f32 %v5945_v39, %v3326_v22  ;;  %v3402_v45 = vmul.f32 %v3398_v38, %v3365_v25 }
0x1e4c   :  { %v3401_v49 = vmul.f32 %v5947_v41, %v3328_v1  ;;  %v3403_v50 = vmul.f32 %v3399_v40, %v3367_v54 }
0x1e4d   :  { %v3404_v51 = vmul.f32 %v3400_v42, %v3369_v57 }
0x1e4e   :  { %v3405_v15 = vmul.f32 %v3401_v49, %v3371_v28 }
0x1e4f   :  { %v3406_v18 = vpack.c.bf16 %v3404_v51, %v3402_v45 }
0x1e50   :  { %v3407_v52 = vpack.c.bf16 %v3405_v15, %v3403_v50 }
0x1e52   :  { %3536 = vmatprep.mubr.bf16.mxu1 %v3407_v52 }
0x1e53   :  { %3537 = vmatmul.mubr.bf16.vlgmr.msra.gmra.mrb[76].mxu1 %v3406_v18 }
0x1e54   :  { %5535 = vmatprep.mubr.msk.bf16.mxu1 %vm6029_vm1, %v6028_v8 }
0x1f26   :  { %v5212_v53 = vpop.f32.mrb[76].mxu1 }
0x1f27   :  { %v5213_v55 = vpop.f32.mrb[77].mxu1 }
0x1f28   :  { %v5214_v56 = vadd.f32 %v5213_v55, %v5212_v53  ;;  %v5215_v58 = vpop.f32.mrb[78].mxu1 }
0x1f29   :  { %v5216_v59 = vpop.f32.mrb[79].mxu1 }
0x1f2a   :  { %v6842_v26 = vadd.f32 %v6744_v30, %v5214_v56  ;;  %v5217_v60 = vadd.f32 %v5216_v59, %v5215_v58  ;;  %v5750_v30 = vld [vmem:[%s7098_s1 + $0x30] sm:$0xff]  }
0x1f2b   :  { %5508 = vmatpush3.bf16.msra.mxu0 %v5750_v30 }
0x1f2c   :  { %v6845_v61 = vadd.f32 %v6747_v33, %v5217_v60  ;;  %v3603_v43 = vmul.f32 %v6842_v26, %v6842_v26  ;;  %v5751_v33 = vld [vmem:[%s7098_s1 + $0x38] sm:$0xff]   ;;  %5509 = vmatprep.subr.bf16.mxu0 %v6028_v8 }
0x1f2e   :  { %v3605_v46 = vsel %vm96_vm0, %v3603_v43, 0.0  ;;  %v3604_v62 = vmul.f32 %v6845_v61, %v6845_v61 }
0x1f2f   :  { %3606 = vadd.xlane.f32.xlu1 %v3605_v46  ;;  %5510 = vmatpush3.bf16.msra.mxu0 %v5751_v33 }
0x1f30   :  { %v3608_v63 = vsel %vm96_vm0, %v3604_v62, 0.0  ;;  %5515 = vmatprep.subr.bf16.mxu0 %v6028_v8 }
0x1f33   :  { %3609 = vadd.xlane.f32.xlu1 %v3608_v63 }
0x1fbc   :  { %v3607_v2 = vpop.xlane.xlu1 %3606 }
0x1fbd   :  { %v3611_v3 = vmul.f32 0.03125, %v3607_v2 }
0x1fbf   :  { %v3613_v4 = vadd.f32 1e-05, %v3611_v3 }
0x1fc0   :  { %v3610_v5 = vpop.xlane.xlu1 %3609 }
0x1fc1   :  { %5948 = vrsqrt.f32 %v3613_v4  ;;  %v3612_v7 = vmul.f32 0.03125, %v3610_v5 }
0x1fc3   :  { %v3614_v9 = vadd.f32 1e-05, %v3612_v7 }
0x1fc5   :  { %5950 = vrsqrt.f32 %v3614_v9 }
0x1fcb   :  { %v5949_v10 = vpop.eup %5948 }
0x1fcc   :  { %v3617_v11 = vmul.f32 %v5949_v10, %v6842_v26 }
0x1fce   :  { %v3625_v14 = vmul.f32 %v5024_v12, %v3617_v11 }
0x1fcf   :  { %v5951_v47 = vpop.eup %5950 }
0x1fd0   :  { %v3618_v13 = vmul.f32 %v5951_v47, %v6845_v61 }
0x1fd2   :  { %v3626_v16 = vmul.f32 %v5024_v12, %v3618_v13 }
0x1fd4   :  { %v3627_v17 = vpack.c.bf16 %v3626_v16, %v3625_v14 }
0x1fd6   :  { %5512 = vmatmul.mubr.msk.bf16.vlgmr.msra.gmra.mrb[76].mxu0 %vm96_vm0, %v3627_v17 }
0x1fd7   :  { %5517 = vmatprep.mubr.msk.bf16.mxu0 %vm6029_vm1, %v6028_v8 }
0x20a9   :  { %v3677_v19 = vpop.f32.mrb[76].mxu0 }
0x20aa   :  { %v5513_v20 = vpop.f32.mrb[77].mxu0 }
0x20ab   :  { %v3680_v22 = vpop.f32.mrb[78].mxu0 }
0x20ac   :  { %v6869_v0 = vpack.c.bf16 %v3680_v22, %v3677_v19  ;;  %v5514_v1 = vpop.f32.mrb[79].mxu0 }
0x20ae   :  { %3862 = vrot.lane.b32.xlu0 %v6869_v0, %s6032_s12  ;;  %3686 = vrot.lane.b32.xlu1 %v6869_v0, %s6031_s11 }
0x20b2   :  { %3860 = vrot.lane.b32.xlu1 %v6869_v0, %s6030_s10 }
0x20b6   :  { %4038 = vrot.lane.b32.xlu1 %v6869_v0, %s6033_s13 }
0x20ba   :  { %4036 = vrot.lane.b32.xlu1 %v6869_v0, %s6034_s14 }
0x2120   :  { %v3863_v24 = vpop.permute.xlu0 %3862  ;;  %v3687_v25 = vpop.permute.xlu1 %3686 }
0x2121   :  { %v3868_v54 = vsel %vm181_vm2, %v3863_v24, 0  ;;  %v3692_v57 = vsel %vm181_vm2, %v3687_v25, 0 }
0x2122   :  { %5516 = vmatpush3.bf16.xpose.msra.mxu0 %v3692_v57  ;;  %5534 = vmatpush3.bf16.xpose.msra.mxu1 %v3868_v54 }
0x2123   :  { %5551 = vmatprep.subr.bf16.mxu1 %v6028_v8  ;;  %5521 = vmatprep.subr.bf16.mxu0 %v6028_v8 }
0x2124   :  { %v3861_v28 = vpop.permute.xlu1 %3860 }
0x2128   :  { %v4039_v29 = vpop.permute.xlu1 %4038 }
0x2129   :  { %v4044_v31 = vsel %vm181_vm2, %v4039_v29, 0  ;;  %5518 = vmatmul.mubr.msk.bf16.vlgmr.msra.gmra.mrb[80].mxu0 %vm181_vm2, %v6869_v0  ;;  %5536 = vmatmul.mubr.msk.bf16.vlgmr.msra.gmra.mrb[80].mxu1 %vm181_vm2, %v3861_v28 }
0x212a   :  { %5552 = vmatpush3.bf16.xpose.msra.mxu1 %v4044_v31  ;;  %5553 = vmatprep.mubr.msk.bf16.mxu1 %vm6029_vm1, %v6028_v8 }
0x212b   :  { %5557 = vmatprep.subr.bf16.mxu1 %v6028_v8  ;;  %5523 = vmatprep.mubr.msk.bf16.mxu0 %vm6029_vm1, %v6028_v8 }
0x212c   :  { %v4037_v32 = vpop.permute.xlu1 %4036 }
0x2131   :  { %5554 = vmatmul.mubr.msk.bf16.vlgmr.msra.gmra.mrb[84].mxu1 %vm181_vm2, %v4037_v32 }
0x2132   :  { %5559 = vmatprep.mubr.msk.bf16.mxu1 %vm6029_vm1, %v6028_v8 }
0x21fc   :  { %v3728_v34 = vpop.f32.mrb[80].mxu0  ;;  %v3904_v35 = vpop.f32.mrb[80].mxu1 }
0x21fd   :  { %v3735_v6 = vmul.f32 0.35355338, %v3728_v34  ;;  %v5519_v36 = vpop.f32.mrb[81].mxu0  ;;  %v5537_v37 = vpop.f32.mrb[81].mxu1  ;;  %v3911_v19 = vmul.f32 0.35355338, %v3904_v35 }
0x21fe   :  { %v3731_v21 = vpop.f32.mrb[82].mxu0  ;;  %v3907_v23 = vpop.f32.mrb[82].mxu1 }
0x21ff   :  { %v3737_v38 = vsel %vm6151_vm7, %v3735_v6, -1e+30  ;;  %v3736_v39 = vmul.f32 0.35355338, %v3731_v21  ;;  %v5520_v40 = vpop.f32.mrb[83].mxu0  ;;  %v5538_v41 = vpop.f32.mrb[83].mxu1 }
0x2200   :  { %v3739_v42 = vsel %vm233_vm8, %v3737_v38, -inf  ;;  %v3912_v17 = vmul.f32 0.35355338, %v3907_v23  ;;  %v3913_v1 = vsel %vm6151_vm7, %v3911_v19, -1e+30 }
0x2201   :  { %3740 = vmax.xlane.f32.xlu1 %v3739_v42  ;;  %v3738_v45 = vsel %vm6155_vm9, %v3736_v39, -1e+30  ;;  %v3915_v24 = vsel %vm233_vm8, %v3913_v1, -inf }
0x2202   :  { %v3742_v49 = vsel %vm233_vm8, %v3738_v45, -inf  ;;  %v3914_v20 = vsel %vm6155_vm9, %v3912_v17, -1e+30 }
0x2203   :  { %3743 = vmax.xlane.f32.xlu0 %v3742_v49  ;;  %v3918_v22 = vsel %vm233_vm8, %v3914_v20, -inf }
0x2204   :  { %v4080_v50 = vpop.f32.mrb[84].mxu1 }
0x2205   :  { %v4087_v51 = vmul.f32 0.35355338, %v4080_v50  ;;  %v5555_v15 = vpop.f32.mrb[85].mxu1 }
0x2206   :  { %v4083_v18 = vpop.f32.mrb[86].mxu1 }
0x2207   :  { %v4089_v52 = vsel %vm6151_vm7, %v4087_v51, -1e+30  ;;  %v4088_v53 = vmul.f32 0.35355338, %v4083_v18  ;;  %v5556_v55 = vpop.f32.mrb[87].mxu1 }
0x2208   :  { %v4091_v56 = vsel %vm233_vm8, %v4089_v52, -inf }
0x2209   :  { %v4090_v58 = vsel %vm6155_vm9, %v4088_v53, -1e+30  ;;  %4092 = vmax.xlane.f32.xlu0 %v4091_v56 }
0x220a   :  { %v4094_v59 = vsel %vm233_vm8, %v4090_v58, -inf }
0x220b   :  { %4095 = vmax.xlane.f32.xlu1 %v4094_v59 }
0x228e   :  { %v3741_v60 = vpop.xlane.xlu1 %3740 }
0x228f   :  { %v3745_v43 = vsub.f32 %v3737_v38, %v3741_v60 }
0x2290   :  { %v3744_v46 = vpop.xlane.xlu0 %3743 }
0x2291   :  { %v3747_v62 = vmul.f32 1.442695, %v3745_v43  ;;  %v3746_v63 = vsub.f32 %v3738_v45, %v3744_v46 }
0x2293   :  { %5952 = vpow2.f32 %v3747_v62  ;;  %v3749_v30 = vmul.f32 1.442695, %v3746_v63 }
0x2295   :  { %5954 = vpow2.f32 %v3749_v30 }
0x2296   :  { %v4093_v33 = vpop.xlane.xlu0 %4092 }
0x2297   :  { %v4097_v2 = vsub.f32 %v4089_v52, %v4093_v33 }
0x2298   :  { %v4096_v3 = vpop.xlane.xlu1 %4095 }
0x2299   :  { %v4099_v4 = vmul.f32 1.442695, %v4097_v2  ;;  %v4098_v5 = vsub.f32 %v4090_v58, %v4096_v3  ;;  %v4978_v58 = vld [vmem:[%s7099_s2 + $0x60] sm:$0xff] }
0x229a   :  { %v3809_v59 = vpack.c.bf16 %v4978_v58, %v4978_v58 }
0x229b   :  { %5956 = vpow2.f32 %v4099_v4  ;;  %v4101_v7 = vmul.f32 1.442695, %v4098_v5 }
0x229c   :  { %v3815_v60 = vsel %vm309_vm10, %v3809_v59, 0 }
0x229d   :  { %v5953_v9 = vpop.eup %5952  ;;  %5958 = vpow2.f32 %v4101_v7 }
0x229e   :  { %v3751_v10 = vsel %vm233_vm8, %v5953_v9, 0.0 }
0x229f   :  { %v5955_v11 = vpop.eup %5954  ;;  %3752 = vadd.xlane.f32.xlu0 %v3751_v10 }
0x22a0   :  { %v3754_v47 = vsel %vm233_vm8, %v5955_v11, 0.0 }
0x22a1   :  { %3755 = vadd.xlane.f32.xlu1 %v3754_v47 }
0x22a5   :  { %v5957_v12 = vpop.eup %5956 }
0x22a6   :  { %v4103_v13 = vsel %vm233_vm8, %v5957_v12, 0.0 }
0x22a7   :  { %v5959_v14 = vpop.eup %5958  ;;  %4104 = vadd.xlane.f32.xlu1 %v4103_v13 }
0x22a8   :  { %v4106_v16 = vsel %vm233_vm8, %v5959_v14, 0.0 }
0x22ab   :  { %4107 = vadd.xlane.f32.xlu1 %v4106_v16 }
0x22b5   :  { %3762 = vrot.lane.b32.xlu0 %v6869_v0, %s6035_s15 }
0x22b9   :  { %4214 = vrot.lane.b32.xlu0 %v6869_v0, %s6036_s16 }
0x22bc   :  { %4114 = vrot.lane.b32.xlu1 %v6869_v0, %s6038_s18 }
0x22bd   :  { %4212 = vrot.lane.b32.xlu0 %v6869_v0, %s6037_s17 }
0x22dc   :  { %3919 = vmax.xlane.f32.xlu0 %v3918_v22 }
0x22e0   :  { %3916 = vmax.xlane.f32.xlu1 %v3915_v24 }
0x232c   :  { %v3753_v25 = vpop.xlane.xlu0 %3752 }
0x232d   :  { %5960 = vrcp.f32 %v3753_v25 }
0x232e   :  { %v3756_v54 = vpop.xlane.xlu1 %3755 }
0x232f   :  { %5962 = vrcp.f32 %v3756_v54 }
0x2330   :  { %v3763_v57 = vpop.permute.xlu0 %3762 }
0x2331   :  { %5522 = vmatpush3.bf16.msra.mxu0 %v3763_v57 }
0x2332   :  { %5527 = vmatprep.subr.bf16.mxu0 %v6028_v8 }
0x2334   :  { %v4105_v28 = vpop.xlane.xlu1 %4104  ;;  %v4215_v39 = vpop.permute.xlu0 %4214 }
0x2335   :  { %5964 = vrcp.f32 %v4105_v28  ;;  %v4220_v41 = vsel %vm181_vm2, %v4215_v39, 0  ;;  %v4979_v28 = vld [vmem:[%s7099_s2 + $0x68] sm:$0xff] }
0x2337   :  { %v5961_v29 = vpop.eup %5960 }
0x2338   :  { %v4108_v31 = vpop.xlane.xlu1 %4107  ;;  %v3759_v34 = vmul.f32 %v5961_v29, %v5953_v9  ;;  %v4213_v42 = vpop.permute.xlu0 %4212  ;;  %v3985_v29 = vpack.c.bf16 %v4979_v28, %v4979_v28 }
0x2339   :  { %v5963_v32 = vpop.eup %5962  ;;  %5966 = vrcp.f32 %v4108_v31 }
0x233a   :  { %v3760_v35 = vmul.f32 %v5963_v32, %v5955_v11  ;;  %v3991_v31 = vsel %vm309_vm10, %v3985_v29, 0 }
0x233c   :  { %v4115_v6 = vpop.permute.xlu1 %4114  ;;  %v3761_v36 = vpack.c.bf16 %v3760_v35, %v3759_v34 }
0x233d   :  { %5558 = vmatpush3.bf16.msra.mxu1 %v4115_v6 }
0x233e   :  { %5524 = vmatmul.mubr.msk.bf16.vlgmr.msra.gmra.mrb[84].mxu0 %vm233_vm8, %v3761_v36  ;;  %5569 = vmatprep.subr.bf16.mxu1 %v6028_v8 }
0x233f   :  { %5529 = vmatprep.mubr.msk.bf16.mxu0 %vm6029_vm1, %v6028_v8  ;;  %v5965_v37 = vpop.eup %5964  ;;  %5528 = vmatpush3.bf16.msra.mxu0 %v3815_v60 }
0x2340   :  { %v4111_v23 = vmul.f32 %v5965_v37, %v5957_v12  ;;  %5539 = vmatprep.subr.bf16.mxu0 %v6028_v8 }
0x2343   :  { %v5967_v21 = vpop.eup %5966 }
0x2344   :  { %v4112_v38 = vmul.f32 %v5967_v21, %v5959_v14 }
0x2346   :  { %v4113_v40 = vpack.c.bf16 %v4112_v38, %v4111_v23  ;;  %v4980_v38 = vld [vmem:[%s7099_s2 + $0x70] sm:$0xff] }
0x2347   :  { %v4161_v39 = vpack.c.bf16 %v4980_v38, %v4980_v38  ;;  %v5772_v38 = vld [vmem:[%s7101_s4 + $0x1e0] sm:$0xff]  }
0x2348   :  { %5560 = vmatmul.mubr.msk.bf16.vlgmr.msra.gmra.mrb[88].mxu1 %vm233_vm8, %v4113_v40 }
0x2349   :  { %5570 = vmatpush3.bf16.xpose.msra.mxu1 %v4220_v41  ;;  %5571 = vmatprep.mubr.msk.bf16.mxu1 %vm6029_vm1, %v6028_v8 }
0x2350   :  { %5572 = vmatmul.mubr.msk.bf16.vlgmr.msra.gmra.mrb[92].mxu1 %vm181_vm2, %v4213_v42 }
0x2351   :  { %4488 = vmatprep.mubr.bf16.mxu1 %v6041_v27 }
0x2369   :  { %v3920_v45 = vpop.xlane.xlu0 %3919 }
0x236a   :  { %v3922_v49 = vsub.f32 %v3914_v20, %v3920_v45 }
0x236c   :  { %v3925_v50 = vmul.f32 1.442695, %v3922_v49 }
0x236d   :  { %v3917_v51 = vpop.xlane.xlu1 %3916 }
0x236e   :  { %5968 = vpow2.f32 %v3925_v50  ;;  %v3921_v15 = vsub.f32 %v3913_v1, %v3917_v51  ;;  %v4167_v50 = vsel %vm309_vm10, %v4161_v39, 0  ;;  %v5773_v39 = vld [vmem:[%s7101_s4 + $0x1a0] sm:$0xff]  }
0x2370   :  { %v3923_v18 = vmul.f32 1.442695, %v3921_v15 }
0x2372   :  { %5970 = vpow2.f32 %v3923_v18  ;;  %v4981_v18 = vld [vmem:[%s7099_s2 + $0x78] sm:$0xff] }
0x2378   :  { %v5969_v52 = vpop.eup %5968 }
0x2379   :  { %v3930_v53 = vsel %vm233_vm8, %v5969_v52, 0.0 }
0x237a   :  { %3931 = vadd.xlane.f32.xlu1 %v3930_v53  ;;  %v4337_v53 = vpack.c.bf16 %v4981_v18, %v4981_v18 }
0x237c   :  { %v5971_v55 = vpop.eup %5970  ;;  %v4343_v60 = vsel %vm309_vm10, %v4337_v53, 0 }
0x237d   :  { %v3927_v56 = vsel %vm233_vm8, %v5971_v55, 0.0 }
0x237e   :  { %3928 = vadd.xlane.f32.xlu0 %v3927_v56 }
0x2394   :  { %3938 = vrot.lane.b32.xlu0 %v6869_v0, %s6039_s19 }
0x2407   :  { %v3932_v43 = vpop.xlane.xlu1 %3931 }
0x240b   :  { %v3929_v46 = vpop.xlane.xlu0 %3928 }
0x240c   :  { %5972 = vrcp.f32 %v3929_v46 }
0x240d   :  { %5974 = vrcp.f32 %v3932_v43 }
0x240f   :  { %v3939_v4 = vpop.permute.xlu0 %3938 }
0x2411   :  { %v3802_v62 = vpop.f32.mrb[84].mxu0 }
0x2412   :  { %v5525_v63 = vpop.f32.mrb[85].mxu0 }
0x2413   :  { %v3805_v30 = vpop.f32.mrb[86].mxu0 }
0x2414   :  { %v3810_v33 = vpack.c.bf16 %v3805_v30, %v3802_v62  ;;  %v5526_v2 = vpop.f32.mrb[87].mxu0 }
0x2416   :  { %v5973_v3 = vpop.eup %5972  ;;  %5530 = vmatmul.mubr.msk.bf16.vlgmr.msra.gmra.mrb[88].mxu0 %vm181_vm2, %v3810_v33 }
0x2417   :  { %v5975_v5 = vpop.eup %5974  ;;  %5540 = vmatpush3.bf16.msra.mxu0 %v3939_v4  ;;  %5541 = vmatprep.mubr.msk.bf16.mxu0 %vm6029_vm1, %v6028_v8  ;;  %v3935_v7 = vmul.f32 %v5973_v3, %v5971_v55 }
0x2418   :  { %5545 = vmatprep.subr.bf16.mxu0 %v6028_v8  ;;  %v3936_v9 = vmul.f32 %v5975_v5, %v5969_v52 }
0x241a   :  { %v3937_v47 = vpack.c.bf16 %v3936_v9, %v3935_v7 }
0x241b   :  { %v4154_v10 = vpop.f32.mrb[88].mxu1 }
0x241c   :  { %v5561_v11 = vpop.f32.mrb[89].mxu1 }
0x241d   :  { %v4157_v12 = vpop.f32.mrb[90].mxu1 }
0x241e   :  { %v4162_v13 = vpack.c.bf16 %v4157_v12, %v4154_v10  ;;  %5542 = vmatmul.mubr.msk.bf16.vlgmr.msra.gmra.mrb[92].mxu0 %vm233_vm8, %v3937_v47  ;;  %v5562_v14 = vpop.f32.mrb[91].mxu1  ;;  %v5757_v47 = vld [vmem:[%s7100_s3 + $0xe4] ss:$16 sps:$4 sm:$0xff]   ;;  %v5755_v12 = vld [vmem:[%s7100_s3 + $0xe0] ss:$16 sps:$4 sm:$0xff]  }
0x241f   :  { %5547 = vmatprep.mubr.msk.bf16.mxu0 %vm6029_vm1, %v6028_v8  ;;  %5546 = vmatpush3.bf16.msra.mxu0 %v3991_v31  ;;  %v5758_v31 = vld [vmem:[%s7100_s3 + $0xc8] ss:$16 sps:$4 sm:$0xff]  }
0x2420   :  { %5563 = vmatprep.subr.bf16.mxu0 %v6028_v8 }
0x2423   :  { %v4256_v16 = vpop.f32.mrb[92].mxu1 }
0x2424   :  { %v4263_v17 = vmul.f32 0.35355338, %v4256_v16  ;;  %v5573_v19 = vpop.f32.mrb[93].mxu1 }
0x2425   :  { %v4259_v20 = vpop.f32.mrb[94].mxu1 }
0x2426   :  { %v4265_v22 = vsel %vm6151_vm7, %v4263_v17, -1e+30  ;;  %v4264_v1 = vmul.f32 0.35355338, %v4259_v20  ;;  %v5574_v24 = vpop.f32.mrb[95].mxu1 }
0x2427   :  { %v4267_v25 = vsel %vm233_vm8, %v4265_v22, -inf }
0x2428   :  { %v4266_v54 = vsel %vm6155_vm9, %v4264_v1, -1e+30  ;;  %4268 = vmax.xlane.f32.xlu1 %v4267_v25 }
0x2429   :  { %v4270_v57 = vsel %vm233_vm8, %v4266_v54, -inf }
0x242c   :  { %4271 = vmax.xlane.f32.xlu1 %v4270_v57 }
0x24b5   :  { %v4269_v44 = vpop.xlane.xlu1 %4268 }
0x24b6   :  { %v4273_v32 = vsub.f32 %v4265_v22, %v4269_v44 }
0x24b8   :  { %v4275_v34 = vmul.f32 1.442695, %v4273_v32  ;;  %v5763_v32 = vld [vmem:[%s7100_s3 + $0xec] ss:$16 sps:$4 sm:$0xff]  }
0x24b9   :  { %v4272_v35 = vpop.xlane.xlu1 %4271 }
0x24ba   :  { %5976 = vpow2.f32 %v4275_v34  ;;  %v4274_v48 = vsub.f32 %v4266_v54, %v4272_v35  ;;  %v5040_v54 = vld [vmem:[%s7103_s6 + $0x3] ss:$0 sm:$0xff]  ;;  %v5761_v34 = vld [vmem:[%s7100_s3 + $0xe8] ss:$16 sps:$4 sm:$0xff]  }
0x24bb   :  { %v5764_v35 = vld [vmem:[%s7101_s4 + $0x1c0] sm:$0xff]  }
0x24bc   :  { %v4277_v6 = vmul.f32 1.442695, %v4274_v48  ;;  %v5765_v48 = vld [vmem:[%s7101_s4 + $0x180] sm:$0xff]  }
0x24be   :  { %5978 = vpow2.f32 %v4277_v6  ;;  %v5766_v6 = vld [vmem:[%s7101_s4 + $0x1c8] sm:$0xff]  }
0x24c4   :  { %v5977_v36 = vpop.eup %5976 }
0x24c5   :  { %v4279_v37 = vsel %vm233_vm8, %v5977_v36, 0.0 }
0x24c6   :  { %4280 = vadd.xlane.f32.xlu1 %v4279_v37  ;;  %v5769_v37 = vld [vmem:[%s7101_s4 + $0x190] sm:$0xff]  }
0x24c8   :  { %v5979_v21 = vpop.eup %5978 }
0x24c9   :  { %v4282_v23 = vsel %vm233_vm8, %v5979_v21, 0.0 }
0x24ca   :  { %4283 = vadd.xlane.f32.xlu1 %v4282_v23  ;;  %v5771_v23 = vld [vmem:[%s7101_s4 + $0x198] sm:$0xff]  }
0x24db   :  { %4290 = vrot.lane.b32.xlu1 %v6869_v0, %s6040_s24 }
0x24f1   :  { %v3978_v40 = vpop.f32.mrb[92].mxu0 }
0x24f2   :  { %v5543_v41 = vpop.f32.mrb[93].mxu0 }
0x24f3   :  { %v3981_v42 = vpop.f32.mrb[94].mxu0  ;;  %v5775_v41 = vld [vmem:[%s7101_s4 + $0x1a8] sm:$0xff]  }
0x24f4   :  { %v3986_v45 = vpack.c.bf16 %v3981_v42, %v3978_v40  ;;  %v5544_v49 = vpop.f32.mrb[95].mxu0  ;;  %v5774_v40 = vld [vmem:[%s7101_s4 + $0x1e8] sm:$0xff]   ;;  %v5776_v42 = vld [vmem:[%s7101_s4 + $0x1f0] sm:$0xff]  }
0x24f5   :  { %v5778_v49 = vld [vmem:[%s7101_s4 + $0x1f8] sm:$0xff]  }
0x24f6   :  { %5548 = vmatmul.mubr.msk.bf16.vlgmr.msra.gmra.mrb[88].mxu0 %vm181_vm2, %v3986_v45  ;;  %v5777_v45 = vld [vmem:[%s7101_s4 + $0x1b0] sm:$0xff]  }
0x24f7   :  { %5564 = vmatpush3.bf16.msra.mxu0 %v4167_v50  ;;  %5565 = vmatprep.mubr.msk.bf16.mxu0 %vm6029_vm1, %v6028_v8  ;;  %v5779_v50 = vld [vmem:[%s7101_s4 + $0x1b8] sm:$0xff]  }
0x24f8   :  { %5575 = vmatprep.subr.bf16.mxu0 %v6028_v8 }
0x2502   :  { %5566 = vmatmul.mubr.msk.bf16.vlgmr.msra.gmra.mrb[88].mxu0 %vm181_vm2, %v4162_v13  ;;  %v5760_v13 = vld [vmem:[%s7100_s3 + $0xcc] ss:$16 sps:$4 sm:$0xff]  }
0x2503   :  { %5577 = vmatprep.mubr.msk.bf16.mxu0 %vm6029_vm1, %v6028_v8 }
0x2553   :  { %v4281_v0 = vpop.xlane.xlu1 %4280 }
0x2554   :  { %5980 = vrcp.f32 %v4281_v0 }
0x2557   :  { %v4284_v51 = vpop.xlane.xlu1 %4283 }
0x2558   :  { %5982 = vrcp.f32 %v4284_v51 }
0x255b   :  { %v4291_v15 = vpop.permute.xlu1 %4290 }
0x255c   :  { %5576 = vmatpush3.bf16.msra.mxu0 %v4291_v15 }
0x255d   :  { %5581 = vmatprep.subr.bf16.mxu0 %v6028_v8 }
0x255e   :  { %v5981_v52 = vpop.eup %5980 }
0x255f   :  { %v4287_v56 = vmul.f32 %v5981_v52, %v5977_v36  ;;  %v5768_v36 = vld [vmem:[%s7101_s4 + $0x1d0] sm:$0xff]  }
0x2562   :  { %v5983_v55 = vpop.eup %5982 }
0x2563   :  { %v4288_v58 = vmul.f32 %v5983_v55, %v5979_v21  ;;  %v5770_v21 = vld [vmem:[%s7101_s4 + $0x1d8] sm:$0xff]  }
0x2565   :  { %v4289_v59 = vpack.c.bf16 %v4288_v58, %v4287_v56 }
0x2567   :  { %5578 = vmatmul.mubr.msk.bf16.vlgmr.msra.gmra.mrb[96].mxu0 %vm233_vm8, %v4289_v59 }
0x2568   :  { %5582 = vmatpush3.bf16.msra.mxu0 %v4343_v60  ;;  %5583 = vmatprep.mubr.msk.bf16.mxu0 %vm6029_vm1, %v6028_v8 }
0x2569   :  { %5245 = vmatprep.subr.bf16.mxu0 %v5764_v35 }
0x263a   :  { %v4330_v43 = vpop.f32.mrb[96].mxu0 }
0x263b   :  { %v5579_v46 = vpop.f32.mrb[97].mxu0 }
0x263c   :  { %v4333_v62 = vpop.f32.mrb[98].mxu0 }
0x263d   :  { %v4338_v63 = vpack.c.bf16 %v4333_v62, %v4330_v43  ;;  %v5580_v30 = vpop.f32.mrb[99].mxu0 }
0x263f   :  { %5584 = vmatmul.mubr.msk.bf16.vlgmr.msra.gmra.mrb[88].mxu0 %vm181_vm2, %v4338_v63 }
0x2640   :  { %5246 = vmatpush3.bf16.msra.mxu0 %v5765_v48 }
0x2641   :  { %5247 = vmatprep.subr.bf16.mxu0 %v5766_v6 }
0x2712   :  { %v4379_v33 = vpop.f32.mrb[88].mxu0 }
0x2713   :  { %v6990_v2 = vadd.f32 %v4379_v33, %v6842_v26  ;;  %v5585_v3 = vpop.f32.mrb[89].mxu0  ;;  %v5754_v26 = vld [vmem:[%s7100_s3 + $0xc4] ss:$16 sps:$4 sm:$0xff]  }
0x2714   :  { %v4382_v4 = vpop.f32.mrb[90].mxu0  ;;  %4456 = vmatprep.subr.bf16.mxu1 %v5754_v26 }
0x2715   :  { %v6993_v5 = vadd.f32 %v4382_v4, %v6845_v61  ;;  %v5586_v7 = vpop.f32.mrb[91].mxu0  ;;  %v4388_v8 = vmul.f32 %v6990_v2, %v6990_v2  ;;  %v5752_v61 = vld [vmem:[%s7100_s3 + $0xc0] ss:$16 sps:$4 sm:$0xff]  }
0x2716   :  { %4457 = vmatpush1.bf16.msra.mxu1 %v5752_v61 }
0x2717   :  { %v4390_v9 = vsel %vm96_vm0, %v4388_v8, 0.0  ;;  %v4389_v10 = vmul.f32 %v6993_v5, %v6993_v5  ;;  %4458 = vmatprep.subr.bf16.mxu1 %v5757_v47 }
0x2718   :  { %4391 = vadd.xlane.f32.xlu0 %v4390_v9 }
0x2719   :  { %v4393_v11 = vsel %vm96_vm0, %v4389_v10, 0.0 }
0x271a   :  { %4394 = vadd.xlane.f32.xlu1 %v4393_v11  ;;  %4459 = vmatpush1.bf16.msra.mxu1 %v5755_v12 }
0x271b   :  { %4499 = vmatprep.subr.bf16.mxu1 %v5760_v13 }
0x27a5   :  { %v4392_v14 = vpop.xlane.xlu0 %4391 }
0x27a6   :  { %v4396_v16 = vmul.f32 0.03125, %v4392_v14 }
0x27a7   :  { %v4395_v17 = vpop.xlane.xlu1 %4394 }
0x27a8   :  { %v4398_v19 = vadd.f32 1e-05, %v4396_v16  ;;  %v4397_v20 = vmul.f32 0.03125, %v4395_v17 }
0x27aa   :  { %5984 = vrsqrt.f32 %v4398_v19  ;;  %v4399_v22 = vadd.f32 1e-05, %v4397_v20 }
0x27ac   :  { %5986 = vrsqrt.f32 %v4399_v22 }
0x27b4   :  { %v5985_v1 = vpop.eup %5984 }
0x27b5   :  { %v4402_v24 = vmul.f32 %v5985_v1, %v6990_v2 }
0x27b6   :  { %v5987_v25 = vpop.eup %5986 }
0x27b7   :  { %v4403_v57 = vmul.f32 %v5987_v25, %v6993_v5  ;;  %v4410_v28 = vmul.f32 %v5040_v54, %v4402_v24 }
0x27b9   :  { %v4411_v29 = vmul.f32 %v5040_v54, %v4403_v57 }
0x27bb   :  { %v4412_v44 = vpack.c.bf16 %v4411_v29, %v4410_v28 }
0x27bd   :  { %5049 = vmatmul.mubr.msk.bf16.vlgmr.msra.gmra.mrb[96].mxu1 %vm96_vm0, %v4412_v44 }
0x27be   :  { %4500 = vmatpush1.bf16.msra.mxu1 %v5758_v31  ;;  %4531 = vmatprep.mubr.bf16.mxu1 %v6041_v27  ;;  %v5767_v27 = vld [vmem:[%s7101_s4 + $0x188] sm:$0xff]   ;;  %s6042_s4 = smov [#allocation2]  }
0x27bf   :  { %4501 = vmatprep.subr.bf16.mxu1 %v5763_v32  ;;  %5248 = vmatpush3.bf16.msra.mxu0 %v5767_v27  ;;  %s4722_s5 = sshll.u32 %s6042_s4, 4  ;;  %s4723_s5 = int_to_ptr.vmem [resolvable:$true] %s4722_s5 }
0x27c0   :  { %5249 = vmatprep.subr.bf16.mxu0 %v5768_v36  ;;  %s6004_s10 = scalar_lea.vmem %s4723_s5, 256  ;;  %p6009_p1 = scmp.lt.s32.totalorder %s4723_s5, %s4723_s5 }
0x27c1   :  { %p6005_p0 = scmp.ne.s32.totalorder %s4723_s5, %s6004_s10  ;;  %p6010_p2 = scmp.lt.s32.totalorder %s6004_s10, %s6004_s10 }
0x27c2   :  { %4502 = vmatpush1.bf16.msra.mxu1 %v5761_v34 }
0x27c3   :  { %5250 = vmatpush3.bf16.msra.mxu0 %v5769_v37  ;;  %p6011_p3 = por %p6010_p2, %p6009_p1 }
0x27c4   :  { %5251 = vmatprep.subr.bf16.mxu0 %v5770_v21 }
0x27c5   :  { %5050 = vmatmul.mubr.msk.bf16.vlgmr.msra.gmra.mrb[100].mxu1 %vm96_vm0, %v4412_v44  ;;  %p6012_p4 = pnand %p6011_p3, %p6005_p0 }
0x27c7   :  { %5252 = vmatpush3.bf16.msra.mxu0 %v5771_v23 }
0x27c8   :  { %5253 = vmatprep.subr.bf16.mxu0 %v5772_v38 }
0x27cb   :  { %5254 = vmatpush3.bf16.msra.mxu0 %v5773_v39 }
0x27cc   :  { %5255 = vmatprep.subr.bf16.mxu0 %v5774_v40 }
0x27cf   :  { %5256 = vmatpush3.bf16.msra.mxu0 %v5775_v41 }
0x27d0   :  { %5257 = vmatprep.subr.bf16.mxu0 %v5776_v42 }
0x27d3   :  { %5258 = vmatpush3.bf16.msra.mxu0 %v5777_v45 }
0x27d4   :  { %5259 = vmatprep.subr.bf16.mxu0 %v5778_v49 }
0x27d7   :  { %5260 = vmatpush3.bf16.msra.mxu0 %v5779_v50 }
0x2890   :  { %v4490_v0 = vpop.f32.mrb[96].mxu1 }
0x2891   :  { %v5051_v51 = vmul.f32 -1.442695, %v4490_v0  ;;  %v4492_v15 = vpop.f32.mrb[97].mxu1 }
0x2892   :  { %v5052_v18 = vmul.f32 -1.442695, %v4492_v15  ;;  %v4494_v52 = vpop.f32.mrb[98].mxu1 }
0x2893   :  { %5988 = vpow2.f32 %v5051_v51  ;;  %v5053_v53 = vmul.f32 -1.442695, %v4494_v52  ;;  %v4496_v55 = vpop.f32.mrb[99].mxu1 }
0x2894   :  { %5990 = vpow2.f32 %v5052_v18  ;;  %v5054_v56 = vmul.f32 -1.442695, %v4496_v55 }
0x2895   :  { %5992 = vpow2.f32 %v5053_v53 }
0x2896   :  { %5994 = vpow2.f32 %v5054_v56 }
0x2898   :  { %v4533_v58 = vpop.f32.mrb[100].mxu1 }
0x2899   :  { %v4535_v59 = vpop.f32.mrb[101].mxu1 }
0x289a   :  { %v4537_v60 = vpop.f32.mrb[102].mxu1 }
0x289b   :  { %v4539_v43 = vpop.f32.mrb[103].mxu1 }
0x289d   :  { %v5989_v46 = vpop.eup %5988 }
0x289e   :  { %v5991_v62 = vpop.eup %5990  ;;  %v4554_v63 = vadd.f32 1.0, %v5989_v46 }
0x289f   :  { %v5993_v30 = vpop.eup %5992  ;;  %v4555_v33 = vadd.f32 1.0, %v5991_v62 }
0x28a0   :  { %v5995_v3 = vpop.eup %5994  ;;  %5996 = vrcp.f32 %v4554_v63  ;;  %v4556_v4 = vadd.f32 1.0, %v5993_v30 }
0x28a1   :  { %5998 = vrcp.f32 %v4555_v33  ;;  %v4557_v7 = vadd.f32 1.0, %v5995_v3 }
0x28a2   :  { %6000 = vrcp.f32 %v4556_v4 }
0x28a3   :  { %6002 = vrcp.f32 %v4557_v7 }
0x28aa   :  { %v5997_v8 = vpop.eup %5996 }
0x28ab   :  { %v5999_v9 = vpop.eup %5998  ;;  %v4566_v10 = vmul.f32 %v5997_v8, %v4490_v0 }
0x28ac   :  { %v6001_v11 = vpop.eup %6000  ;;  %v4567_v26 = vmul.f32 %v5999_v9, %v4492_v15 }
0x28ad   :  { %v6003_v61 = vpop.eup %6002  ;;  %v4568_v47 = vmul.f32 %v6001_v11, %v4494_v52  ;;  %v4570_v12 = vmul.f32 %v4566_v10, %v4533_v58 }
0x28ae   :  { %v4569_v13 = vmul.f32 %v6003_v61, %v4496_v55  ;;  %v4571_v14 = vmul.f32 %v4567_v26, %v4535_v59 }
0x28af   :  { %v4572_v16 = vmul.f32 %v4568_v47, %v4537_v60 }
0x28b0   :  { %v4573_v17 = vmul.f32 %v4569_v13, %v4539_v43 }
0x28b1   :  { %v4574_v19 = vpack.c.bf16 %v4572_v16, %v4570_v12 }
0x28b2   :  { %v4575_v20 = vpack.c.bf16 %v4573_v17, %v4571_v14 }
0x28b4   :  { %4704 = vmatprep.mubr.bf16.mxu0 %v4575_v20 }
0x28b5   :  { %4705 = vmatmul.mubr.bf16.vlgmr.msra.gmra.mrb[100].mxu0 %v4574_v19 }
0x2988   :  { %v5261_v22 = vpop.f32.mrb[100].mxu0 }
0x2989   :  { %v5262_v1 = vpop.f32.mrb[101].mxu0 }
0x298a   :  { %v5263_v24 = vadd.f32 %v5262_v1, %v5261_v22  ;;  %v5264_v25 = vpop.f32.mrb[102].mxu0 }
0x298b   :  { %v5265_v54 = vpop.f32.mrb[103].mxu0 }
0x298c   :  { %v4713_v57 = vadd.f32 %v6990_v2, %v5263_v24  ;;  %v5266_v28 = vadd.f32 %v5265_v54, %v5264_v25 }
0x298e   :  { %4715 = vst.msk [vmem:[#allocation2] sm:$0xff] %vm96_vm0, %v4713_v57  ;;  %v4714_v29 = vadd.f32 %v6993_v5, %v5266_v28 }
0x2990   :  { %4716 = vst.msk [vmem:[#allocation2 + $0x8] sm:$0xff] %vm96_vm0, %v4714_v29 }
0x2991   :  { %6015 = shalt.err (!%p6012_p4)
}
0x2992   :  { %s6016_s12 = scalar_lea.hbm %s7104_s7, 256 }
0x2993   :  { %p6017_p5 = scmp.ne.s32.totalorder %s7104_s7, %s6016_s12  ;;  %p6020_p6 = scmp.lt.u32.totalorder %s6016_s12, %s7104_s7 }
0x2995   :  { %p6022_p7 = pnand %p6020_p6, %p6017_p5 }
0x2997   :  { %6025 = shalt.err (!%p6022_p7)
}
0x2998   :  { %s6043_s16 = smov 128   ;;  %s6044_s17 = smov 8  }
0x2999   :  { %4728 = dma.vmem_to_hbm [thread:$0]  %s4723_s5, 256, %s7104_s7, [#allocation3], %s6043_s16, %s6043_s16, %s6044_s17  }
0x299a   :  { %6026 = dma.done.wait [#allocation3], 256  }
0x299b   :  { %6027 = vsyncadd [#allocation3], 4294967040 }
0x299c   :  { %4732 = vsyncpa [#allocation3], 1 }

</bundles_post_ra>
